<compile_context>
chip_gen: v7x
topology: tpu7x:2x2x1
jax: 0.10.0
libtpu: 0.0.40
codegen_flags: <defaults>
</compile_context>

<pallas_src>
import functools

import jax
import jax.numpy as jnp
import numpy as np
from jax.experimental import pallas as pl
from jax.experimental.pallas import tpu as pltpu

_EPS = 1e-5
_SLOPE = 0.2
_LANES = 128


# ----------------------------- helpers ---------------------------------------
def _round_up(v, m):
    return ((v + m - 1) // m) * m


@functools.lru_cache(maxsize=None)
def _vmem_limit_bytes():
    """Generation-aware scoped-VMEM limit (<=48 MiB on v7x, <=96 MiB on v5e/v6e)."""
    try:
        cap = int(pltpu.get_tpu_info().vmem_capacity_bytes)
    except Exception:                     # conservative fallback if query unavailable
        cap = 64 * 1024 * 1024
    return int(min(cap * 3 // 4, 96 * 1024 * 1024))


def _choose_tile_h(ho, wo, ci, cp, fuse_in):
    """Largest row-band height (multiple of 8, preferring divisors of ho) whose full
    working set — input band, halo, weights, bf16 output, im2col patch, f32 acc —
    fits a fraction of the scoped VMEM budget."""
    budget = int(_vmem_limit_bytes() * 0.7)
    wp = wo + 2

    def usage(th):
        x_in = 2 * th * wp * ci * 2               # main band, double-buffered, bf16
        halo = 2 * 2 * wp * ci * 2                # 2-row halo, double-buffered
        w_blk = 2 * 9 * ci * cp * 2               # folded weights (counted x2)
        y_out = 2 * th * wo * cp * 2              # bf16 output tile, double-buffered
        band = (th + 2) * wp * ci * 2             # concatenated band copy
        band32 = (th + 2) * wp * ci * 4 if fuse_in else 0   # fused affine in f32
        patch = th * wo * 9 * ci * 2              # local im2col operand
        acc = 2 * th * wo * cp * 4                # f32 accumulator + relayout temp
        return x_in + halo + w_blk + y_out + band + band32 + patch + acc

    best_div = best_fit = None
    cap = min(_round_up(ho, 8), 1024)
    th = 8
    while th <= cap:
        if usage(th) <= budget:
            best_fit = th
            if ho % th == 0:
                best_div = th
        th += 8
    return best_div or best_fit or 8              # th is always even (halo index needs it)


def _choose_tile_m(m, cp):
    """Row-tile for the final elementwise sweep; always respects the VMEM budget."""
    budget = int(_vmem_limit_bytes() * 0.6)
    per_row = cp * (2 * 2 + 2 * 4 + 8)            # bf16 in (x2) + f32 out (x2) + temps
    tm = max(8, (budget // per_row) // 8 * 8)
    return int(min(tm, _round_up(m, 8)))


# ----------------------------- Pallas kernels --------------------------------
def _conv_patch_matmul(x_ref, halo_ref, w_ref, aff_ref, *, th, wo, ci, fuse_in):
    """Folded-tap 3x3 conv of one row band: a single K = 9*ci MXU matmul.

    x_ref    (th,  wo+2, ci) bf16  main rows of the reflection-padded band
    halo_ref (2,   wo+2, ci) bf16  2-row bottom halo (same HBM array, 2nd BlockSpec)
    w_ref    (9*ci, cp)      bf16  (kh, kw, ci)-major folded weights
    aff_ref  (2, ci) f32 or None   previous layer's BN (scale, shift), fused in
    returns  (th*wo, cp)     f32
    """
    band = jnp.concatenate([x_ref[...], halo_ref[...]], axis=0)      # (th+2, wp, ci)
    if fuse_in:
        # Fused previous-layer BatchNorm affine + LeakyReLU on the input band
        # (elementwise per channel, so it commutes with the reflection padding).
        scale = aff_ref[0:1, :].reshape(1, 1, ci)
        shift = aff_ref[1:2, :].reshape(1, 1, ci)
        z = band.astype(jnp.float32) * scale + shift
        band = jnp.where(z > 0, z, _SLOPE * z).astype(jnp.bfloat16)
    taps = [band[kh:kh + th, kw:kw + wo, :] for kh in range(3) for kw in range(3)]
    patch = jnp.concatenate(taps, axis=-1).reshape(th * wo, 9 * ci)  # local im2col
    return jnp.dot(patch, w_ref[...], preferred_element_type=jnp.float32)


def _conv_bn_kernel(*refs, th, wo, ci, cp, fuse_in, mask_tail, ho):
    """Conv (+fused previous BN/act) -> bf16 pre-norm output + f32 BN partial sums."""
    if fuse_in:
        x_ref, halo_ref, w_ref, aff_ref, y_ref, stats_ref = refs
    else:
        x_ref, halo_ref, w_ref, y_ref, stats_ref = refs
        aff_ref = None
    acc = _conv_patch_matmul(x_ref, halo_ref, w_ref, aff_ref,
                             th=th, wo=wo, ci=ci, fuse_in=fuse_in)
    y_ref[...] = acc.reshape(th, wo, cp).astype(y_ref.dtype)
    if mask_tail:
        # Zero rows past the true output height before reducing (tail of last band).
        row = jax.lax.broadcasted_iota(jnp.int32, (th * wo, 1), 0) // wo
        acc = jnp.where(pl.program_id(1) * th + row < ho, acc, 0.0)
    # TODO(synk): switch to shifted/Welford partials if activations grow large
    # (single-pass f32 E[x^2]-E[x]^2 can lose precision at very large counts).
    stats_ref[0:1, :] = jnp.sum(acc, axis=0, keepdims=True)
    stats_ref[1:2, :] = jnp.sum(acc * acc, axis=0, keepdims=True)


def _conv_bias_act_kernel(x_ref, halo_ref, w_ref, b_ref, y_ref, *, th, wo, ci, cp):
    """No-BatchNorm path: conv + bias + LeakyReLU(0.2), stored in bf16."""
    acc = _conv_patch_matmul(x_ref, halo_ref, w_ref, None,
                             th=th, wo=wo, ci=ci, fuse_in=False)
    z = acc + b_ref[...]
    y_ref[...] = jnp.where(z > 0, z, _SLOPE * z).reshape(th, wo, cp).astype(y_ref.dtype)


def _bn_act_kernel(y_ref, aff_ref, o_ref):
    """Final layer only: y*scale + shift (folded BN affine) then LeakyReLU(0.2)."""
    z = y_ref[...].astype(jnp.float32) * aff_ref[0:1, :] + aff_ref[1:2, :]
    o_ref[...] = jnp.where(z > 0, z, _SLOPE * z)


# ------------------------------ one conv layer --------------------------------
def _conv_layer(x_nhwc, aff_in, w, b, gamma, beta, padding, use_bn):
    """One [ReflectionPad -> Conv3x3 (-> BN stats)] layer on lane-padded NHWC bf16.

    x_nhwc : (N, H, W, ci) bf16 (ci already the padded channel count of the chain).
    aff_in : None or (2, ci) f32 -- previous layer's BN (scale, shift) fused (with
             LeakyReLU) into this layer's conv input (BN path, layers >= 2).
    Returns (y, aff_out): y (N, Ho, Wo, cp) bf16 is the pre-norm conv output in the BN
    path (post-activation in the no-BN path); aff_out is this layer's (scale, shift)
    in the BN path, else None.
    """
    p = int(padding)
    n, h, wd, ci = x_nhwc.shape
    c_out = w.shape[0]
    cp = _round_up(c_out, _LANES)

    # Reflection pad (pure data movement; commutes with the fused per-channel affine).
    xp = jnp.pad(x_nhwc, ((0, 0), (p, p), (p, p), (0, 0)), mode="reflect")
    hp, wp = h + 2 * p, wd + 2 * p
    ho, wo = hp - 2, wp - 2

    fuse_in = bool(use_bn and (aff_in is not None))
    th = _choose_tile_h(ho, wo, ci, cp, fuse_in)
    nb = (ho + th - 1) // th
    mask_tail = (nb * th != ho)
    hp_needed = nb * th + 2
    if hp_needed > hp:          # zero tail so every input block stays fully in-bounds
        xp = jnp.pad(xp, ((0, 0), (0, hp_needed - hp), (0, 0), (0, 0)))

    # PyTorch (O, I, 3, 3) -> (kh, kw, I, O); zero-pad I->ci and O->cp; fold taps.
    wmat = jnp.transpose(w, (2, 3, 1, 0))
    wmat = jnp.pad(wmat, ((0, 0), (0, 0), (0, ci - w.shape[1]), (0, cp - c_out)))
    wmat = wmat.reshape(9 * ci, cp).astype(jnp.bfloat16)

    x_spec = pl.BlockSpec((None, th, wp, ci), lambda bb, i: (bb, i, 0, 0))
    halo_spec = pl.BlockSpec((None, 2, wp, ci),
                             lambda bb, i: (bb, (i + 1) * (th // 2), 0, 0))
    w_spec = pl.BlockSpec((9 * ci, cp), lambda bb, i: (0, 0))
    y_spec = pl.BlockSpec((None, th, wo, cp), lambda bb, i: (bb, i, 0, 0))
    cparams = pltpu.CompilerParams(
        dimension_semantics=("parallel", "parallel"),
        vmem_limit_bytes=_vmem_limit_bytes())

    if use_bn:
        in_specs = [x_spec, halo_spec, w_spec]
        operands = [xp, xp, wmat]
        if fuse_in:
            in_specs.append(pl.BlockSpec((2, ci), lambda bb, i: (0, 0)))
            operands.append(aff_in)
        y, stats = pl.pallas_call(
            functools.partial(_conv_bn_kernel, th=th, wo=wo, ci=ci, cp=cp,
                              fuse_in=fuse_in, mask_tail=mask_tail, ho=ho),
            grid=(n, nb),
            in_specs=in_specs,
            out_specs=(y_spec,
                       pl.BlockSpec((None, None, 2, cp), lambda bb, i: (bb, i, 0, 0))),
            out_shape=(jax.ShapeDtypeStruct((n, ho, wo, cp), jnp.bfloat16),
                       jax.ShapeDtypeStruct((n, nb, 2, cp), jnp.float32)),
            compiler_params=cparams,
        )(*operands)

        # Tiny per-channel finalisation (biased variance, BN training mode).
        # Conv bias is skipped: it is cancelled exactly by the mean subtraction.
        cnt = jnp.float32(n * ho * wo)
        tot = jnp.sum(stats, axis=(0, 1))                       # (2, cp)
        mean = tot[0] / cnt
        var = jnp.maximum(tot[1] / cnt - mean * mean, 0.0)
        g = jnp.pad(gamma.astype(jnp.float32), (0, cp - c_out))
        bt = jnp.pad(beta.astype(jnp.float32), (0, cp - c_out))
        scale = g * jax.lax.rsqrt(var + _EPS)
        shift = bt - mean * scale
        return y, jnp.stack([scale, shift])                     # (2, cp) f32

    bias = jnp.pad(b.astype(jnp.float32), (0, cp - c_out)).reshape(1, cp)
    y = pl.pallas_call(
        functools.partial(_conv_bias_act_kernel, th=th, wo=wo, ci=ci, cp=cp),
        grid=(n, nb),
        in_specs=[x_spec, halo_spec, w_spec,
                  pl.BlockSpec((1, cp), lambda bb, i: (0, 0))],
        out_specs=y_spec,
        out_shape=jax.ShapeDtypeStruct((n, ho, wo, cp), jnp.bfloat16),
        compiler_params=cparams,
    )(xp, xp, wmat, bias)
    return y, None


def _apply_bn_act(y, aff):
    """Final layer only: lane-dense elementwise BN affine + LeakyReLU sweep."""
    n, ho, wo, cp = y.shape
    m = n * ho * wo
    tm = _choose_tile_m(m, cp)
    out = pl.pallas_call(
        _bn_act_kernel,
        grid=((m + tm - 1) // tm,),
        in_specs=[pl.BlockSpec((tm, cp), lambda i: (i, 0)),
                  pl.BlockSpec((2, cp), lambda i: (0, 0))],
        out_specs=pl.BlockSpec((tm, cp), lambda i: (i, 0)),
        out_shape=jax.ShapeDtypeStruct((m, cp), jnp.float32),
        compiler_params=pltpu.CompilerParams(
            dimension_semantics=("parallel",),
            vmem_limit_bytes=_vmem_limit_bytes()),
    )(y.reshape(m, cp), aff)
    return out.reshape(n, ho, wo, cp)


# ------------------------------ full block ------------------------------------
def unet_conv_block(x_nchw, params, padding, batch_norm):
    """params: list of (weight (O,I,3,3), bias (O,), gamma (O,), beta (O,))."""
    x = jnp.transpose(x_nchw, (0, 2, 3, 1)).astype(jnp.bfloat16)    # NCHW -> NHWC bf16
    aff = None
    c_out = x.shape[-1]
    for (w, b, gamma, beta) in params:
        x, aff = _conv_layer(x, aff, w, b, gamma, beta, padding, batch_norm)
        c_out = w.shape[0]
    if batch_norm:
        x = _apply_bn_act(x, aff)        # last layer's BN affine + LeakyReLU, f32
    else:
        x = x.astype(jnp.float32)
    # Single channel un-pad at the very end of the block, fused with NHWC -> NCHW.
    return jnp.transpose(x[..., :c_out], (0, 3, 1, 2))


# --------------------------- pure-JAX reference -------------------------------
def _reference_block(x_nchw, params, padding, batch_norm):
    """Same math as the PyTorch module, mirroring the kernel's precision policy
    (bf16 conv operands, bf16 inter-layer storage, f32 accumulation / BN stats)."""
    p = int(padding)
    x = x_nchw.astype(jnp.float32)
    for (w, b, gamma, beta) in params:
        xi = x.astype(jnp.bfloat16)                               # stored / conv-lhs bf16
        xp = jnp.pad(xi, ((0, 0), (0, 0), (p, p), (p, p)), mode="reflect")
        y = jax.lax.conv_general_dilated(
            xp, w.astype(jnp.bfloat16), window_strides=(1, 1), padding="VALID",
            dimension_numbers=("NCHW", "OIHW", "NCHW"),
            preferred_element_type=jnp.float32)
        if batch_norm:
            mean = jnp.mean(y, axis=(0, 2, 3), keepdims=True)
            var = jnp.mean((y - mean) ** 2, axis=(0, 2, 3), keepdims=True)
            scale = gamma[None, :, None, None] * jax.lax.rsqrt(var + _EPS)
            shift = beta[None, :, None, None] - mean * scale
            yb = y.astype(jnp.bfloat16).astype(jnp.float32)       # bf16 inter-layer store
            z = yb * scale + shift                                # (conv bias cancels)
        else:
            z = y + b[None, :, None, None]
        x = jnp.where(z > 0, z, _SLOPE * z)
    return x


# ------------------------------ parameter init --------------------------------
def init_params(key, conv_num, in_size, out_size):
    params = []
    c_in = in_size
    for _ in range(conv_num):
        key, kw, kb = jax.random.split(key, 3)
        w = 0.1 * jax.random.normal(kw, (out_size, c_in, 3, 3), dtype=jnp.float32)
        b = 0.05 * jax.random.normal(kb, (out_size,), dtype=jnp.float32)
        gamma = 1.0 + 0.1 * jnp.arange(out_size, dtype=jnp.float32)
        beta = 0.01 * jnp.arange(out_size, dtype=jnp.float32)
        params.append((w, b, gamma, beta))
        c_in = out_size
    return params


# ------------------------------------ main ------------------------------------
if __name__ == "__main__":
    conv_num, in_size, out_size, padding = 2, 4, 8, 1

    key = jax.random.PRNGKey(0)
    key, kx = jax.random.split(key)
    x = jax.random.normal(kx, (2, in_size, 16, 16), dtype=jnp.float32)   # NCHW
    params = init_params(key, conv_num, in_size, out_size)

    for batch_norm in (True, False):
        fwd = jax.jit(functools.partial(unet_conv_block,
                                        padding=padding, batch_norm=batch_norm))
        out = jax.block_until_ready(fwd(x, params))
        ref = jax.block_until_ready(
            _reference_block(x, params, padding, batch_norm))
        assert out.shape == (2, out_size, 16, 16), out.shape
        np.testing.assert_allclose(np.asarray(out, dtype=np.float32),
                                   np.asarray(ref, dtype=np.float32),
                                   rtol=2e-2, atol=2e-2)

    print("KERNEL_OK")
</pallas_src>

<mosaic_0001>
module attributes {stable_mosaic.version = 11 : i64} {
  func.func @_conv_bn_kernel(%arg0: i32, %arg1: i32, %arg2: memref<1x16x18x4xbf16, #tpu.memory_space<vmem>>, %arg3: memref<1x2x18x4xbf16, #tpu.memory_space<vmem>>, %arg4: memref<36x128xbf16, #tpu.memory_space<vmem>>, %arg5: memref<1x16x16x128xbf16, #tpu.memory_space<vmem>>, %arg6: memref<1x1x2x128xf32, #tpu.memory_space<vmem>>) attributes {dimension_semantics = [#tpu.dimension_semantics<parallel>, #tpu.dimension_semantics<parallel>], iteration_bounds = array<i64: 2, 1>, scalar_prefetch = 0 : i64, scratch_operands = 0 : i64, tpu.core_type = #tpu.core_type<tc>, window_params = [{transform_indices = @transform_0, window_bounds = array<i64: 1, 16, 18, 4>}, {transform_indices = @transform_1, window_bounds = array<i64: 1, 2, 18, 4>}, {pipeline_mode = #tpu.pipeline_mode<synchronous>, transform_indices = @transform_2, window_bounds = array<i64: 36, 128>}, {transform_indices = @transform_3, window_bounds = array<i64: 1, 16, 16, 128>}, {transform_indices = @transform_4, window_bounds = array<i64: 1, 1, 2, 128>}]} {
    %c0 = arith.constant 0 : index
    %c0_0 = arith.constant 0 : index
    %c0_1 = arith.constant 0 : index
    %c0_2 = arith.constant 0 : index
    %0 = vector.load %arg2[%c0, %c0_0, %c0_1, %c0_2] : memref<1x16x18x4xbf16, #tpu.memory_space<vmem>>, vector<1x16x18x4xbf16>
    %1 = vector.shape_cast %0 : vector<1x16x18x4xbf16> to vector<16x18x4xbf16>
    %c0_3 = arith.constant 0 : index
    %c0_4 = arith.constant 0 : index
    %c0_5 = arith.constant 0 : index
    %c0_6 = arith.constant 0 : index
    %2 = vector.load %arg3[%c0_3, %c0_4, %c0_5, %c0_6] : memref<1x2x18x4xbf16, #tpu.memory_space<vmem>>, vector<1x2x18x4xbf16>
    %3 = vector.shape_cast %2 : vector<1x2x18x4xbf16> to vector<2x18x4xbf16>
    %4 = tpu.concatenate %1, %3 in 0 : vector<16x18x4xbf16>, vector<2x18x4xbf16> -> vector<18x18x4xbf16>
    %5 = vector.extract_strided_slice %4 {offsets = [0, 0, 0], sizes = [16, 16, 4], strides = [1, 1, 1]} : vector<18x18x4xbf16> to vector<16x16x4xbf16>
    %6 = vector.extract_strided_slice %4 {offsets = [0, 1, 0], sizes = [16, 16, 4], strides = [1, 1, 1]} : vector<18x18x4xbf16> to vector<16x16x4xbf16>
    %7 = vector.extract_strided_slice %4 {offsets = [0, 2, 0], sizes = [16, 16, 4], strides = [1, 1, 1]} : vector<18x18x4xbf16> to vector<16x16x4xbf16>
    %8 = vector.extract_strided_slice %4 {offsets = [1, 0, 0], sizes = [16, 16, 4], strides = [1, 1, 1]} : vector<18x18x4xbf16> to vector<16x16x4xbf16>
    %9 = vector.extract_strided_slice %4 {offsets = [1, 1, 0], sizes = [16, 16, 4], strides = [1, 1, 1]} : vector<18x18x4xbf16> to vector<16x16x4xbf16>
    %10 = vector.extract_strided_slice %4 {offsets = [1, 2, 0], sizes = [16, 16, 4], strides = [1, 1, 1]} : vector<18x18x4xbf16> to vector<16x16x4xbf16>
    %11 = vector.extract_strided_slice %4 {offsets = [2, 0, 0], sizes = [16, 16, 4], strides = [1, 1, 1]} : vector<18x18x4xbf16> to vector<16x16x4xbf16>
    %12 = vector.extract_strided_slice %4 {offsets = [2, 1, 0], sizes = [16, 16, 4], strides = [1, 1, 1]} : vector<18x18x4xbf16> to vector<16x16x4xbf16>
    %13 = vector.extract_strided_slice %4 {offsets = [2, 2, 0], sizes = [16, 16, 4], strides = [1, 1, 1]} : vector<18x18x4xbf16> to vector<16x16x4xbf16>
    %14 = tpu.concatenate %5, %6, %7, %8, %9, %10, %11, %12, %13 in 2 : vector<16x16x4xbf16>, vector<16x16x4xbf16>, vector<16x16x4xbf16>, vector<16x16x4xbf16>, vector<16x16x4xbf16>, vector<16x16x4xbf16>, vector<16x16x4xbf16>, vector<16x16x4xbf16>, vector<16x16x4xbf16> -> vector<16x16x36xbf16>
    %15 = vector.shape_cast %14 : vector<16x16x36xbf16> to vector<256x36xbf16>
    %c0_7 = arith.constant 0 : index
    %c0_8 = arith.constant 0 : index
    %16 = vector.load %arg4[%c0_7, %c0_8] : memref<36x128xbf16, #tpu.memory_space<vmem>>, vector<36x128xbf16>
    %cst = arith.constant dense<0.000000e+00> : vector<256x128xf32>
    %17 = tpu.matmul %15, %16, %cst {dimension_numbers = #tpu.dot_dimension_numbers<[1], [0], [0], [1], [0, 0, 1, 1], [], []>} : vector<256x36xbf16>, vector<36x128xbf16>, vector<256x128xf32> -> vector<256x128xf32>
    %18 = vector.shape_cast %17 : vector<256x128xf32> to vector<16x16x128xf32>
    %19 = arith.truncf %18 : vector<16x16x128xf32> to vector<16x16x128xbf16>
    %c0_9 = arith.constant 0 : index
    %c0_10 = arith.constant 0 : index
    %c0_11 = arith.constant 0 : index
    %c0_12 = arith.constant 0 : index
    %20 = vector.load %arg5[%c0_9, %c0_10, %c0_11, %c0_12] : memref<1x16x16x128xbf16, #tpu.memory_space<vmem>>, vector<1x16x16x128xbf16>
    %21 = vector.shape_cast %20 : vector<1x16x16x128xbf16> to vector<16x16x128xbf16>
    %22 = vector.shape_cast %19 : vector<16x16x128xbf16> to vector<1x16x16x128xbf16>
    tpu.vector_store %arg5[%c0_9, %c0_10, %c0_11, %c0_12], %22 {strides = array<i32>} : memref<1x16x16x128xbf16, #tpu.memory_space<vmem>>, vector<1x16x16x128xbf16>,
    %cst_13 = arith.constant dense<0.000000e+00> : vector<128xf32>
    %23 = vector.multi_reduction <add>, %17, %cst_13 [0] : vector<256x128xf32> to vector<128xf32>
    %24 = vector.shape_cast %23 : vector<128xf32> to vector<1x128xf32>
    %c0_14 = arith.constant 0 : index
    %c0_15 = arith.constant 0 : index
    %c0_16 = arith.constant 0 : index
    %c0_17 = arith.constant 0 : index
    %25 = vector.load %arg6[%c0_14, %c0_15, %c0_16, %c0_17] : memref<1x1x2x128xf32, #tpu.memory_space<vmem>>, vector<1x1x1x128xf32>
    %26 = vector.shape_cast %25 : vector<1x1x1x128xf32> to vector<1x128xf32>
    %27 = vector.shape_cast %24 : vector<1x128xf32> to vector<1x1x1x128xf32>
    tpu.vector_store %arg6[%c0_14, %c0_15, %c0_16, %c0_17], %27 {strides = array<i32>} : memref<1x1x2x128xf32, #tpu.memory_space<vmem>>, vector<1x1x1x128xf32>,
    %28 = arith.mulf %17, %17 : vector<256x128xf32>
    %cst_18 = arith.constant dense<0.000000e+00> : vector<128xf32>
    %29 = vector.multi_reduction <add>, %28, %cst_18 [0] : vector<256x128xf32> to vector<128xf32>
    %30 = vector.shape_cast %29 : vector<128xf32> to vector<1x128xf32>
    %c0_19 = arith.constant 0 : index
    %c0_20 = arith.constant 0 : index
    %c1 = arith.constant 1 : index
    %c0_21 = arith.constant 0 : index
    %31 = vector.load %arg6[%c0_19, %c0_20, %c1, %c0_21] : memref<1x1x2x128xf32, #tpu.memory_space<vmem>>, vector<1x1x1x128xf32>
    %32 = vector.shape_cast %31 : vector<1x1x1x128xf32> to vector<1x128xf32>
    %33 = vector.shape_cast %30 : vector<1x128xf32> to vector<1x1x1x128xf32>
    tpu.vector_store %arg6[%c0_19, %c0_20, %c1, %c0_21], %33 {strides = array<i32>} : memref<1x1x2x128xf32, #tpu.memory_space<vmem>>, vector<1x1x1x128xf32>,
    return
  }
  func.func @transform_0(%arg0: i32, %arg1: i32) -> (i32, i32, i32, i32) {
    %c0_i32 = arith.constant 0 : i32
    %c0_i32_0 = arith.constant 0 : i32
    %c0_i32_1 = arith.constant 0 : i32
    return %arg0, %arg1, %c0_i32, %c0_i32_0 : i32, i32, i32, i32
  }
  func.func @transform_1(%arg0: i32, %arg1: i32) -> (i32, i32, i32, i32) {
    %c1_i32 = arith.constant 1 : i32
    %0 = arith.addi %arg1, %c1_i32 : i32
    %c8_i32 = arith.constant 8 : i32
    %1 = arith.muli %0, %c8_i32 : i32
    %c0_i32 = arith.constant 0 : i32
    %c0_i32_0 = arith.constant 0 : i32
    %c0_i32_1 = arith.constant 0 : i32
    return %arg0, %1, %c0_i32, %c0_i32_0 : i32, i32, i32, i32
  }
  func.func @transform_2(%arg0: i32, %arg1: i32) -> (i32, i32) {
    %c0_i32 = arith.constant 0 : i32
    %c0_i32_0 = arith.constant 0 : i32
    %c0_i32_1 = arith.constant 0 : i32
    return %c0_i32, %c0_i32_0 : i32, i32
  }
  func.func @transform_3(%arg0: i32, %arg1: i32) -> (i32, i32, i32, i32) {
    %c0_i32 = arith.constant 0 : i32
    %c0_i32_0 = arith.constant 0 : i32
    %c0_i32_1 = arith.constant 0 : i32
    return %arg0, %arg1, %c0_i32, %c0_i32_0 : i32, i32, i32, i32
  }
  func.func @transform_4(%arg0: i32, %arg1: i32) -> (i32, i32, i32, i32) {
    %c0_i32 = arith.constant 0 : i32
    %c0_i32_0 = arith.constant 0 : i32
    %c0_i32_1 = arith.constant 0 : i32
    return %arg0, %arg1, %c0_i32, %c0_i32_0 : i32, i32, i32, i32
  }
}

module attributes {stable_mosaic.version = 11 : i64} {
  func.func @_conv_bn_kernel(%arg0: i32, %arg1: i32, %arg2: memref<1x16x18x128xbf16, #tpu.memory_space<vmem>>, %arg3: memref<1x2x18x128xbf16, #tpu.memory_space<vmem>>, %arg4: memref<1152x128xbf16, #tpu.memory_space<vmem>>, %arg5: memref<2x128xf32, #tpu.memory_space<vmem>>, %arg6: memref<1x16x16x128xbf16, #tpu.memory_space<vmem>>, %arg7: memref<1x1x2x128xf32, #tpu.memory_space<vmem>>) attributes {dimension_semantics = [#tpu.dimension_semantics<parallel>, #tpu.dimension_semantics<parallel>], iteration_bounds = array<i64: 2, 1>, scalar_prefetch = 0 : i64, scratch_operands = 0 : i64, tpu.core_type = #tpu.core_type<tc>, window_params = [{transform_indices = @transform_0, window_bounds = array<i64: 1, 16, 18, 128>}, {transform_indices = @transform_1, window_bounds = array<i64: 1, 2, 18, 128>}, {pipeline_mode = #tpu.pipeline_mode<synchronous>, transform_indices = @transform_2, window_bounds = array<i64: 1152, 128>}, {pipeline_mode = #tpu.pipeline_mode<synchronous>, transform_indices = @transform_3, window_bounds = array<i64: 2, 128>}, {transform_indices = @transform_4, window_bounds = array<i64: 1, 16, 16, 128>}, {transform_indices = @transform_5, window_bounds = array<i64: 1, 1, 2, 128>}]} {
    %c0 = arith.constant 0 : index
    %c0_0 = arith.constant 0 : index
    %c0_1 = arith.constant 0 : index
    %c0_2 = arith.constant 0 : index
    %0 = vector.load %arg2[%c0, %c0_0, %c0_1, %c0_2] : memref<1x16x18x128xbf16, #tpu.memory_space<vmem>>, vector<1x16x18x128xbf16>
    %1 = vector.shape_cast %0 : vector<1x16x18x128xbf16> to vector<16x18x128xbf16>
    %c0_3 = arith.constant 0 : index
    %c0_4 = arith.constant 0 : index
    %c0_5 = arith.constant 0 : index
    %c0_6 = arith.constant 0 : index
    %2 = vector.load %arg3[%c0_3, %c0_4, %c0_5, %c0_6] : memref<1x2x18x128xbf16, #tpu.memory_space<vmem>>, vector<1x2x18x128xbf16>
    %3 = vector.shape_cast %2 : vector<1x2x18x128xbf16> to vector<2x18x128xbf16>
    %4 = tpu.concatenate %1, %3 in 0 : vector<16x18x128xbf16>, vector<2x18x128xbf16> -> vector<18x18x128xbf16>
    %c0_7 = arith.constant 0 : index
    %c0_8 = arith.constant 0 : index
    %5 = vector.load %arg5[%c0_7, %c0_8] : memref<2x128xf32, #tpu.memory_space<vmem>>, vector<1x128xf32>
    %6 = vector.shape_cast %5 : vector<1x128xf32> to vector<1x1x128xf32>
    %c1 = arith.constant 1 : index
    %c0_9 = arith.constant 0 : index
    %7 = vector.load %arg5[%c1, %c0_9] : memref<2x128xf32, #tpu.memory_space<vmem>>, vector<1x128xf32>
    %8 = vector.shape_cast %7 : vector<1x128xf32> to vector<1x1x128xf32>
    %9 = arith.extf %4 : vector<18x18x128xbf16> to vector<18x18x128xf32>
    %10 = vector.broadcast %6 : vector<1x1x128xf32> to vector<18x18x128xf32>
    %11 = arith.mulf %9, %10 : vector<18x18x128xf32>
    %12 = vector.broadcast %8 : vector<1x1x128xf32> to vector<18x18x128xf32>
    %13 = arith.addf %11, %12 : vector<18x18x128xf32>
    %cst = arith.constant 0.000000e+00 : f32
    %14 = vector.broadcast %cst : f32 to vector<18x18x128xf32>
    %15 = arith.cmpf ogt, %13, %14 : vector<18x18x128xf32>
    %cst_10 = arith.constant 2.000000e-01 : f32
    %16 = vector.broadcast %cst_10 : f32 to vector<18x18x128xf32>
    %17 = arith.mulf %16, %13 : vector<18x18x128xf32>
    %18 = arith.select %15, %13, %17 : vector<18x18x128xi1>, vector<18x18x128xf32>
    %19 = arith.truncf %18 : vector<18x18x128xf32> to vector<18x18x128xbf16>
    %20 = vector.extract_strided_slice %19 {offsets = [0, 0, 0], sizes = [16, 16, 128], strides = [1, 1, 1]} : vector<18x18x128xbf16> to vector<16x16x128xbf16>
    %21 = vector.extract_strided_slice %19 {offsets = [0, 1, 0], sizes = [16, 16, 128], strides = [1, 1, 1]} : vector<18x18x128xbf16> to vector<16x16x128xbf16>
    %22 = vector.extract_strided_slice %19 {offsets = [0, 2, 0], sizes = [16, 16, 128], strides = [1, 1, 1]} : vector<18x18x128xbf16> to vector<16x16x128xbf16>
    %23 = vector.extract_strided_slice %19 {offsets = [1, 0, 0], sizes = [16, 16, 128], strides = [1, 1, 1]} : vector<18x18x128xbf16> to vector<16x16x128xbf16>
    %24 = vector.extract_strided_slice %19 {offsets = [1, 1, 0], sizes = [16, 16, 128], strides = [1, 1, 1]} : vector<18x18x128xbf16> to vector<16x16x128xbf16>
    %25 = vector.extract_strided_slice %19 {offsets = [1, 2, 0], sizes = [16, 16, 128], strides = [1, 1, 1]} : vector<18x18x128xbf16> to vector<16x16x128xbf16>
    %26 = vector.extract_strided_slice %19 {offsets = [2, 0, 0], sizes = [16, 16, 128], strides = [1, 1, 1]} : vector<18x18x128xbf16> to vector<16x16x128xbf16>
    %27 = vector.extract_strided_slice %19 {offsets = [2, 1, 0], sizes = [16, 16, 128], strides = [1, 1, 1]} : vector<18x18x128xbf16> to vector<16x16x128xbf16>
    %28 = vector.extract_strided_slice %19 {offsets = [2, 2, 0], sizes = [16, 16, 128], strides = [1, 1, 1]} : vector<18x18x128xbf16> to vector<16x16x128xbf16>
    %29 = tpu.concatenate %20, %21, %22, %23, %24, %25, %26, %27, %28 in 2 : vector<16x16x128xbf16>, vector<16x16x128xbf16>, vector<16x16x128xbf16>, vector<16x16x128xbf16>, vector<16x16x128xbf16>, vector<16x16x128xbf16>, vector<16x16x128xbf16>, vector<16x16x128xbf16>, vector<16x16x128xbf16> -> vector<16x16x1152xbf16>
    %30 = vector.shape_cast %29 : vector<16x16x1152xbf16> to vector<256x1152xbf16>
    %c0_11 = arith.constant 0 : index
    %c0_12 = arith.constant 0 : index
    %31 = vector.load %arg4[%c0_11, %c0_12] : memref<1152x128xbf16, #tpu.memory_space<vmem>>, vector<1152x128xbf16>
    %cst_13 = arith.constant dense<0.000000e+00> : vector<256x128xf32>
    %32 = tpu.matmul %30, %31, %cst_13 {dimension_numbers = #tpu.dot_dimension_numbers<[1], [0], [0], [1], [0, 0, 1, 1], [], []>} : vector<256x1152xbf16>, vector<1152x128xbf16>, vector<256x128xf32> -> vector<256x128xf32>
    %33 = vector.shape_cast %32 : vector<256x128xf32> to vector<16x16x128xf32>
    %34 = arith.truncf %33 : vector<16x16x128xf32> to vector<16x16x128xbf16>
    %c0_14 = arith.constant 0 : index
    %c0_15 = arith.constant 0 : index
    %c0_16 = arith.constant 0 : index
    %c0_17 = arith.constant 0 : index
    %35 = vector.load %arg6[%c0_14, %c0_15, %c0_16, %c0_17] : memref<1x16x16x128xbf16, #tpu.memory_space<vmem>>, vector<1x16x16x128xbf16>
    %36 = vector.shape_cast %35 : vector<1x16x16x128xbf16> to vector<16x16x128xbf16>
    %37 = vector.shape_cast %34 : vector<16x16x128xbf16> to vector<1x16x16x128xbf16>
    tpu.vector_store %arg6[%c0_14, %c0_15, %c0_16, %c0_17], %37 {strides = array<i32>} : memref<1x16x16x128xbf16, #tpu.memory_space<vmem>>, vector<1x16x16x128xbf16>,
    %cst_18 = arith.constant dense<0.000000e+00> : vector<128xf32>
    %38 = vector.multi_reduction <add>, %32, %cst_18 [0] : vector<256x128xf32> to vector<128xf32>
    %39 = vector.shape_cast %38 : vector<128xf32> to vector<1x128xf32>
    %c0_19 = arith.constant 0 : index
    %c0_20 = arith.constant 0 : index
    %c0_21 = arith.constant 0 : index
    %c0_22 = arith.constant 0 : index
    %40 = vector.load %arg7[%c0_19, %c0_20, %c0_21, %c0_22] : memref<1x1x2x128xf32, #tpu.memory_space<vmem>>, vector<1x1x1x128xf32>
    %41 = vector.shape_cast %40 : vector<1x1x1x128xf32> to vector<1x128xf32>
    %42 = vector.shape_cast %39 : vector<1x128xf32> to vector<1x1x1x128xf32>
    tpu.vector_store %arg7[%c0_19, %c0_20, %c0_21, %c0_22], %42 {strides = array<i32>} : memref<1x1x2x128xf32, #tpu.memory_space<vmem>>, vector<1x1x1x128xf32>,
    %43 = arith.mulf %32, %32 : vector<256x128xf32>
    %cst_23 = arith.constant dense<0.000000e+00> : vector<128xf32>
    %44 = vector.multi_reduction <add>, %43, %cst_23 [0] : vector<256x128xf32> to vector<128xf32>
    %45 = vector.shape_cast %44 : vector<128xf32> to vector<1x128xf32>
    %c0_24 = arith.constant 0 : index
    %c0_25 = arith.constant 0 : index
    %c1_26 = arith.constant 1 : index
    %c0_27 = arith.constant 0 : index
    %46 = vector.load %arg7[%c0_24, %c0_25, %c1_26, %c0_27] : memref<1x1x2x128xf32, #tpu.memory_space<vmem>>, vector<1x1x1x128xf32>
    %47 = vector.shape_cast %46 : vector<1x1x1x128xf32> to vector<1x128xf32>
    %48 = vector.shape_cast %45 : vector<1x128xf32> to vector<1x1x1x128xf32>
    tpu.vector_store %arg7[%c0_24, %c0_25, %c1_26, %c0_27], %48 {strides = array<i32>} : memref<1x1x2x128xf32, #tpu.memory_space<vmem>>, vector<1x1x1x128xf32>,
    return
  }
  func.func @transform_0(%arg0: i32, %arg1: i32) -> (i32, i32, i32, i32) {
    %c0_i32 = arith.constant 0 : i32
    %c0_i32_0 = arith.constant 0 : i32
    %c0_i32_1 = arith.constant 0 : i32
    return %arg0, %arg1, %c0_i32, %c0_i32_0 : i32, i32, i32, i32
  }
  func.func @transform_1(%arg0: i32, %arg1: i32) -> (i32, i32, i32, i32) {
    %c1_i32 = arith.constant 1 : i32
    %0 = arith.addi %arg1, %c1_i32 : i32
    %c8_i32 = arith.constant 8 : i32
    %1 = arith.muli %0, %c8_i32 : i32
    %c0_i32 = arith.constant 0 : i32
    %c0_i32_0 = arith.constant 0 : i32
    %c0_i32_1 = arith.constant 0 : i32
    return %arg0, %1, %c0_i32, %c0_i32_0 : i32, i32, i32, i32
  }
  func.func @transform_2(%arg0: i32, %arg1: i32) -> (i32, i32) {
    %c0_i32 = arith.constant 0 : i32
    %c0_i32_0 = arith.constant 0 : i32
    %c0_i32_1 = arith.constant 0 : i32
    return %c0_i32, %c0_i32_0 : i32, i32
  }
  func.func @transform_3(%arg0: i32, %arg1: i32) -> (i32, i32) {
    %c0_i32 = arith.constant 0 : i32
    %c0_i32_0 = arith.constant 0 : i32
    %c0_i32_1 = arith.constant 0 : i32
    return %c0_i32, %c0_i32_0 : i32, i32
  }
  func.func @transform_4(%arg0: i32, %arg1: i32) -> (i32, i32, i32, i32) {
    %c0_i32 = arith.constant 0 : i32
    %c0_i32_0 = arith.constant 0 : i32
    %c0_i32_1 = arith.constant 0 : i32
    return %arg0, %arg1, %c0_i32, %c0_i32_0 : i32, i32, i32, i32
  }
  func.func @transform_5(%arg0: i32, %arg1: i32) -> (i32, i32, i32, i32) {
    %c0_i32 = arith.constant 0 : i32
    %c0_i32_0 = arith.constant 0 : i32
    %c0_i32_1 = arith.constant 0 : i32
    return %arg0, %arg1, %c0_i32, %c0_i32_0 : i32, i32, i32, i32
  }
}

module attributes {stable_mosaic.version = 11 : i64} {
  func.func @_bn_act_kernel(%arg0: i32, %arg1: memref<512x128xbf16, #tpu.memory_space<vmem>>, %arg2: memref<2x128xf32, #tpu.memory_space<vmem>>, %arg3: memref<512x128xf32, #tpu.memory_space<vmem>>) attributes {dimension_semantics = [#tpu.dimension_semantics<parallel>], iteration_bounds = array<i64: 1>, scalar_prefetch = 0 : i64, scratch_operands = 0 : i64, tpu.core_type = #tpu.core_type<tc>, window_params = [{transform_indices = @transform_0, window_bounds = array<i64: 512, 128>}, {pipeline_mode = #tpu.pipeline_mode<synchronous>, transform_indices = @transform_1, window_bounds = array<i64: 2, 128>}, {transform_indices = @transform_2, window_bounds = array<i64: 512, 128>}]} {
    %c0 = arith.constant 0 : index
    %c0_0 = arith.constant 0 : index
    %0 = vector.load %arg1[%c0, %c0_0] : memref<512x128xbf16, #tpu.memory_space<vmem>>, vector<512x128xbf16>
    %1 = arith.extf %0 : vector<512x128xbf16> to vector<512x128xf32>
    %c0_1 = arith.constant 0 : index
    %c0_2 = arith.constant 0 : index
    %2 = vector.load %arg2[%c0_1, %c0_2] : memref<2x128xf32, #tpu.memory_space<vmem>>, vector<1x128xf32>
    %3 = vector.broadcast %2 : vector<1x128xf32> to vector<512x128xf32>
    %4 = arith.mulf %1, %3 : vector<512x128xf32>
    %c1 = arith.constant 1 : index
    %c0_3 = arith.constant 0 : index
    %5 = vector.load %arg2[%c1, %c0_3] : memref<2x128xf32, #tpu.memory_space<vmem>>, vector<1x128xf32>
    %6 = vector.broadcast %5 : vector<1x128xf32> to vector<512x128xf32>
    %7 = arith.addf %4, %6 : vector<512x128xf32>
    %cst = arith.constant 0.000000e+00 : f32
    %8 = vector.broadcast %cst : f32 to vector<512x128xf32>
    %9 = arith.cmpf ogt, %7, %8 : vector<512x128xf32>
    %cst_4 = arith.constant 2.000000e-01 : f32
    %10 = vector.broadcast %cst_4 : f32 to vector<512x128xf32>
    %11 = arith.mulf %10, %7 : vector<512x128xf32>
    %12 = arith.select %9, %7, %11 : vector<512x128xi1>, vector<512x128xf32>
    %c0_5 = arith.constant 0 : index
    %c0_6 = arith.constant 0 : index
    %13 = vector.load %arg3[%c0_5, %c0_6] : memref<512x128xf32, #tpu.memory_space<vmem>>, vector<512x128xf32>
    tpu.vector_store %arg3[%c0_5, %c0_6], %12 {strides = array<i32>} : memref<512x128xf32, #tpu.memory_space<vmem>>, vector<512x128xf32>,
    return
  }
  func.func @transform_0(%arg0: i32) -> (i32, i32) {
    %c0_i32 = arith.constant 0 : i32
    %c0_i32_0 = arith.constant 0 : i32
    return %arg0, %c0_i32 : i32, i32
  }
  func.func @transform_1(%arg0: i32) -> (i32, i32) {
    %c0_i32 = arith.constant 0 : i32
    %c0_i32_0 = arith.constant 0 : i32
    %c0_i32_1 = arith.constant 0 : i32
    return %c0_i32, %c0_i32_0 : i32, i32
  }
  func.func @transform_2(%arg0: i32) -> (i32, i32) {
    %c0_i32 = arith.constant 0 : i32
    %c0_i32_0 = arith.constant 0 : i32
    return %arg0, %c0_i32 : i32, i32
  }
}

</mosaic_0001>

<bundles_post_ra>
// kernel: unet_conv_block.5
= control target key start
LH: loop header
LB: loop body
LE: loop exit
PB: predicated region body
PF: predicated region fallthrough
CT: control target
= control target key end

     0   :  { %s1139_s0 = inlined_call_operand.vmem [shape: bf16[512,128], index: 0, kind: input, shape index: {}]   ;;  %s1140_s1 = inlined_call_operand.vmem [shape: f32[2,128], index: 1, kind: input, shape index: {}]   ;;  %s1141_s2 = inlined_call_operand.vmem [shape: f32[512,128], index: 2, kind: output, shape index: {}]  }
   0x1   :  { %v540_v0 = vld [vmem:[%s1139_s0] sm:$0xff]   ;;  %v667_v4 = vld [vmem:[%s1139_s0 + $0x8] sm:$0xff]   ;;  %v668_v5 = vld [vmem:[%s1139_s0 + $0x10] sm:$0xff]  }
   0x2   :  { %v719_v1 = vld [vmem:[%s1140_s1] ss:$0 sm:$0xff]  ;;  %v541_v2 = vunpack.c.l.bf16 %v540_v0  ;;  %v542_v3 = vunpack.c.h.bf16 %v540_v0  ;;  %v669_v6 = vld [vmem:[%s1139_s0 + $0x18] sm:$0xff]   ;;  %v733_v7 = vld [vmem:[%s1140_s1 + $0x1] ss:$0 sm:$0xff]  ;;  %v545_v8 = vunpack.c.l.bf16 %v667_v4  ;;  %v546_v9 = vunpack.c.h.bf16 %v667_v4 }
   0x3   :  { %v549_v10 = vunpack.c.l.bf16 %v668_v5  ;;  %v550_v11 = vunpack.c.h.bf16 %v668_v5  ;;  %v553_v14 = vunpack.c.l.bf16 %v669_v6  ;;  %v554_v15 = vunpack.c.h.bf16 %v669_v6  ;;  %v670_v28 = vld [vmem:[%s1139_s0 + $0x20] sm:$0xff]   ;;  %v671_v36 = vld [vmem:[%s1139_s0 + $0x28] sm:$0xff]   ;;  %v672_v48 = vld [vmem:[%s1139_s0 + $0x30] sm:$0xff]  }
   0x4   :  { %v144_v12 = vmul.f32 %v541_v2, %v719_v1  ;;  %v145_v13 = vmul.f32 %v542_v3, %v719_v1  ;;  %v146_v16 = vmul.f32 %v545_v8, %v719_v1  ;;  %v147_v17 = vmul.f32 %v546_v9, %v719_v1  ;;  %v673_v55 = vld [vmem:[%s1139_s0 + $0x38] sm:$0xff]  }
   0x5   :  { %v148_v18 = vmul.f32 %v549_v10, %v719_v1  ;;  %v149_v19 = vmul.f32 %v550_v11, %v719_v1  ;;  %v150_v22 = vmul.f32 %v553_v14, %v719_v1  ;;  %v151_v23 = vmul.f32 %v554_v15, %v719_v1  ;;  %v674_v14 = vld [vmem:[%s1139_s0 + $0x40] sm:$0xff]  }
   0x6   :  { %v213_v20 = vadd.f32 %v733_v7, %v144_v12  ;;  %v214_v21 = vadd.f32 %v733_v7, %v145_v13  ;;  %v215_v24 = vadd.f32 %v733_v7, %v146_v16  ;;  %v216_v25 = vadd.f32 %v733_v7, %v147_v17 }
   0x7   :  { %v217_v26 = vadd.f32 %v733_v7, %v148_v18  ;;  %v218_v27 = vadd.f32 %v733_v7, %v149_v19  ;;  %v219_v41 = vadd.f32 %v733_v7, %v150_v22  ;;  %v220_v42 = vadd.f32 %v733_v7, %v151_v23  ;;  %v675_v19 = vld [vmem:[%s1139_s0 + $0x48] sm:$0xff]  }
   0x8   :  { %vm277_vm0 = vcmp.gt.f32.partialorder %v213_v20, 0.0  ;;  %v341_v29 = vmul.f32 0.2, %v213_v20  ;;  %vm278_vm1 = vcmp.gt.f32.partialorder %v214_v21, 0.0  ;;  %v342_v30 = vmul.f32 0.2, %v214_v21 }
   0x9   :  { %vm279_vm2 = vcmp.gt.f32.partialorder %v215_v24, 0.0  ;;  %v343_v31 = vmul.f32 0.2, %v215_v24  ;;  %vm280_vm3 = vcmp.gt.f32.partialorder %v216_v25, 0.0  ;;  %v344_v32 = vmul.f32 0.2, %v216_v25 }
   0xa   :  { %v405_v33 = vsel %vm277_vm0, %v213_v20, %v341_v29  ;;  %v406_v34 = vsel %vm278_vm1, %v214_v21, %v342_v30  ;;  %vm281_vm4 = vcmp.gt.f32.partialorder %v217_v26, 0.0  ;;  %v345_v35 = vmul.f32 0.2, %v217_v26  ;;  %v676_v30 = vld [vmem:[%s1139_s0 + $0x50] sm:$0xff]  }
   0xb   :  { %469 = vst [vmem:[%s1141_s2] sm:$0xff] %v405_v33  ;;  %470 = vst [vmem:[%s1141_s2 + $0x8] sm:$0xff] %v406_v34  ;;  %v407_v37 = vsel %vm279_vm2, %v215_v24, %v343_v31  ;;  %v408_v38 = vsel %vm280_vm3, %v216_v25, %v344_v32  ;;  %vm282_vm5 = vcmp.gt.f32.partialorder %v218_v27, 0.0  ;;  %v346_v39 = vmul.f32 0.2, %v218_v27 }
   0xc   :  { %471 = vst [vmem:[%s1141_s2 + $0x10] sm:$0xff] %v407_v37  ;;  %472 = vst [vmem:[%s1141_s2 + $0x18] sm:$0xff] %v408_v38  ;;  %v409_v40 = vsel %vm281_vm4, %v217_v26, %v345_v35  ;;  %v557_v43 = vunpack.c.l.bf16 %v670_v28  ;;  %v558_v45 = vunpack.c.h.bf16 %v670_v28  ;;  %v561_v46 = vunpack.c.l.bf16 %v671_v36  ;;  %v677_v37 = vld [vmem:[%s1139_s0 + $0x58] sm:$0xff]  }
   0xd   :  { %473 = vst [vmem:[%s1141_s2 + $0x20] sm:$0xff] %v409_v40  ;;  %v410_v44 = vsel %vm282_vm5, %v218_v27, %v346_v39  ;;  %v562_v47 = vunpack.c.h.bf16 %v671_v36  ;;  %vm283_vm6 = vcmp.gt.f32.partialorder %v219_v41, 0.0  ;;  %v347_v49 = vmul.f32 0.2, %v219_v41 }
   0xe   :  { %474 = vst [vmem:[%s1141_s2 + $0x28] sm:$0xff] %v410_v44  ;;  %vm284_vm7 = vcmp.gt.f32.partialorder %v220_v42, 0.0  ;;  %v348_v50 = vmul.f32 0.2, %v220_v42  ;;  %v152_v51 = vmul.f32 %v557_v43, %v719_v1  ;;  %v153_v52 = vmul.f32 %v558_v45, %v719_v1 }
   0xf   :  { %v154_v53 = vmul.f32 %v561_v46, %v719_v1  ;;  %v155_v54 = vmul.f32 %v562_v47, %v719_v1  ;;  %v411_v56 = vsel %vm283_vm6, %v219_v41, %v347_v49  ;;  %v565_v58 = vunpack.c.l.bf16 %v672_v48 }
  0x10   :  { %v412_v57 = vsel %vm284_vm7, %v220_v42, %v348_v50  ;;  %v566_v59 = vunpack.c.h.bf16 %v672_v48  ;;  %475 = vst [vmem:[%s1141_s2 + $0x30] sm:$0xff] %v411_v56  ;;  %v221_v60 = vadd.f32 %v733_v7, %v152_v51  ;;  %v222_v61 = vadd.f32 %v733_v7, %v153_v52 }
  0x11   :  { %476 = vst [vmem:[%s1141_s2 + $0x38] sm:$0xff] %v412_v57  ;;  %v223_v62 = vadd.f32 %v733_v7, %v154_v53  ;;  %v224_v63 = vadd.f32 %v733_v7, %v155_v54  ;;  %v156_v0 = vmul.f32 %v565_v58, %v719_v1  ;;  %v569_v3 = vunpack.c.l.bf16 %v673_v55  ;;  %v678_v58 = vld [vmem:[%s1139_s0 + $0x60] sm:$0xff]  }
  0x12   :  { %v157_v2 = vmul.f32 %v566_v59, %v719_v1  ;;  %v570_v4 = vunpack.c.h.bf16 %v673_v55  ;;  %vm285_vm8 = vcmp.gt.f32.partialorder %v221_v60, 0.0  ;;  %v349_v5 = vmul.f32 0.2, %v221_v60 }
  0x13   :  { %vm286_vm9 = vcmp.gt.f32.partialorder %v222_v61, 0.0  ;;  %v350_v6 = vmul.f32 0.2, %v222_v61  ;;  %vm287_vm10 = vcmp.gt.f32.partialorder %v223_v62, 0.0  ;;  %v351_v8 = vmul.f32 0.2, %v223_v62 }
  0x14   :  { %vm288_vm11 = vcmp.gt.f32.partialorder %v224_v63, 0.0  ;;  %v352_v9 = vmul.f32 0.2, %v224_v63  ;;  %v413_v10 = vsel %vm285_vm8, %v221_v60, %v349_v5  ;;  %v225_v12 = vadd.f32 %v733_v7, %v156_v0 }
  0x15   :  { %v414_v11 = vsel %vm286_vm9, %v222_v61, %v350_v6  ;;  %v226_v13 = vadd.f32 %v733_v7, %v157_v2  ;;  %477 = vst [vmem:[%s1141_s2 + $0x40] sm:$0xff] %v413_v10  ;;  %v415_v15 = vsel %vm287_vm10, %v223_v62, %v351_v8  ;;  %v158_v17 = vmul.f32 %v569_v3, %v719_v1 }
  0x16   :  { %478 = vst [vmem:[%s1141_s2 + $0x48] sm:$0xff] %v414_v11  ;;  %v416_v16 = vsel %vm288_vm11, %v224_v63, %v352_v9  ;;  %v159_v18 = vmul.f32 %v570_v4, %v719_v1  ;;  %479 = vst [vmem:[%s1141_s2 + $0x50] sm:$0xff] %v415_v15  ;;  %vm289_vm12 = vcmp.gt.f32.partialorder %v225_v12, 0.0  ;;  %v353_v20 = vmul.f32 0.2, %v225_v12  ;;  %v679_v63 = vld [vmem:[%s1139_s0 + $0x68] sm:$0xff]  }
  0x17   :  { %480 = vst [vmem:[%s1141_s2 + $0x58] sm:$0xff] %v416_v16  ;;  %vm290_vm13 = vcmp.gt.f32.partialorder %v226_v13, 0.0  ;;  %v354_v21 = vmul.f32 0.2, %v226_v13  ;;  %v227_v22 = vadd.f32 %v733_v7, %v158_v17  ;;  %v573_v24 = vunpack.c.l.bf16 %v674_v14 }
  0x18   :  { %v228_v23 = vadd.f32 %v733_v7, %v159_v18  ;;  %v574_v25 = vunpack.c.h.bf16 %v674_v14  ;;  %v417_v26 = vsel %vm289_vm12, %v225_v12, %v353_v20  ;;  %v577_v28 = vunpack.c.l.bf16 %v675_v19  ;;  %v680_v12 = vld [vmem:[%s1139_s0 + $0x70] sm:$0xff]  }
  0x19   :  { %v418_v27 = vsel %vm290_vm13, %v226_v13, %v354_v21  ;;  %v578_v29 = vunpack.c.h.bf16 %v675_v19  ;;  %481 = vst [vmem:[%s1141_s2 + $0x60] sm:$0xff] %v417_v26  ;;  %vm291_vm14 = vcmp.gt.f32.partialorder %v227_v22, 0.0  ;;  %v355_v31 = vmul.f32 0.2, %v227_v22  ;;  %v681_v19 = vld [vmem:[%s1139_s0 + $0x78] sm:$0xff]  }
  0x1a   :  { %482 = vst [vmem:[%s1141_s2 + $0x68] sm:$0xff] %v418_v27  ;;  %vm292_vm15 = vcmp.gt.f32.partialorder %v228_v23, 0.0  ;;  %v356_v32 = vmul.f32 0.2, %v228_v23  ;;  %v160_v33 = vmul.f32 %v573_v24, %v719_v1  ;;  %v161_v34 = vmul.f32 %v574_v25, %v719_v1 }
  0x1b   :  { %v162_v35 = vmul.f32 %v577_v28, %v719_v1  ;;  %v163_v36 = vmul.f32 %v578_v29, %v719_v1  ;;  %v419_v38 = vsel %vm291_vm14, %v227_v22, %v355_v31  ;;  %v581_v40 = vunpack.c.l.bf16 %v676_v30 }
  0x1c   :  { %v420_v39 = vsel %vm292_vm15, %v228_v23, %v356_v32  ;;  %v582_v41 = vunpack.c.h.bf16 %v676_v30  ;;  %483 = vst [vmem:[%s1141_s2 + $0x70] sm:$0xff] %v419_v38  ;;  %v229_v42 = vadd.f32 %v733_v7, %v160_v33  ;;  %v230_v43 = vadd.f32 %v733_v7, %v161_v34 }
  0x1d   :  { %484 = vst [vmem:[%s1141_s2 + $0x78] sm:$0xff] %v420_v39  ;;  %v231_v44 = vadd.f32 %v733_v7, %v162_v35  ;;  %v232_v45 = vadd.f32 %v733_v7, %v163_v36  ;;  %v164_v46 = vmul.f32 %v581_v40, %v719_v1  ;;  %v585_v48 = vunpack.c.l.bf16 %v677_v37  ;;  %v682_v40 = vld [vmem:[%s1139_s0 + $0x80] sm:$0xff]  }
  0x1e   :  { %v165_v47 = vmul.f32 %v582_v41, %v719_v1  ;;  %v586_v49 = vunpack.c.h.bf16 %v677_v37  ;;  %vm293_vm0 = vcmp.gt.f32.partialorder %v229_v42, 0.0  ;;  %v357_v50 = vmul.f32 0.2, %v229_v42 }
  0x1f   :  { %vm294_vm1 = vcmp.gt.f32.partialorder %v230_v43, 0.0  ;;  %v358_v51 = vmul.f32 0.2, %v230_v43  ;;  %vm295_vm2 = vcmp.gt.f32.partialorder %v231_v44, 0.0  ;;  %v359_v52 = vmul.f32 0.2, %v231_v44 }
  0x20   :  { %vm296_vm3 = vcmp.gt.f32.partialorder %v232_v45, 0.0  ;;  %v360_v53 = vmul.f32 0.2, %v232_v45  ;;  %v421_v54 = vsel %vm293_vm0, %v229_v42, %v357_v50  ;;  %v233_v56 = vadd.f32 %v733_v7, %v164_v46 }
  0x21   :  { %v422_v55 = vsel %vm294_vm1, %v230_v43, %v358_v51  ;;  %v234_v57 = vadd.f32 %v733_v7, %v165_v47  ;;  %485 = vst [vmem:[%s1141_s2 + $0x80] sm:$0xff] %v421_v54  ;;  %v423_v59 = vsel %vm295_vm2, %v231_v44, %v359_v52  ;;  %v166_v61 = vmul.f32 %v585_v48, %v719_v1 }
  0x22   :  { %486 = vst [vmem:[%s1141_s2 + $0x88] sm:$0xff] %v422_v55  ;;  %v424_v60 = vsel %vm296_vm3, %v232_v45, %v360_v53  ;;  %v167_v62 = vmul.f32 %v586_v49, %v719_v1  ;;  %487 = vst [vmem:[%s1141_s2 + $0x90] sm:$0xff] %v423_v59  ;;  %vm297_vm4 = vcmp.gt.f32.partialorder %v233_v56, 0.0  ;;  %v361_v0 = vmul.f32 0.2, %v233_v56  ;;  %v683_v45 = vld [vmem:[%s1139_s0 + $0x88] sm:$0xff]  }
  0x23   :  { %488 = vst [vmem:[%s1141_s2 + $0x98] sm:$0xff] %v424_v60  ;;  %vm298_vm5 = vcmp.gt.f32.partialorder %v234_v57, 0.0  ;;  %v362_v2 = vmul.f32 0.2, %v234_v57  ;;  %v235_v3 = vadd.f32 %v733_v7, %v166_v61  ;;  %v589_v5 = vunpack.c.l.bf16 %v678_v58 }
  0x24   :  { %v236_v4 = vadd.f32 %v733_v7, %v167_v62  ;;  %v590_v6 = vunpack.c.h.bf16 %v678_v58  ;;  %v425_v8 = vsel %vm297_vm4, %v233_v56, %v361_v0  ;;  %v593_v10 = vunpack.c.l.bf16 %v679_v63  ;;  %v684_v56 = vld [vmem:[%s1139_s0 + $0x90] sm:$0xff]  }
  0x25   :  { %v426_v9 = vsel %vm298_vm5, %v234_v57, %v362_v2  ;;  %v594_v11 = vunpack.c.h.bf16 %v679_v63  ;;  %489 = vst [vmem:[%s1141_s2 + $0xa0] sm:$0xff] %v425_v8  ;;  %vm299_vm6 = vcmp.gt.f32.partialorder %v235_v3, 0.0  ;;  %v363_v13 = vmul.f32 0.2, %v235_v3  ;;  %v685_v63 = vld [vmem:[%s1139_s0 + $0x98] sm:$0xff]  }
  0x26   :  { %490 = vst [vmem:[%s1141_s2 + $0xa8] sm:$0xff] %v426_v9  ;;  %vm300_vm7 = vcmp.gt.f32.partialorder %v236_v4, 0.0  ;;  %v364_v14 = vmul.f32 0.2, %v236_v4  ;;  %v168_v15 = vmul.f32 %v589_v5, %v719_v1  ;;  %v169_v16 = vmul.f32 %v590_v6, %v719_v1 }
  0x27   :  { %v170_v17 = vmul.f32 %v593_v10, %v719_v1  ;;  %v171_v18 = vmul.f32 %v594_v11, %v719_v1  ;;  %v427_v20 = vsel %vm299_vm6, %v235_v3, %v363_v13  ;;  %v597_v22 = vunpack.c.l.bf16 %v680_v12 }
  0x28   :  { %v428_v21 = vsel %vm300_vm7, %v236_v4, %v364_v14  ;;  %v598_v23 = vunpack.c.h.bf16 %v680_v12  ;;  %491 = vst [vmem:[%s1141_s2 + $0xb0] sm:$0xff] %v427_v20  ;;  %v237_v24 = vadd.f32 %v733_v7, %v168_v15  ;;  %v238_v25 = vadd.f32 %v733_v7, %v169_v16 }
  0x29   :  { %492 = vst [vmem:[%s1141_s2 + $0xb8] sm:$0xff] %v428_v21  ;;  %v239_v26 = vadd.f32 %v733_v7, %v170_v17  ;;  %v240_v27 = vadd.f32 %v733_v7, %v171_v18  ;;  %v172_v28 = vmul.f32 %v597_v22, %v719_v1  ;;  %v601_v30 = vunpack.c.l.bf16 %v681_v19  ;;  %v686_v22 = vld [vmem:[%s1139_s0 + $0xa0] sm:$0xff]  }
  0x2a   :  { %v173_v29 = vmul.f32 %v598_v23, %v719_v1  ;;  %v602_v31 = vunpack.c.h.bf16 %v681_v19  ;;  %vm301_vm8 = vcmp.gt.f32.partialorder %v237_v24, 0.0  ;;  %v365_v32 = vmul.f32 0.2, %v237_v24 }
  0x2b   :  { %vm302_vm9 = vcmp.gt.f32.partialorder %v238_v25, 0.0  ;;  %v366_v33 = vmul.f32 0.2, %v238_v25  ;;  %vm303_vm10 = vcmp.gt.f32.partialorder %v239_v26, 0.0  ;;  %v367_v34 = vmul.f32 0.2, %v239_v26 }
  0x2c   :  { %vm304_vm11 = vcmp.gt.f32.partialorder %v240_v27, 0.0  ;;  %v368_v35 = vmul.f32 0.2, %v240_v27  ;;  %v429_v36 = vsel %vm301_vm8, %v237_v24, %v365_v32  ;;  %v241_v38 = vadd.f32 %v733_v7, %v172_v28 }
  0x2d   :  { %v430_v37 = vsel %vm302_vm9, %v238_v25, %v366_v33  ;;  %v242_v39 = vadd.f32 %v733_v7, %v173_v29  ;;  %493 = vst [vmem:[%s1141_s2 + $0xc0] sm:$0xff] %v429_v36  ;;  %v431_v41 = vsel %vm303_vm10, %v239_v26, %v367_v34  ;;  %v174_v43 = vmul.f32 %v601_v30, %v719_v1 }
  0x2e   :  { %494 = vst [vmem:[%s1141_s2 + $0xc8] sm:$0xff] %v430_v37  ;;  %v432_v42 = vsel %vm304_vm11, %v240_v27, %v368_v35  ;;  %v175_v44 = vmul.f32 %v602_v31, %v719_v1  ;;  %495 = vst [vmem:[%s1141_s2 + $0xd0] sm:$0xff] %v431_v41  ;;  %vm305_vm12 = vcmp.gt.f32.partialorder %v241_v38, 0.0  ;;  %v369_v46 = vmul.f32 0.2, %v241_v38  ;;  %v687_v27 = vld [vmem:[%s1139_s0 + $0xa8] sm:$0xff]  }
  0x2f   :  { %496 = vst [vmem:[%s1141_s2 + $0xd8] sm:$0xff] %v432_v42  ;;  %vm306_vm13 = vcmp.gt.f32.partialorder %v242_v39, 0.0  ;;  %v370_v47 = vmul.f32 0.2, %v242_v39  ;;  %v243_v48 = vadd.f32 %v733_v7, %v174_v43  ;;  %v605_v50 = vunpack.c.l.bf16 %v682_v40 }
  0x30   :  { %v244_v49 = vadd.f32 %v733_v7, %v175_v44  ;;  %v606_v51 = vunpack.c.h.bf16 %v682_v40  ;;  %v433_v52 = vsel %vm305_vm12, %v241_v38, %v369_v46  ;;  %v609_v54 = vunpack.c.l.bf16 %v683_v45  ;;  %v688_v38 = vld [vmem:[%s1139_s0 + $0xb0] sm:$0xff]  }
  0x31   :  { %v434_v53 = vsel %vm306_vm13, %v242_v39, %v370_v47  ;;  %v610_v55 = vunpack.c.h.bf16 %v683_v45  ;;  %497 = vst [vmem:[%s1141_s2 + $0xe0] sm:$0xff] %v433_v52  ;;  %vm307_vm14 = vcmp.gt.f32.partialorder %v243_v48, 0.0  ;;  %v371_v57 = vmul.f32 0.2, %v243_v48  ;;  %v689_v45 = vld [vmem:[%s1139_s0 + $0xb8] sm:$0xff]  }
  0x32   :  { %498 = vst [vmem:[%s1141_s2 + $0xe8] sm:$0xff] %v434_v53  ;;  %vm308_vm15 = vcmp.gt.f32.partialorder %v244_v49, 0.0  ;;  %v372_v58 = vmul.f32 0.2, %v244_v49  ;;  %v176_v59 = vmul.f32 %v605_v50, %v719_v1  ;;  %v177_v60 = vmul.f32 %v606_v51, %v719_v1 }
  0x33   :  { %v178_v61 = vmul.f32 %v609_v54, %v719_v1  ;;  %v179_v62 = vmul.f32 %v610_v55, %v719_v1  ;;  %v435_v0 = vsel %vm307_vm14, %v243_v48, %v371_v57  ;;  %v613_v3 = vunpack.c.l.bf16 %v684_v56 }
  0x34   :  { %v436_v2 = vsel %vm308_vm15, %v244_v49, %v372_v58  ;;  %v614_v4 = vunpack.c.h.bf16 %v684_v56  ;;  %499 = vst [vmem:[%s1141_s2 + $0xf0] sm:$0xff] %v435_v0  ;;  %v245_v5 = vadd.f32 %v733_v7, %v176_v59  ;;  %v246_v6 = vadd.f32 %v733_v7, %v177_v60 }
  0x35   :  { %500 = vst [vmem:[%s1141_s2 + $0xf8] sm:$0xff] %v436_v2  ;;  %v247_v8 = vadd.f32 %v733_v7, %v178_v61  ;;  %v248_v9 = vadd.f32 %v733_v7, %v179_v62  ;;  %v180_v10 = vmul.f32 %v613_v3, %v719_v1  ;;  %v617_v12 = vunpack.c.l.bf16 %v685_v63  ;;  %v690_v3 = vld [vmem:[%s1139_s0 + $0xc0] sm:$0xff]  }
  0x36   :  { %v181_v11 = vmul.f32 %v614_v4, %v719_v1  ;;  %v618_v13 = vunpack.c.h.bf16 %v685_v63  ;;  %vm309_vm0 = vcmp.gt.f32.partialorder %v245_v5, 0.0  ;;  %v373_v14 = vmul.f32 0.2, %v245_v5 }
  0x37   :  { %vm310_vm1 = vcmp.gt.f32.partialorder %v246_v6, 0.0  ;;  %v374_v15 = vmul.f32 0.2, %v246_v6  ;;  %vm311_vm2 = vcmp.gt.f32.partialorder %v247_v8, 0.0  ;;  %v375_v16 = vmul.f32 0.2, %v247_v8 }
  0x38   :  { %vm312_vm3 = vcmp.gt.f32.partialorder %v248_v9, 0.0  ;;  %v376_v17 = vmul.f32 0.2, %v248_v9  ;;  %v437_v18 = vsel %vm309_vm0, %v245_v5, %v373_v14  ;;  %v249_v20 = vadd.f32 %v733_v7, %v180_v10 }
  0x39   :  { %v438_v19 = vsel %vm310_vm1, %v246_v6, %v374_v15  ;;  %v250_v21 = vadd.f32 %v733_v7, %v181_v11  ;;  %501 = vst [vmem:[%s1141_s2 + $0x100] sm:$0xff] %v437_v18  ;;  %v439_v23 = vsel %vm311_vm2, %v247_v8, %v375_v16  ;;  %v182_v25 = vmul.f32 %v617_v12, %v719_v1 }
  0x3a   :  { %502 = vst [vmem:[%s1141_s2 + $0x108] sm:$0xff] %v438_v19  ;;  %v440_v24 = vsel %vm312_vm3, %v248_v9, %v376_v17  ;;  %v183_v26 = vmul.f32 %v618_v13, %v719_v1  ;;  %503 = vst [vmem:[%s1141_s2 + $0x110] sm:$0xff] %v439_v23  ;;  %vm313_vm4 = vcmp.gt.f32.partialorder %v249_v20, 0.0  ;;  %v377_v28 = vmul.f32 0.2, %v249_v20  ;;  %v691_v9 = vld [vmem:[%s1139_s0 + $0xc8] sm:$0xff]  }
  0x3b   :  { %504 = vst [vmem:[%s1141_s2 + $0x118] sm:$0xff] %v440_v24  ;;  %vm314_vm5 = vcmp.gt.f32.partialorder %v250_v21, 0.0  ;;  %v378_v29 = vmul.f32 0.2, %v250_v21  ;;  %v251_v30 = vadd.f32 %v733_v7, %v182_v25  ;;  %v621_v32 = vunpack.c.l.bf16 %v686_v22 }
  0x3c   :  { %v252_v31 = vadd.f32 %v733_v7, %v183_v26  ;;  %v622_v33 = vunpack.c.h.bf16 %v686_v22  ;;  %v441_v34 = vsel %vm313_vm4, %v249_v20, %v377_v28  ;;  %v625_v36 = vunpack.c.l.bf16 %v687_v27  ;;  %v692_v20 = vld [vmem:[%s1139_s0 + $0xd0] sm:$0xff]  }
  0x3d   :  { %v442_v35 = vsel %vm314_vm5, %v250_v21, %v378_v29  ;;  %v626_v37 = vunpack.c.h.bf16 %v687_v27  ;;  %505 = vst [vmem:[%s1141_s2 + $0x120] sm:$0xff] %v441_v34  ;;  %vm315_vm6 = vcmp.gt.f32.partialorder %v251_v30, 0.0  ;;  %v379_v39 = vmul.f32 0.2, %v251_v30  ;;  %v693_v27 = vld [vmem:[%s1139_s0 + $0xd8] sm:$0xff]  }
  0x3e   :  { %506 = vst [vmem:[%s1141_s2 + $0x128] sm:$0xff] %v442_v35  ;;  %vm316_vm7 = vcmp.gt.f32.partialorder %v252_v31, 0.0  ;;  %v380_v40 = vmul.f32 0.2, %v252_v31  ;;  %v184_v41 = vmul.f32 %v621_v32, %v719_v1  ;;  %v185_v42 = vmul.f32 %v622_v33, %v719_v1 }
  0x3f   :  { %v186_v43 = vmul.f32 %v625_v36, %v719_v1  ;;  %v187_v44 = vmul.f32 %v626_v37, %v719_v1  ;;  %v443_v46 = vsel %vm315_vm6, %v251_v30, %v379_v39  ;;  %v629_v48 = vunpack.c.l.bf16 %v688_v38 }
  0x40   :  { %v444_v47 = vsel %vm316_vm7, %v252_v31, %v380_v40  ;;  %v630_v49 = vunpack.c.h.bf16 %v688_v38  ;;  %507 = vst [vmem:[%s1141_s2 + $0x130] sm:$0xff] %v443_v46  ;;  %v253_v50 = vadd.f32 %v733_v7, %v184_v41  ;;  %v254_v51 = vadd.f32 %v733_v7, %v185_v42 }
  0x41   :  { %508 = vst [vmem:[%s1141_s2 + $0x138] sm:$0xff] %v444_v47  ;;  %v255_v52 = vadd.f32 %v733_v7, %v186_v43  ;;  %v256_v53 = vadd.f32 %v733_v7, %v187_v44  ;;  %v188_v54 = vmul.f32 %v629_v48, %v719_v1  ;;  %v633_v56 = vunpack.c.l.bf16 %v689_v45  ;;  %v694_v48 = vld [vmem:[%s1139_s0 + $0xe0] sm:$0xff]  }
  0x42   :  { %v189_v55 = vmul.f32 %v630_v49, %v719_v1  ;;  %v634_v57 = vunpack.c.h.bf16 %v689_v45  ;;  %vm317_vm8 = vcmp.gt.f32.partialorder %v253_v50, 0.0  ;;  %v381_v58 = vmul.f32 0.2, %v253_v50 }
  0x43   :  { %vm318_vm9 = vcmp.gt.f32.partialorder %v254_v51, 0.0  ;;  %v382_v59 = vmul.f32 0.2, %v254_v51  ;;  %vm319_vm10 = vcmp.gt.f32.partialorder %v255_v52, 0.0  ;;  %v383_v60 = vmul.f32 0.2, %v255_v52 }
  0x44   :  { %vm320_vm11 = vcmp.gt.f32.partialorder %v256_v53, 0.0  ;;  %v384_v61 = vmul.f32 0.2, %v256_v53  ;;  %v445_v62 = vsel %vm317_vm8, %v253_v50, %v381_v58  ;;  %v257_v0 = vadd.f32 %v733_v7, %v188_v54 }
  0x45   :  { %v446_v63 = vsel %vm318_vm9, %v254_v51, %v382_v59  ;;  %v258_v2 = vadd.f32 %v733_v7, %v189_v55  ;;  %509 = vst [vmem:[%s1141_s2 + $0x140] sm:$0xff] %v445_v62  ;;  %v447_v4 = vsel %vm319_vm10, %v255_v52, %v383_v60  ;;  %v190_v6 = vmul.f32 %v633_v56, %v719_v1 }
  0x46   :  { %510 = vst [vmem:[%s1141_s2 + $0x148] sm:$0xff] %v446_v63  ;;  %v448_v5 = vsel %vm320_vm11, %v256_v53, %v384_v61  ;;  %v191_v8 = vmul.f32 %v634_v57, %v719_v1  ;;  %511 = vst [vmem:[%s1141_s2 + $0x150] sm:$0xff] %v447_v4  ;;  %vm321_vm12 = vcmp.gt.f32.partialorder %v257_v0, 0.0  ;;  %v385_v10 = vmul.f32 0.2, %v257_v0  ;;  %v695_v53 = vld [vmem:[%s1139_s0 + $0xe8] sm:$0xff]  }
  0x47   :  { %512 = vst [vmem:[%s1141_s2 + $0x158] sm:$0xff] %v448_v5  ;;  %vm322_vm13 = vcmp.gt.f32.partialorder %v258_v2, 0.0  ;;  %v386_v11 = vmul.f32 0.2, %v258_v2  ;;  %v259_v12 = vadd.f32 %v733_v7, %v190_v6  ;;  %v637_v14 = vunpack.c.l.bf16 %v690_v3 }
  0x48   :  { %v260_v13 = vadd.f32 %v733_v7, %v191_v8  ;;  %v638_v15 = vunpack.c.h.bf16 %v690_v3  ;;  %v449_v16 = vsel %vm321_vm12, %v257_v0, %v385_v10  ;;  %v641_v18 = vunpack.c.l.bf16 %v691_v9  ;;  %v696_v0 = vld [vmem:[%s1139_s0 + $0xf0] sm:$0xff]  }
  0x49   :  { %v450_v17 = vsel %vm322_vm13, %v258_v2, %v386_v11  ;;  %v642_v19 = vunpack.c.h.bf16 %v691_v9  ;;  %513 = vst [vmem:[%s1141_s2 + $0x160] sm:$0xff] %v449_v16  ;;  %vm323_vm14 = vcmp.gt.f32.partialorder %v259_v12, 0.0  ;;  %v387_v21 = vmul.f32 0.2, %v259_v12  ;;  %v697_v9 = vld [vmem:[%s1139_s0 + $0xf8] sm:$0xff]  }
  0x4a   :  { %514 = vst [vmem:[%s1141_s2 + $0x168] sm:$0xff] %v450_v17  ;;  %vm324_vm15 = vcmp.gt.f32.partialorder %v260_v13, 0.0  ;;  %v388_v22 = vmul.f32 0.2, %v260_v13  ;;  %v192_v23 = vmul.f32 %v637_v14, %v719_v1  ;;  %v193_v24 = vmul.f32 %v638_v15, %v719_v1 }
  0x4b   :  { %v194_v25 = vmul.f32 %v641_v18, %v719_v1  ;;  %v195_v26 = vmul.f32 %v642_v19, %v719_v1  ;;  %v451_v28 = vsel %vm323_vm14, %v259_v12, %v387_v21  ;;  %v645_v30 = vunpack.c.l.bf16 %v692_v20 }
  0x4c   :  { %v452_v29 = vsel %vm324_vm15, %v260_v13, %v388_v22  ;;  %v646_v31 = vunpack.c.h.bf16 %v692_v20  ;;  %515 = vst [vmem:[%s1141_s2 + $0x170] sm:$0xff] %v451_v28  ;;  %v261_v32 = vadd.f32 %v733_v7, %v192_v23  ;;  %v262_v33 = vadd.f32 %v733_v7, %v193_v24 }
  0x4d   :  { %516 = vst [vmem:[%s1141_s2 + $0x178] sm:$0xff] %v452_v29  ;;  %v263_v34 = vadd.f32 %v733_v7, %v194_v25  ;;  %v264_v35 = vadd.f32 %v733_v7, %v195_v26  ;;  %v196_v36 = vmul.f32 %v645_v30, %v719_v1  ;;  %v649_v38 = vunpack.c.l.bf16 %v693_v27 }
  0x4e   :  { %v197_v37 = vmul.f32 %v646_v31, %v719_v1  ;;  %v650_v39 = vunpack.c.h.bf16 %v693_v27  ;;  %vm325_vm0 = vcmp.gt.f32.partialorder %v261_v32, 0.0  ;;  %v389_v40 = vmul.f32 0.2, %v261_v32 }
  0x4f   :  { %vm326_vm1 = vcmp.gt.f32.partialorder %v262_v33, 0.0  ;;  %v390_v41 = vmul.f32 0.2, %v262_v33  ;;  %vm327_vm2 = vcmp.gt.f32.partialorder %v263_v34, 0.0  ;;  %v391_v42 = vmul.f32 0.2, %v263_v34 }
  0x50   :  { %vm328_vm3 = vcmp.gt.f32.partialorder %v264_v35, 0.0  ;;  %v392_v43 = vmul.f32 0.2, %v264_v35  ;;  %v453_v44 = vsel %vm325_vm0, %v261_v32, %v389_v40  ;;  %v265_v46 = vadd.f32 %v733_v7, %v196_v36 }
  0x51   :  { %v454_v45 = vsel %vm326_vm1, %v262_v33, %v390_v41  ;;  %v266_v47 = vadd.f32 %v733_v7, %v197_v37  ;;  %517 = vst [vmem:[%s1141_s2 + $0x180] sm:$0xff] %v453_v44  ;;  %v455_v49 = vsel %vm327_vm2, %v263_v34, %v391_v42  ;;  %v198_v51 = vmul.f32 %v649_v38, %v719_v1 }
  0x52   :  { %518 = vst [vmem:[%s1141_s2 + $0x188] sm:$0xff] %v454_v45  ;;  %v456_v50 = vsel %vm328_vm3, %v264_v35, %v392_v43  ;;  %v199_v52 = vmul.f32 %v650_v39, %v719_v1  ;;  %519 = vst [vmem:[%s1141_s2 + $0x190] sm:$0xff] %v455_v49  ;;  %vm329_vm4 = vcmp.gt.f32.partialorder %v265_v46, 0.0  ;;  %v393_v54 = vmul.f32 0.2, %v265_v46 }
  0x53   :  { %520 = vst [vmem:[%s1141_s2 + $0x198] sm:$0xff] %v456_v50  ;;  %vm330_vm5 = vcmp.gt.f32.partialorder %v266_v47, 0.0  ;;  %v394_v55 = vmul.f32 0.2, %v266_v47  ;;  %v267_v56 = vadd.f32 %v733_v7, %v198_v51  ;;  %v653_v58 = vunpack.c.l.bf16 %v694_v48 }
  0x54   :  { %v268_v57 = vadd.f32 %v733_v7, %v199_v52  ;;  %v654_v59 = vunpack.c.h.bf16 %v694_v48  ;;  %v457_v60 = vsel %vm329_vm4, %v265_v46, %v393_v54  ;;  %v657_v62 = vunpack.c.l.bf16 %v695_v53 }
  0x55   :  { %v458_v61 = vsel %vm330_vm5, %v266_v47, %v394_v55  ;;  %v658_v63 = vunpack.c.h.bf16 %v695_v53  ;;  %521 = vst [vmem:[%s1141_s2 + $0x1a0] sm:$0xff] %v457_v60  ;;  %vm331_vm6 = vcmp.gt.f32.partialorder %v267_v56, 0.0  ;;  %v395_v2 = vmul.f32 0.2, %v267_v56 }
  0x56   :  { %522 = vst [vmem:[%s1141_s2 + $0x1a8] sm:$0xff] %v458_v61  ;;  %vm332_vm7 = vcmp.gt.f32.partialorder %v268_v57, 0.0  ;;  %v396_v3 = vmul.f32 0.2, %v268_v57  ;;  %v200_v4 = vmul.f32 %v653_v58, %v719_v1  ;;  %v201_v5 = vmul.f32 %v654_v59, %v719_v1 }
  0x57   :  { %v202_v6 = vmul.f32 %v657_v62, %v719_v1  ;;  %v203_v8 = vmul.f32 %v658_v63, %v719_v1  ;;  %v459_v10 = vsel %vm331_vm6, %v267_v56, %v395_v2  ;;  %v661_v12 = vunpack.c.l.bf16 %v696_v0 }
  0x58   :  { %v460_v11 = vsel %vm332_vm7, %v268_v57, %v396_v3  ;;  %v662_v13 = vunpack.c.h.bf16 %v696_v0  ;;  %523 = vst [vmem:[%s1141_s2 + $0x1b0] sm:$0xff] %v459_v10  ;;  %v269_v14 = vadd.f32 %v733_v7, %v200_v4  ;;  %v270_v15 = vadd.f32 %v733_v7, %v201_v5 }
  0x59   :  { %524 = vst [vmem:[%s1141_s2 + $0x1b8] sm:$0xff] %v460_v11  ;;  %v271_v16 = vadd.f32 %v733_v7, %v202_v6  ;;  %v272_v17 = vadd.f32 %v733_v7, %v203_v8  ;;  %v204_v18 = vmul.f32 %v661_v12, %v719_v1  ;;  %v665_v20 = vunpack.c.l.bf16 %v697_v9 }
  0x5a   :  { %v205_v19 = vmul.f32 %v662_v13, %v719_v1  ;;  %v666_v21 = vunpack.c.h.bf16 %v697_v9  ;;  %vm333_vm8 = vcmp.gt.f32.partialorder %v269_v14, 0.0  ;;  %v397_v22 = vmul.f32 0.2, %v269_v14 }
  0x5b   :  { %vm334_vm9 = vcmp.gt.f32.partialorder %v270_v15, 0.0  ;;  %v398_v23 = vmul.f32 0.2, %v270_v15  ;;  %vm335_vm10 = vcmp.gt.f32.partialorder %v271_v16, 0.0  ;;  %v399_v24 = vmul.f32 0.2, %v271_v16 }
  0x5c   :  { %vm336_vm11 = vcmp.gt.f32.partialorder %v272_v17, 0.0  ;;  %v400_v25 = vmul.f32 0.2, %v272_v17  ;;  %v461_v26 = vsel %vm333_vm8, %v269_v14, %v397_v22  ;;  %v273_v28 = vadd.f32 %v733_v7, %v204_v18 }
  0x5d   :  { %v462_v27 = vsel %vm334_vm9, %v270_v15, %v398_v23  ;;  %v274_v29 = vadd.f32 %v733_v7, %v205_v19  ;;  %525 = vst [vmem:[%s1141_s2 + $0x1c0] sm:$0xff] %v461_v26  ;;  %v463_v30 = vsel %vm335_vm10, %v271_v16, %v399_v24  ;;  %v206_v32 = vmul.f32 %v665_v20, %v719_v1 }
  0x5e   :  { %526 = vst [vmem:[%s1141_s2 + $0x1c8] sm:$0xff] %v462_v27  ;;  %v464_v31 = vsel %vm336_vm11, %v272_v17, %v400_v25  ;;  %v207_v33 = vmul.f32 %v666_v21, %v719_v1  ;;  %527 = vst [vmem:[%s1141_s2 + $0x1d0] sm:$0xff] %v463_v30  ;;  %vm337_vm12 = vcmp.gt.f32.partialorder %v273_v28, 0.0  ;;  %v401_v34 = vmul.f32 0.2, %v273_v28 }
  0x5f   :  { %528 = vst [vmem:[%s1141_s2 + $0x1d8] sm:$0xff] %v464_v31  ;;  %vm338_vm13 = vcmp.gt.f32.partialorder %v274_v29, 0.0  ;;  %v402_v35 = vmul.f32 0.2, %v274_v29  ;;  %v275_v36 = vadd.f32 %v733_v7, %v206_v32 }
  0x60   :  { %v276_v37 = vadd.f32 %v733_v7, %v207_v33  ;;  %v465_v38 = vsel %vm337_vm12, %v273_v28, %v401_v34 }
  0x61   :  { %v466_v39 = vsel %vm338_vm13, %v274_v29, %v402_v35  ;;  %529 = vst [vmem:[%s1141_s2 + $0x1e0] sm:$0xff] %v465_v38  ;;  %vm339_vm14 = vcmp.gt.f32.partialorder %v275_v36, 0.0  ;;  %v403_v1 = vmul.f32 0.2, %v275_v36 }
  0x62   :  { %530 = vst [vmem:[%s1141_s2 + $0x1e8] sm:$0xff] %v466_v39  ;;  %vm340_vm15 = vcmp.gt.f32.partialorder %v276_v37, 0.0  ;;  %v404_v40 = vmul.f32 0.2, %v276_v37 }
  0x63   :  { %v467_v41 = vsel %vm339_vm14, %v275_v36, %v403_v1 }
  0x64   :  { %v468_v42 = vsel %vm340_vm15, %v276_v37, %v404_v40  ;;  %531 = vst [vmem:[%s1141_s2 + $0x1f0] sm:$0xff] %v467_v41 }
  0x65   :  { %532 = vst [vmem:[%s1141_s2 + $0x1f8] sm:$0xff] %v468_v42 }

// kernel: unet_conv_block.3
= control target key start
LH: loop header
LB: loop body
LE: loop exit
PB: predicated region body
PF: predicated region fallthrough
CT: control target
= control target key end

     0   :  { %s2399_s15 = smov 0   ;;  %s2401_s16 = smov 0   ;;  %s2954_s0 = inlined_call_operand.vmem [shape: bf16[2,18,18,4], index: 0, kind: input, shape index: {}, may-alias: {0,1}]   ;;  %s2955_s1 = inlined_call_operand.vmem [shape: bf16[2,18,18,4], index: 1, kind: input, shape index: {}, may-alias: {0,1}]   ;;  %s2956_s2 = inlined_call_operand.vmem [shape: bf16[36,128], index: 2, kind: input, shape index: {}]   ;;  %s2957_s3 = inlined_call_operand.vmem [shape: bf16[2,16,16,128], index: 3, kind: output, shape index: {0}]   ;;  %s2958_s4 = inlined_call_operand.vmem [shape: f32[2,1,2,128], index: 4, kind: output, shape index: {1}]  }
   0x1   :  { %s2403_s17 = smov 0  }
   0x2 LB: > { %s27_s18 = sadd.s32 1, %s2360_s16  ;;  %p1978_p0 = scmp.ge.s32.totalorder %s2364_s17, 1  ;;  %s2364_s17 = sphi %s2403_s17, %s15_s17   ;;  %s2360_s16 = sphi %s2401_s16, %s2960_s16   ;;  %s2356_s15 = sphi %s2399_s15, %s2959_s15  }
   0x3   : > { %p29_p1 = scmp.ge.s32.totalorder %s27_s18, 2  ;;  %p225_p2 = scmp.lt.s32.totalorder %s2364_s17, 3 }
   0x5   : > { %s2962_s18 = smov (%p29_p1, %s27_s18), 0  ;;  %p226_p3 = pnand %p1978_p0, %p225_p2 }
   0x6   : > { %p291_p4 = scmp.lt.s32.totalorder (!%p226_p3), %s2356_s15, 1  ;;  %vm747_vm0 = vcmask (!%p226_p3), 1046528   ;;  %s2366_s23 = smov (!%p226_p3), 12   ;;  %vm522_vm1 = vsmask.f32 (!%p226_p3), 7424  ;;  %v2323_v44 = vld [vmem:[%s2956_s2] sm:$0xff] (!%p226_p3)  }
   0x7   : > { %229 = sbr.rel (%p226_p3) target bundleno = 624 (0x270), region = 32  ;;  %s2367_s24 = smov (!%p226_p3), 20   ;;  %2222 = vmatprep.subr.bf16.mxu0 (!%p226_p3), %v2323_v44  ;;  %v2325_v46 = vld [vmem:[%s2956_s2 + $0x8] sm:$0xff] (!%p226_p3)   ;;  %2260 = vmatprep.subr.bf16.mxu1 (!%p226_p3), %v2323_v44  ;;  %v2327_v50 = vld [vmem:[%s2956_s2 + $0x10] ss:$0 sps:$4 sm:$0x33] (!%p226_p3)  }
   0x8   : > { %s2368_s25 = smov (!%p226_p3), 8   ;;  %s2369_s26 = smov (!%p226_p3), 4   ;;  %2223 = vmatpush3.bf16.msra.mxu0 (!%p226_p3), %v2323_v44  ;;  %2263 = vmatpush3.bf16.msra.mxu1 (!%p226_p3), %v2323_v44  ;;  %vm1383_vm2 = vcmask (!%p226_p3), 1041408   ;;  %vm1066_vm3 = vcmask (!%p226_p3), 31744   ;;  %vm1099_vm4 = vcmask (!%p226_p3), 64512   ;;  %vm1132_vm5 = vcmask (!%p226_p3), 97280  }
   0x9   : > { %s2370_s27 = smov (!%p226_p3), 16   ;;  %s2371_s30 = smov (!%p226_p3), 24   ;;  %2224 = vmatprep.subr.bf16.mxu0 (!%p226_p3), %v2325_v46  ;;  %2261 = vmatprep.subr.bf16.mxu1 (!%p226_p3), %v2325_v46  ;;  %v1385_v54 = vsel (!%p226_p3), %vm1383_vm2, %v2327_v50, 0  ;;  %vm1165_vm6 = vcmask (!%p226_p3), 130048   ;;  %vm1198_vm7 = vcmask (!%p226_p3), 162816   ;;  %vm1231_vm8 = vcmask (!%p226_p3), 195584  }
   0xa   : > { %s2372_s7 = smov (!%p226_p3), 28   ;;  %s2373_s10 = smov (!%p226_p3), 32   ;;  %vm1264_vm9 = vcmask (!%p226_p3), 228352   ;;  %vm1297_vm10 = vcmask (!%p226_p3), 261120   ;;  %vm1350_vm11 = vcmask (!%p226_p3), 293888  }
   0xc   : > { %2225 = vmatpush3.bf16.msra.mxu0 (!%p226_p3), %v2325_v46  ;;  %2264 = vmatpush3.bf16.msra.mxu1 (!%p226_p3), %v2325_v46 }
   0xd   : > { %2266 = vmatprep.subr.msk.bf16.mxu0 (!%p226_p3), %vm1383_vm2, %v2327_v50  ;;  %2267 = vmatprep.subr.msk.bf16.mxu1 (!%p226_p3), %vm1383_vm2, %v2327_v50 }
   0xe   : > { %s2964_s15 = smov (!%p291_p4, %s2356_s15), 1 }
   0xf   : > { %s2268_s19 = smul.u32 216, %s2964_s15 }
  0x10   : > { %2227 = vmatpush3.bf16.msra.mxu0 %v1385_v54  ;;  %2265 = vmatpush3.bf16.msra.mxu1 %v1385_v54 }
  0x11   : > { %s2425_s22 = scalar_lea.vmem %s2954_s0, %s2268_s19  ;;  %s2074_s11 = sadd.s32 192, %s2268_s19 }
  0x12   : > { %v2428_v0 = vld [vmem:[%s2425_s22 + $0x18] sm:$0xff]   ;;  %v2431_v1 = vld [vmem:[%s2425_s22 + $0xc] sm:$0xff]   ;;  %v2305_v2 = vld [vmem:[%s2425_s22 + $0x14] ss:$0 sps:$4 sm:$0x11]   ;;  %s2581_s14 = scalar_lea.vmem %s2955_s1, %s2074_s11  ;;  %s2075_s19 = sshll.u32 %s2964_s15, 7 }
  0x13   : > { %835 = vrot.lane.b32.xlu1 %v2428_v0, %s2366_s23  ;;  %v2437_v3 = vld [vmem:[%s2425_s22] sm:$0xff]   ;;  %833 = vrot.lane.b32.xlu0 %v2431_v1, %s2366_s23  ;;  %v751_v4 = vrot.slane %v2431_v1, 1  ;;  %v752_v5 = vrot.slane %v2305_v2, 1  ;;  %v2307_v6 = vld [vmem:[%s2425_s22 + $0x8] ss:$0 sps:$4 sm:$0x11]  }
  0x14   : > { %v748_v7 = vrot.slane %v2437_v3, 1  ;;  %v524_v8 = vshrl.u32 %v2437_v3, 16  ;;  %v526_v9 = vshll.u32 %v2437_v3, 16  ;;  %v536_v10 = vshrl.u32 %v2431_v1, 16  ;;  %v2457_v30 = vld [vmem:[%s2425_s22 + $0x24] sm:$0xff]   ;;  %v2487_v49 = vld [vmem:[%s2425_s22 + $0x30] sm:$0xff]  }
  0x15   : > { %v753_v11 = vsel %vm747_vm0, %v751_v4, %v752_v5  ;;  %v749_v12 = vrot.slane %v2307_v6, 1  ;;  %v531_v13 = vshll.u32 %v2307_v6, 16  ;;  %v2308_v14 = vld [vmem:[%s2425_s22 + $0x20] ss:$0 sps:$4 sm:$0x11]   ;;  %v538_v15 = vshll.u32 %v2431_v1, 16 }
  0x16   : > { %v528_v16 = vrot.slane %v526_v9, 1  ;;  %v543_v17 = vshll.u32 %v2305_v2, 16  ;;  %v550_v18 = vshll.u32 %v2428_v0, 16  ;;  %v754_v23 = vrot.slane %v2428_v0, 1  ;;  %v2503_v60 = vld [vmem:[%s2425_s22 + $0x3c] sm:$0xff]  }
  0x17   : > { %915 = vrot.lane.b32.xlu0 %v753_v11, %s2367_s24  ;;  %v750_v19 = vsel %vm747_vm0, %v748_v7, %v749_v12  ;;  %v533_v20 = vrot.slane %v531_v13, 1  ;;  %v540_v21 = vrot.slane %v538_v15, 1  ;;  %v548_v25 = vshrl.u32 %v2428_v0, 16  ;;  %v2310_v33 = vld [vmem:[%s2425_s22 + $0x2c] ss:$0 sps:$4 sm:$0x11]  }
  0x18   : > { %796 = vrot.lane.b32.xlu1 %v750_v19, %s2368_s25  ;;  %v529_v22 = vor.u32 %v528_v16, %v524_v8  ;;  %v545_v24 = vrot.slane %v543_v17, 1  ;;  %v755_v26 = vrot.slane %v2308_v14, 1  ;;  %v552_v28 = vrot.slane %v550_v18, 1  ;;  %v2312_v51 = vld [vmem:[%s2425_s22 + $0x38] ss:$0 sps:$4 sm:$0x11]  }
  0x19   : > { %v541_v27 = vor.u32 %v540_v21, %v536_v10  ;;  %v555_v29 = vshll.u32 %v2308_v14, 16  ;;  %v562_v37 = vshll.u32 %v2457_v30, 16  ;;  %v560_v39 = vshrl.u32 %v2457_v30, 16  ;;  %v2314_v2 = vld [vmem:[%s2425_s22 + $0x44] ss:$0 sps:$4 sm:$0x11]  }
  0x1a   : > { %v534_v31 = vsel %vm522_vm1, %v529_v22, %v533_v20  ;;  %v756_v34 = vsel %vm747_vm0, %v754_v23, %v755_v26  ;;  %v553_v35 = vor.u32 %v552_v28, %v548_v25  ;;  %v567_v41 = vshll.u32 %v2310_v33, 16  ;;  %v2528_v14 = vld [vmem:[%s2425_s22 + $0x48] sm:$0xff]   ;;  %v2316_v16 = vld [vmem:[%s2425_s22 + $0x50] ss:$0 sps:$4 sm:$0x11]   ;;  %v2541_v23 = vld [vmem:[%s2425_s22 + $0x54] sm:$0xff]  }
  0x1b   : > { %715 = vrot.lane.b32.xlu0 %v534_v31, %s2369_s26  ;;  %v546_v32 = vsel %vm522_vm1, %v541_v27, %v545_v24  ;;  %v557_v36 = vrot.slane %v555_v29, 1  ;;  %v564_v40 = vrot.slane %v562_v37, 1  ;;  %v757_v47 = vrot.slane %v2457_v30, 1  ;;  %v2318_v27 = vld [vmem:[%s2425_s22 + $0x5c] ss:$0 sps:$4 sm:$0x11]  }
  0x1c   : > { %798 = vrot.lane.b32.xlu1 %v753_v11, %s2368_s25  ;;  %v569_v43 = vrot.slane %v567_v41, 1  ;;  %v758_v48 = vrot.slane %v2310_v33, 1  ;;  %v574_v53 = vshll.u32 %v2487_v49, 16  ;;  %v572_v55 = vshrl.u32 %v2487_v49, 16 }
  0x1d   : > { %v558_v38 = vsel %vm522_vm1, %v553_v35, %v557_v36  ;;  %v565_v42 = vor.u32 %v564_v40, %v560_v39  ;;  %v579_v57 = vshll.u32 %v2312_v51, 16  ;;  %v760_v62 = vrot.slane %v2487_v49, 1  ;;  %v2566_v39 = vld [vmem:[%s2425_s22 + $0x60] sm:$0xff]   ;;  %v2320_v41 = vld [vmem:[%s2425_s22 + $0x68] ss:$0 sps:$4 sm:$0x11]  }
  0x1e   : > { %v759_v52 = vsel %vm747_vm0, %v757_v47, %v758_v48  ;;  %v576_v56 = vrot.slane %v574_v53, 1  ;;  %v761_v63 = vrot.slane %v2312_v51, 1  ;;  %v586_v4 = vshll.u32 %v2503_v60, 16  ;;  %v2586_v48 = vld [vmem:[%s2425_s22 + $0x6c] sm:$0xff]  }
  0x1f   : > { %717 = vrot.lane.b32.xlu0 %v546_v32, %s2369_s26  ;;  %v570_v45 = vsel %vm522_vm1, %v565_v42, %v569_v43  ;;  %v581_v59 = vrot.slane %v579_v57, 1  ;;  %v584_v6 = vshrl.u32 %v2503_v60, 16  ;;  %v591_v8 = vshll.u32 %v2314_v2, 16  ;;  %v2322_v53 = vld [vmem:[%s2425_s22 + $0x74] ss:$0 sps:$4 sm:$0x11]  }
  0x20   : > { %917 = vrot.lane.b32.xlu1 %v756_v34, %s2367_s24  ;;  %v577_v58 = vor.u32 %v576_v56, %v572_v55  ;;  %v762_v5 = vsel %vm747_vm0, %v760_v62, %v761_v63  ;;  %v588_v7 = vrot.slane %v586_v4, 1  ;;  %v763_v12 = vrot.slane %v2503_v60, 1 }
  0x21   : > { %v593_v10 = vrot.slane %v591_v8, 1  ;;  %v764_v13 = vrot.slane %v2314_v2, 1  ;;  %v598_v17 = vshll.u32 %v2528_v14, 16  ;;  %v596_v18 = vshrl.u32 %v2528_v14, 16 }
  0x22   : > { %v582_v61 = vsel %vm522_vm1, %v577_v58, %v581_v59  ;;  %v589_v9 = vor.u32 %v588_v7, %v584_v6  ;;  %v603_v20 = vshll.u32 %v2316_v16, 16  ;;  %v766_v25 = vrot.slane %v2528_v14, 1 }
  0x23   : > { %880 = vrot.lane.b32.xlu0 %v546_v32, %s2370_s27  ;;  %v765_v15 = vsel %vm747_vm0, %v763_v12, %v764_v13  ;;  %v600_v19 = vrot.slane %v598_v17, 1  ;;  %v767_v26 = vrot.slane %v2316_v16, 1  ;;  %v610_v28 = vshll.u32 %v2541_v23, 16  ;;  %v2326_v13 = vld [vmem:[%s2425_s22 + $0x80] ss:$0 sps:$4 sm:$0x11]  }
  0x24   : > { %882 = vrot.lane.b32.xlu1 %v558_v38, %s2370_s27  ;;  %v594_v11 = vsel %vm522_vm1, %v589_v9, %v593_v10  ;;  %v605_v22 = vrot.slane %v603_v20, 1  ;;  %v608_v31 = vshrl.u32 %v2541_v23, 16  ;;  %v615_v33 = vshll.u32 %v2318_v27, 16  ;;  %v2611_v9 = vld [vmem:[%s2425_s22 + $0x78] sm:$0xff]  }
  0x25   : > { %v601_v21 = vor.u32 %v600_v19, %v596_v18  ;;  %v768_v29 = vsel %vm747_vm0, %v766_v25, %v767_v26  ;;  %v612_v32 = vrot.slane %v610_v28, 1  ;;  %v769_v37 = vrot.slane %v2541_v23, 1  ;;  %v2629_v28 = vld [vmem:[%s2425_s22 + $0x84] sm:$0xff]  }
  0x26   : > { %v617_v35 = vrot.slane %v615_v33, 1  ;;  %v622_v42 = vshll.u32 %v2566_v39, 16  ;;  %v620_v43 = vshrl.u32 %v2566_v39, 16  ;;  %v772_v51 = vrot.slane %v2566_v39, 1 }
  0x27   : > { %952 = vrot.lane.b32.xlu0 %v2428_v0, %s2371_s30  ;;  %v606_v24 = vsel %vm522_vm1, %v601_v21, %v605_v22  ;;  %v634_v54 = vshll.u32 %v2586_v48, 16  ;;  %v632_v56 = vshrl.u32 %v2586_v48, 16  ;;  %v639_v58 = vshll.u32 %v2322_v53, 16 }
  0x28   : > { %954 = vrot.lane.b32.xlu1 %v2457_v30, %s2371_s30  ;;  %v624_v44 = vrot.slane %v622_v42, 1  ;;  %v775_v6 = vrot.slane %v2586_v48, 1  ;;  %v776_v7 = vrot.slane %v2322_v53, 1  ;;  %v644_v19 = vshrl.u32 %v2611_v9, 16 }
  0x29   : > { %v636_v57 = vrot.slane %v634_v54, 1  ;;  %v641_v63 = vrot.slane %v639_v58, 1  ;;  %v651_v21 = vshll.u32 %v2326_v13, 16  ;;  %v778_v33 = vrot.slane %v2611_v9, 1 }
  0x2a   : > { %v625_v46 = vor.u32 %v624_v44, %v620_v43 }
  0x2b   : > { %999 = vrot.lane.b32.xlu0 %v558_v38, %s2372_s7  ;;  %v637_v62 = vor.u32 %v636_v57, %v632_v56 }
  0x2c   : > { %1001 = vrot.lane.b32.xlu1 %v570_v45, %s2372_s7 }
  0x2d   : > { %v642_v4 = vsel %vm522_vm1, %v637_v62, %v641_v63 }
  0x2f   : > { %1034 = vrot.lane.b32.xlu0 %v756_v34, %s2373_s10 }
  0x30   : > { %719 = vrot.lane.b32.xlu1 %v558_v38, %s2369_s26  ;;  %v770_v38 = vrot.slane %v2318_v27, 1 }
  0x32   : > { %v771_v40 = vsel %vm747_vm0, %v769_v37, %v770_v38  ;;  %v2329_v38 = vld [vmem:[%s2425_s22 + $0x8c] ss:$0 sps:$4 sm:$0x11]  }
  0x33   : > { %1036 = vrot.lane.b32.xlu0 %v759_v52, %s2373_s10 }
  0x34   : > { %721 = vrot.lane.b32.xlu1 %v570_v45, %s2369_s26 }
  0x37   : > { %800 = vrot.lane.b32.xlu0 %v756_v34, %s2368_s25  ;;  %v613_v34 = vor.u32 %v612_v32, %v608_v31 }
  0x38   : > { %802 = vrot.lane.b32.xlu1 %v759_v52, %s2368_s25 }
  0x39   : > { %v618_v36 = vsel %vm522_vm1, %v613_v34, %v617_v35  ;;  %v779_v34 = vrot.slane %v2326_v13, 1 }
  0x3b   : > { %837 = vrot.lane.b32.xlu0 %v2457_v30, %s2366_s23 }
  0x3c   : > { %839 = vrot.lane.b32.xlu1 %v2487_v49, %s2366_s23 }
  0x3f   : > { %884 = vrot.lane.b32.xlu0 %v570_v45, %s2370_s27  ;;  %v627_v45 = vshll.u32 %v2320_v41, 16 }
  0x40   : > { %886 = vrot.lane.b32.xlu1 %v582_v61, %s2370_s27 }
  0x41   : > { %v629_v47 = vrot.slane %v627_v45, 1  ;;  %v780_v45 = vsel %vm747_vm0, %v778_v33, %v779_v34 }
  0x43   : > { %919 = vrot.lane.b32.xlu0 %v759_v52, %s2367_s24  ;;  %v630_v50 = vsel %vm522_vm1, %v625_v46, %v629_v47  ;;  %v773_v52 = vrot.slane %v2320_v41, 1 }
  0x44   : > { %921 = vrot.lane.b32.xlu1 %v762_v5, %s2367_s24 }
  0x45   : > { %v774_v55 = vsel %vm747_vm0, %v772_v51, %v773_v52  ;;  %v663_v52 = vshll.u32 %v2329_v38, 16 }
  0x47   : > { %956 = vrot.lane.b32.xlu0 %v2487_v49, %s2371_s30 }
  0x48   : > { %958 = vrot.lane.b32.xlu1 %v2503_v60, %s2371_s30 }
  0x4b   : > { %1003 = vrot.lane.b32.xlu0 %v582_v61, %s2372_s7 }
  0x4c   : > { %1005 = vrot.lane.b32.xlu1 %v594_v11, %s2372_s7 }
  0x4f   : > { %1038 = vrot.lane.b32.xlu0 %v762_v5, %s2373_s10 }
  0x50   : > { %723 = vrot.lane.b32.xlu1 %v582_v61, %s2369_s26 }
  0x53   : > { %1040 = vrot.lane.b32.xlu0 %v765_v15, %s2373_s10 }
  0x54   : > { %725 = vrot.lane.b32.xlu1 %v594_v11, %s2369_s26 }
  0x57   : > { %804 = vrot.lane.b32.xlu0 %v762_v5, %s2368_s25 }
  0x58   : > { %806 = vrot.lane.b32.xlu1 %v765_v15, %s2368_s25 }
  0x5b   : > { %841 = vrot.lane.b32.xlu0 %v2503_v60, %s2366_s23 }
  0x5c   : > { %843 = vrot.lane.b32.xlu1 %v2528_v14, %s2366_s23 }
  0x5f   : > { %888 = vrot.lane.b32.xlu0 %v594_v11, %s2370_s27  ;;  %v777_v11 = vsel %vm747_vm0, %v775_v6, %v776_v7  ;;  %v781_v6 = vrot.slane %v2629_v28, 1  ;;  %v782_v7 = vrot.slane %v2329_v38, 1 }
  0x60   : > { %890 = vrot.lane.b32.xlu1 %v606_v24, %s2370_s27 }
  0x63   : > { %923 = vrot.lane.b32.xlu0 %v765_v15, %s2367_s24  ;;  %v646_v15 = vshll.u32 %v2611_v9, 16 }
  0x64   : > { %925 = vrot.lane.b32.xlu1 %v768_v29, %s2367_s24 }
  0x65   : > { %v648_v20 = vrot.slane %v646_v15, 1  ;;  %v2331_v15 = vld [vmem:[%s2425_s22 + $0x98] ss:$0 sps:$4 sm:$0x11]  }
  0x67   : > { %960 = vrot.lane.b32.xlu0 %v2528_v14, %s2371_s30  ;;  %v649_v27 = vor.u32 %v648_v20, %v644_v19 }
  0x68   : > { %962 = vrot.lane.b32.xlu1 %v2541_v23, %s2371_s30 }
  0x6b   : > { %1007 = vrot.lane.b32.xlu0 %v606_v24, %s2372_s7 }
  0x6c   : > { %1009 = vrot.lane.b32.xlu1 %v618_v36, %s2372_s7 }
  0x6f   : > { %1042 = vrot.lane.b32.xlu0 %v768_v29, %s2373_s10 }
  0x70   : > { %727 = vrot.lane.b32.xlu1 %v606_v24, %s2369_s26 }
  0x73   : > { %1044 = vrot.lane.b32.xlu0 %v771_v40, %s2373_s10 }
  0x74   : > { %729 = vrot.lane.b32.xlu1 %v618_v36, %s2369_s26 }
  0x77   : > { %808 = vrot.lane.b32.xlu0 %v768_v29, %s2368_s25 }
  0x78   : > { %810 = vrot.lane.b32.xlu1 %v771_v40, %s2368_s25 }
  0x7b   : > { %845 = vrot.lane.b32.xlu0 %v2541_v23, %s2366_s23 }
  0x7c   : > { %847 = vrot.lane.b32.xlu1 %v2566_v39, %s2366_s23 }
  0x7f   : > { %892 = vrot.lane.b32.xlu0 %v618_v36, %s2370_s27 }
  0x80   : > { %894 = vrot.lane.b32.xlu1 %v630_v50, %s2370_s27 }
  0x83   : > { %927 = vrot.lane.b32.xlu0 %v771_v40, %s2367_s24  ;;  %v658_v40 = vshll.u32 %v2629_v28, 16 }
  0x84   : > { %929 = vrot.lane.b32.xlu1 %v774_v55, %s2367_s24 }
  0x85   : > { %v836_v59 = vpop.permute.xlu1 %835  ;;  %v834_v61 = vpop.permute.xlu0 %833  ;;  %v660_v51 = vrot.slane %v658_v40, 1 }
  0x87   : > { %964 = vrot.lane.b32.xlu0 %v2566_v39, %s2371_s30 }
  0x88   : > { %966 = vrot.lane.b32.xlu1 %v2586_v48, %s2371_s30 }
  0x89   : > { %v916_v2 = vpop.permute.xlu0 %915 }
  0x8a   : > { %v797_v5 = vpop.permute.xlu1 %796 }
  0x8b   : > { %1011 = vrot.lane.b32.xlu0 %v630_v50, %s2372_s7 }
  0x8c   : > { %1013 = vrot.lane.b32.xlu1 %v642_v4, %s2372_s7 }
  0x8d   : > { %v716_v8 = vpop.permute.xlu0 %715 }
  0x8e   : > { %v799_v10 = vpop.permute.xlu1 %798  ;;  %v1068_v17 = vsel %vm1066_vm3, %v2437_v3, %v716_v8  ;;  %v653_v3 = vrot.slane %v651_v21, 1  ;;  %v675_v21 = vshll.u32 %v2331_v15, 16 }
  0x8f   : > { %1046 = vrot.lane.b32.xlu0 %v774_v55, %s2373_s10  ;;  %v1101_v25 = vsel %vm1099_vm4, %v1068_v17, %v797_v5 }
  0x90   : > { %731 = vrot.lane.b32.xlu1 %v630_v50, %s2369_s26  ;;  %v1134_v32 = vsel %vm1132_vm5, %v1101_v25, %v834_v61  ;;  %v654_v37 = vsel %vm522_vm1, %v649_v27, %v653_v3  ;;  %v656_v50 = vshrl.u32 %v2629_v28, 16  ;;  %v665_v61 = vrot.slane %v663_v52, 1  ;;  %v2682_v27 = vld [vmem:[%s2425_s22 + $0x9c] sm:$0xff]  }
  0x91   : > { %v718_v12 = vpop.permute.xlu0 %717 }
  0x92   : > { %v918_v16 = vpop.permute.xlu1 %917  ;;  %v1070_v24 = vsel %vm1066_vm3, %v2431_v1, %v718_v12  ;;  %v783_v12 = vsel %vm747_vm0, %v781_v6, %v782_v7  ;;  %v787_v6 = vrot.slane %v2682_v27, 1 }
  0x93   : > { %1048 = vrot.lane.b32.xlu0 %v777_v11, %s2373_s10  ;;  %v1103_v29 = vsel %vm1099_vm4, %v1070_v24, %v799_v10  ;;  %v2669_v10 = vld [vmem:[%s2425_s22 + $0x90] sm:$0xff]  }
  0x94   : > { %733 = vrot.lane.b32.xlu1 %v642_v4, %s2369_s26  ;;  %v1136_v35 = vsel %vm1132_vm5, %v1103_v29, %v836_v59  ;;  %v661_v59 = vor.u32 %v660_v51, %v656_v50  ;;  %v668_v19 = vshrl.u32 %v2669_v10, 16 }
  0x95   : > { %v881_v18 = vpop.permute.xlu0 %880 }
  0x96   : > { %v883_v22 = vpop.permute.xlu1 %882  ;;  %v1167_v1 = vsel %vm1165_vm6, %v1134_v32, %v881_v18  ;;  %v784_v32 = vrot.slane %v2669_v10, 1 }
  0x97   : > { %812 = vrot.lane.b32.xlu0 %v774_v55, %s2368_s25  ;;  %v1200_v42 = vsel %vm1198_vm7, %v1167_v1, %v916_v2  ;;  %v1169_v43 = vsel %vm1165_vm6, %v1136_v35, %v883_v22  ;;  %v785_v1 = vrot.slane %v2331_v15, 1 }
  0x98   : > { %814 = vrot.lane.b32.xlu1 %v777_v11, %s2368_s25  ;;  %v1202_v55 = vsel %vm1198_vm7, %v1169_v43, %v918_v16  ;;  %v670_v16 = vshll.u32 %v2669_v10, 16 }
  0x99   : > { %v953_v26 = vpop.permute.xlu0 %952 }
  0x9a   : > { %v955_v31 = vpop.permute.xlu1 %954  ;;  %v1233_v44 = vsel %vm1231_vm8, %v1200_v42, %v953_v26  ;;  %v672_v20 = vrot.slane %v670_v16, 1  ;;  %v677_v26 = vrot.slane %v675_v21, 1  ;;  %v2335_v16 = vld [vmem:[%s2425_s22 + $0xb0] ss:$0 sps:$4 sm:$0x11]  }
  0x9b   : > { %849 = vrot.lane.b32.xlu0 %v2586_v48, %s2366_s23  ;;  %v1235_v56 = vsel %vm1231_vm8, %v1202_v55, %v955_v31 }
  0x9c   : > { %851 = vrot.lane.b32.xlu1 %v2611_v9, %s2366_s23  ;;  %v673_v25 = vor.u32 %v672_v20, %v668_v19 }
  0x9d   : > { %v1000_v36 = vpop.permute.xlu0 %999 }
  0x9e   : > { %v1002_v41 = vpop.permute.xlu1 %1001  ;;  %v1266_v46 = vsel %vm1264_vm9, %v1233_v44, %v1000_v36  ;;  %v678_v35 = vsel %vm522_vm1, %v673_v25, %v677_v26  ;;  %v2333_v36 = vld [vmem:[%s2425_s22 + $0xa4] ss:$0 sps:$4 sm:$0x11]   ;;  %v786_v44 = vsel %vm747_vm0, %v784_v32, %v785_v1 }
  0x9f   : > { %896 = vrot.lane.b32.xlu0 %v642_v4, %s2370_s27  ;;  %v1268_v57 = vsel %vm1264_vm9, %v1235_v56, %v1002_v41  ;;  %v666_v4 = vsel %vm522_vm1, %v661_v59, %v665_v61  ;;  %v687_v51 = vshll.u32 %v2333_v36, 16  ;;  %v788_v7 = vrot.slane %v2333_v36, 1 }
  0xa0   : > { %898 = vrot.lane.b32.xlu1 %v654_v37, %s2370_s27 }
  0xa1   : > { %v1035_v47 = vpop.permute.xlu0 %1034  ;;  %v689_v61 = vrot.slane %v687_v51, 1 }
  0xa2   : > { %v720_v53 = vpop.permute.xlu1 %719  ;;  %v1299_v54 = vsel %vm1297_vm10, %v1266_v46, %v1035_v47 }
  0xa3   : > { %931 = vrot.lane.b32.xlu0 %v777_v11, %s2367_s24  ;;  %2228 = vmatprep.mubr.msk.bf16.mxu0 %vm1350_vm11, %v1299_v54  ;;  %v1072_v29 = vsel %vm1066_vm3, %v2428_v0, %v720_v53 }
  0xa4   : > { %933 = vrot.lane.b32.xlu1 %v780_v45, %s2367_s24 }
  0xa5   : > { %v1037_v58 = vpop.permute.xlu0 %1036 }
  0xa6   : > { %v722_v62 = vpop.permute.xlu1 %721  ;;  %v1301_v63 = vsel %vm1297_vm10, %v1268_v57, %v1037_v58 }
  0xa7   : > { %968 = vrot.lane.b32.xlu0 %v2611_v9, %s2371_s30  ;;  %2229 = vmatmul.mubr.msk.bf16.vlgmr.msra.gmra.mrb[0].mxu0 %vm1350_vm11, %v1301_v63  ;;  %v1074_v40 = vsel %vm1066_vm3, %v2457_v30, %v722_v62 }
  0xa8   : > { %970 = vrot.lane.b32.xlu1 %v2629_v28, %s2371_s30 }
  0xa9   : > { %v801_v2 = vpop.permute.xlu0 %800 }
  0xaa   : > { %v803_v5 = vpop.permute.xlu1 %802  ;;  %v1105_v31 = vsel %vm1099_vm4, %v1072_v29, %v801_v2  ;;  %v2740_v29 = vld [vmem:[%s2425_s22 + $0xb4] sm:$0xff]  }
  0xab   : > { %1015 = vrot.lane.b32.xlu0 %v654_v37, %s2372_s7  ;;  %v1107_v42 = vsel %vm1099_vm4, %v1074_v40, %v803_v5 }
  0xac   : > { %1017 = vrot.lane.b32.xlu1 %v666_v4, %s2372_s7 }
  0xad   : > { %v838_v8 = vpop.permute.xlu0 %837 }
  0xae   : > { %v840_v11 = vpop.permute.xlu1 %839  ;;  %v1138_v33 = vsel %vm1132_vm5, %v1105_v31, %v838_v8 }
  0xaf   : > { %1050 = vrot.lane.b32.xlu0 %v780_v45, %s2373_s10  ;;  %v1140_v46 = vsel %vm1132_vm5, %v1107_v42, %v840_v11  ;;  %v2727_v11 = vld [vmem:[%s2425_s22 + $0xa8] sm:$0xff]  }
  0xb0   : > { %735 = vrot.lane.b32.xlu1 %v654_v37, %s2369_s26  ;;  %v682_v37 = vshll.u32 %v2682_v27, 16  ;;  %v692_v20 = vshrl.u32 %v2727_v11, 16 }
  0xb1   : > { %v885_v13 = vpop.permute.xlu0 %884 }
  0xb2   : > { %v887_v17 = vpop.permute.xlu1 %886  ;;  %v1171_v0 = vsel %vm1165_vm6, %v1138_v33, %v885_v13  ;;  %v684_v30 = vrot.slane %v682_v37, 1  ;;  %v789_v13 = vsel %vm747_vm0, %v787_v6, %v788_v7  ;;  %v790_v33 = vrot.slane %v2727_v11, 1 }
  0xb3   : > { %1052 = vrot.lane.b32.xlu0 %v783_v12, %s2373_s10  ;;  %v1173_v52 = vsel %vm1165_vm6, %v1140_v46, %v887_v17  ;;  %v694_v17 = vshll.u32 %v2727_v11, 16  ;;  %v704_v46 = vshrl.u32 %v2740_v29, 16  ;;  %v793_v6 = vrot.slane %v2740_v29, 1 }
  0xb4   : > { %737 = vrot.lane.b32.xlu1 %v666_v4, %s2369_s26 }
  0xb5   : > { %v920_v18 = vpop.permute.xlu0 %919  ;;  %v696_v21 = vrot.slane %v694_v17, 1  ;;  %v2339_v17 = vld [vmem:[%s2581_s14 + $0x8] ss:$0 sps:$4 sm:$0x11]  }
  0xb6   : > { %v922_v22 = vpop.permute.xlu1 %921  ;;  %v1204_v41 = vsel %vm1198_vm7, %v1171_v0, %v920_v18  ;;  %v2337_v0 = vld [vmem:[%s2425_s22 + $0xbc] ss:$0 sps:$4 sm:$0x11]   ;;  %s2911_s22 = scalar_lea.vmem %s2957_s3, %s2075_s19 }
  0xb7   : > { %816 = vrot.lane.b32.xlu0 %v780_v45, %s2368_s25  ;;  %v680_v45 = vshrl.u32 %v2682_v27, 16  ;;  %v1206_v55 = vsel %vm1198_vm7, %v1173_v52, %v922_v22  ;;  %v699_v22 = vshll.u32 %v2335_v16, 16  ;;  %v697_v26 = vor.u32 %v696_v21, %v692_v20 }
  0xb8   : > { %818 = vrot.lane.b32.xlu1 %v783_v12, %s2368_s25  ;;  %v711_v51 = vshll.u32 %v2337_v0, 16  ;;  %v794_v7 = vrot.slane %v2337_v0, 1 }
  0xb9   : > { %v957_v24 = vpop.permute.xlu0 %956  ;;  %v685_v59 = vor.u32 %v684_v30, %v680_v45 }
  0xba   : > { %v959_v3 = vpop.permute.xlu1 %958  ;;  %v1237_v43 = vsel %vm1231_vm8, %v1204_v41, %v957_v24 }
  0xbb   : > { %853 = vrot.lane.b32.xlu0 %v2629_v28, %s2366_s23  ;;  %v1239_v56 = vsel %vm1231_vm8, %v1206_v55, %v959_v3  ;;  %v701_v3 = vrot.slane %v699_v22, 1 }
  0xbc   : > { %855 = vrot.lane.b32.xlu1 %v2669_v10, %s2366_s23 }
  0xbd   : > { %v1004_v34 = vpop.permute.xlu0 %1003  ;;  %v702_v37 = vsel %vm522_vm1, %v697_v26, %v701_v3 }
  0xbe   : > { %v1006_v38 = vpop.permute.xlu1 %1005  ;;  %v1270_v47 = vsel %vm1264_vm9, %v1237_v43, %v1004_v34  ;;  %v791_v34 = vrot.slane %v2335_v16, 1 }
  0xbf   : > { %900 = vrot.lane.b32.xlu0 %v666_v4, %s2370_s27  ;;  %v1272_v57 = vsel %vm1264_vm9, %v1239_v56, %v1006_v38  ;;  %v690_v4 = vsel %vm522_vm1, %v685_v59, %v689_v61  ;;  %v706_v38 = vshll.u32 %v2740_v29, 16  ;;  %v713_v61 = vrot.slane %v711_v51, 1 }
  0xc0   : > { %902 = vrot.lane.b32.xlu1 %v678_v35, %s2370_s27  ;;  %v792_v45 = vsel %vm747_vm0, %v790_v33, %v791_v34 }
  0xc1   : > { %v1039_v50 = vpop.permute.xlu0 %1038 }
  0xc2   : > { %v724_v53 = vpop.permute.xlu1 %723  ;;  %v1303_v54 = vsel %vm1297_vm10, %v1270_v47, %v1039_v50 }
  0xc3   : > { %935 = vrot.lane.b32.xlu0 %v783_v12, %s2367_s24  ;;  %2232 = vmatprep.mubr.msk.bf16.mxu0 %vm1350_vm11, %v1303_v54  ;;  %v1076_v32 = vsel %vm1066_vm3, %v2487_v49, %v724_v53 }
  0xc4   : > { %937 = vrot.lane.b32.xlu1 %v786_v44, %s2367_s24 }
  0xc5   : > { %v1041_v58 = vpop.permute.xlu0 %1040 }
  0xc6   : > { %v726_v62 = vpop.permute.xlu1 %725  ;;  %v1305_v63 = vsel %vm1297_vm10, %v1272_v57, %v1041_v58 }
  0xc7   : > { %972 = vrot.lane.b32.xlu0 %v2669_v10, %s2371_s30  ;;  %2233 = vmatmul.mubr.msk.bf16.gmra.mrb[4].mxu0 %vm1350_vm11, %v1305_v63  ;;  %v1078_v41 = vsel %vm1066_vm3, %v2503_v60, %v726_v62  ;;  %v708_v60 = vrot.slane %v706_v38, 1 }
  0xc8   : > { %974 = vrot.lane.b32.xlu1 %v2682_v27, %s2371_s30 }
  0xc9   : > { %v805_v2 = vpop.permute.xlu0 %804  ;;  %v709_v59 = vor.u32 %v708_v60, %v704_v46 }
  0xca   : > { %v807_v5 = vpop.permute.xlu1 %806  ;;  %v1109_v1 = vsel %vm1099_vm4, %v1076_v32, %v805_v2  ;;  %v2340_v32 = vld [vmem:[%s2581_s14 + $0xc] sm:$0xff]  }
  0xcb   : > { %1019 = vrot.lane.b32.xlu0 %v678_v35, %s2372_s7  ;;  %v1111_v43 = vsel %vm1099_vm4, %v1078_v41, %v807_v5 }
  0xcc   : > { %1021 = vrot.lane.b32.xlu1 %v690_v4, %s2372_s7 }
  0xcd   : > { %v842_v8 = vpop.permute.xlu0 %841 }
  0xce   : > { %v844_v12 = vpop.permute.xlu1 %843 }
  0xcf   : > { %1054 = vrot.lane.b32.xlu0 %v786_v44, %s2373_s10  ;;  %v1144_v47 = vsel %vm1132_vm5, %v1111_v43, %v844_v12  ;;  %v2785_v12 = vld [vmem:[%s2581_s14] sm:$0xff]  }
  0xd0   : > { %739 = vrot.lane.b32.xlu1 %v678_v35, %s2369_s26  ;;  %v1142_v35 = vsel %vm1132_vm5, %v1109_v1, %v842_v8  ;;  %v869_v21 = vshrl.u32 %v2785_v12, 16 }
  0xd1   : > { %v889_v15 = vpop.permute.xlu0 %888 }
  0xd2   : > { %v891_v18 = vpop.permute.xlu1 %890  ;;  %v1175_v49 = vsel %vm1165_vm6, %v1142_v35, %v889_v15  ;;  %v795_v15 = vsel %vm747_vm0, %v793_v6, %v794_v7  ;;  %v912_v35 = vrot.slane %v2785_v12, 1 }
  0xd3   : > { %1056 = vrot.lane.b32.xlu0 %v789_v13, %s2373_s10  ;;  %v1177_v52 = vsel %vm1165_vm6, %v1144_v47, %v891_v18  ;;  %v871_v18 = vshll.u32 %v2785_v12, 16  ;;  %v988_v47 = vshrl.u32 %v2340_v32, 16 }
  0xd4   : > { %741 = vrot.lane.b32.xlu1 %v690_v4, %s2369_s26 }
  0xd5   : > { %v924_v19 = vpop.permute.xlu0 %923  ;;  %v873_v22 = vrot.slane %v871_v18, 1 }
  0xd6   : > { %v926_v24 = vpop.permute.xlu1 %925  ;;  %v1208_v42 = vsel %vm1198_vm7, %v1175_v49, %v924_v19  ;;  %v2341_v49 = vld [vmem:[%s2581_s14 + $0x14] ss:$0 sps:$4 sm:$0x11]  }
  0xd7   : > { %820 = vrot.lane.b32.xlu0 %v786_v44, %s2368_s25  ;;  %v1210_v55 = vsel %vm1198_vm7, %v1177_v52, %v926_v24  ;;  %v876_v24 = vshll.u32 %v2339_v17, 16  ;;  %v874_v3 = vor.u32 %v873_v22, %v869_v21  ;;  %v1032_v6 = vrot.slane %v2341_v49, 1 }
  0xd8   : > { %822 = vrot.lane.b32.xlu1 %v789_v13, %s2368_s25 }
  0xd9   : > { %v961_v25 = vpop.permute.xlu0 %960 }
  0xda   : > { %v963_v31 = vpop.permute.xlu1 %962  ;;  %v1241_v44 = vsel %vm1231_vm8, %v1208_v42, %v961_v25 }
  0xdb   : > { %857 = vrot.lane.b32.xlu0 %v2682_v27, %s2366_s23  ;;  %v1243_v56 = vsel %vm1231_vm8, %v1210_v55, %v963_v31  ;;  %v878_v31 = vrot.slane %v876_v24, 1 }
  0xdc   : > { %859 = vrot.lane.b32.xlu1 %v2727_v11, %s2366_s23 }
  0xdd   : > { %v1008_v36 = vpop.permute.xlu0 %1007  ;;  %v879_v38 = vsel %vm522_vm1, %v874_v3, %v878_v31 }
  0xde   : > { %v1010_v40 = vpop.permute.xlu1 %1009  ;;  %v1274_v50 = vsel %vm1264_vm9, %v1241_v44, %v1008_v36  ;;  %v913_v36 = vrot.slane %v2339_v17, 1 }
  0xdf   : > { %904 = vrot.lane.b32.xlu0 %v690_v4, %s2370_s27  ;;  %v1276_v57 = vsel %vm1264_vm9, %v1243_v56, %v1010_v40  ;;  %v714_v4 = vsel %vm522_vm1, %v709_v59, %v713_v61  ;;  %v990_v40 = vshll.u32 %v2340_v32, 16 }
  0xe0   : > { %906 = vrot.lane.b32.xlu1 %v702_v37, %s2370_s27  ;;  %v914_v46 = vsel %vm747_vm0, %v912_v35, %v913_v36 }
  0xe1   : > { %v1043_v30 = vpop.permute.xlu0 %1042  ;;  %v992_v51 = vrot.slane %v990_v40, 1 }
  0xe2   : > { %v728_v53 = vpop.permute.xlu1 %727  ;;  %v1307_v54 = vsel %vm1297_vm10, %v1274_v50, %v1043_v30 }
  0xe3   : > { %939 = vrot.lane.b32.xlu0 %v789_v13, %s2367_s24  ;;  %2236 = vmatprep.mubr.msk.bf16.mxu0 %vm1350_vm11, %v1307_v54  ;;  %v1080_v33 = vsel %vm1066_vm3, %v2528_v14, %v728_v53  ;;  %v993_v59 = vor.u32 %v992_v51, %v988_v47 }
  0xe4   : > { %941 = vrot.lane.b32.xlu1 %v792_v45, %s2367_s24 }
  0xe5   : > { %v1045_v58 = vpop.permute.xlu0 %1044 }
  0xe6   : > { %v730_v62 = vpop.permute.xlu1 %729  ;;  %v1309_v63 = vsel %vm1297_vm10, %v1276_v57, %v1045_v58 }
  0xe7   : > { %976 = vrot.lane.b32.xlu0 %v2727_v11, %s2371_s30  ;;  %2237 = vmatmul.mubr.msk.bf16.gmra.mrb[8].mxu0 %vm1350_vm11, %v1309_v63  ;;  %v1082_v42 = vsel %vm1066_vm3, %v2541_v23, %v730_v62  ;;  %v995_v23 = vshll.u32 %v2341_v49, 16 }
  0xe8   : > { %978 = vrot.lane.b32.xlu1 %v2740_v29, %s2371_s30 }
  0xe9   : > { %v809_v2 = vpop.permute.xlu0 %808  ;;  %v997_v61 = vrot.slane %v995_v23, 1 }
  0xea   : > { %v811_v5 = vpop.permute.xlu1 %810  ;;  %v1113_v34 = vsel %vm1099_vm4, %v1080_v33, %v809_v2 }
  0xeb   : > { %1023 = vrot.lane.b32.xlu0 %v702_v37, %s2372_s7  ;;  %v1115_v44 = vsel %vm1099_vm4, %v1082_v42, %v811_v5  ;;  %v1031_v5 = vrot.slane %v2340_v32, 1 }
  0xec   : > { %1025 = vrot.lane.b32.xlu1 %v714_v4, %s2372_s7 }
  0xed   : > { %v846_v8 = vpop.permute.xlu0 %845 }
  0xee   : > { %v848_v13 = vpop.permute.xlu1 %847 }
  0xef   : > { %1058 = vrot.lane.b32.xlu0 %v792_v45, %s2373_s10  ;;  %v1148_v50 = vsel %vm1132_vm5, %v1115_v44, %v848_v13  ;;  %v1033_v13 = vsel %vm747_vm0, %v1031_v5, %v1032_v6 }
  0xf0   : > { %743 = vrot.lane.b32.xlu1 %v702_v37, %s2369_s26  ;;  %v1146_v37 = vsel %vm1132_vm5, %v1113_v34, %v846_v8 }
  0xf1   : > { %v893_v16 = vpop.permute.xlu0 %892 }
  0xf2   : > { %v895_v19 = vpop.permute.xlu1 %894  ;;  %v1179_v14 = vsel %vm1165_vm6, %v1146_v37, %v893_v16 }
  0xf3   : > { %1060 = vrot.lane.b32.xlu0 %v795_v15, %s2373_s10  ;;  %v1181_v52 = vsel %vm1165_vm6, %v1148_v50, %v895_v19 }
  0xf4   : > { %745 = vrot.lane.b32.xlu1 %v714_v4, %s2369_s26 }
  0xf5   : > { %v928_v20 = vpop.permute.xlu0 %927 }
  0xf6   : > { %v930_v25 = vpop.permute.xlu1 %929  ;;  %v1212_v43 = vsel %vm1198_vm7, %v1179_v14, %v928_v20 }
  0xf7   : > { %824 = vrot.lane.b32.xlu0 %v792_v45, %s2368_s25  ;;  %v1214_v55 = vsel %vm1198_vm7, %v1181_v52, %v930_v25 }
  0xf8   : > { %826 = vrot.lane.b32.xlu1 %v795_v15, %s2368_s25 }
  0xf9   : > { %v965_v26 = vpop.permute.xlu0 %964 }
  0xfa   : > { %v967_v1 = vpop.permute.xlu1 %966  ;;  %v1245_v45 = vsel %vm1231_vm8, %v1212_v43, %v965_v26 }
  0xfb   : > { %861 = vrot.lane.b32.xlu0 %v2740_v29, %s2366_s23  ;;  %v1247_v56 = vsel %vm1231_vm8, %v1214_v55, %v967_v1 }
  0xfc   : > { %863 = vrot.lane.b32.xlu1 %v2785_v12, %s2366_s23  ;;  %s1983_s23 = sshll.u32 %s2964_s15, 1 }
  0xfd   : > { %v1012_v0 = vpop.permute.xlu0 %1011  ;;  %s338_s26 = scalar_lea.vmem %s2958_s4, %s1983_s23 }
  0xfe   : > { %v1014_v41 = vpop.permute.xlu1 %1013  ;;  %v1278_v30 = vsel %vm1264_vm9, %v1245_v45, %v1012_v0 }
  0xff   : > { %908 = vrot.lane.b32.xlu0 %v714_v4, %s2370_s27  ;;  %v1280_v57 = vsel %vm1264_vm9, %v1247_v56, %v1014_v41  ;;  %v998_v4 = vsel %vm522_vm1, %v993_v59, %v997_v61 }
 0x100   : > { %910 = vrot.lane.b32.xlu1 %v879_v38, %s2370_s27 }
 0x101   : > { %v1047_v60 = vpop.permute.xlu0 %1046 }
 0x102   : > { %v732_v53 = vpop.permute.xlu1 %731  ;;  %v1311_v54 = vsel %vm1297_vm10, %v1278_v30, %v1047_v60 }
 0x103   : > { %943 = vrot.lane.b32.xlu0 %v795_v15, %s2367_s24  ;;  %2240 = vmatprep.mubr.msk.bf16.mxu0 %vm1350_vm11, %v1311_v54  ;;  %v1084_v21 = vsel %vm1066_vm3, %v2566_v39, %v732_v53 }
 0x104   : > { %945 = vrot.lane.b32.xlu1 %v914_v46, %s2367_s24 }
 0x105   : > { %v1049_v58 = vpop.permute.xlu0 %1048 }
 0x106   : > { %v734_v62 = vpop.permute.xlu1 %733  ;;  %v1313_v63 = vsel %vm1297_vm10, %v1280_v57, %v1049_v58 }
 0x107   : > { %980 = vrot.lane.b32.xlu0 %v2785_v12, %s2371_s30  ;;  %2241 = vmatmul.mubr.msk.bf16.gmra.mrb[12].mxu0 %vm1350_vm11, %v1313_v63  ;;  %v1086_v31 = vsel %vm1066_vm3, %v2586_v48, %v734_v62 }
 0x108   : > { %982 = vrot.lane.b32.xlu1 %v2340_v32, %s2371_s30 }
 0x109   : > { %v813_v2 = vpop.permute.xlu0 %812 }
 0x10a   : > { %v815_v7 = vpop.permute.xlu1 %814  ;;  %v1117_v22 = vsel %vm1099_vm4, %v1084_v21, %v813_v2 }
 0x10b   : > { %1027 = vrot.lane.b32.xlu0 %v879_v38, %s2372_s7  ;;  %v1119_v1 = vsel %vm1099_vm4, %v1086_v31, %v815_v7 }
 0x10c   : > { %1029 = vrot.lane.b32.xlu1 %v998_v4, %s2372_s7 }
 0x10d   : > { %v850_v8 = vpop.permute.xlu0 %849 }
 0x10e   : > { %v852_v15 = vpop.permute.xlu1 %851  ;;  %v1150_v24 = vsel %vm1132_vm5, %v1117_v22, %v850_v8 }
 0x10f   : > { %1062 = vrot.lane.b32.xlu0 %v914_v46, %s2373_s10  ;;  %v1152_v34 = vsel %vm1132_vm5, %v1119_v1, %v852_v15 }
 0x110   : > { %1064 = vrot.lane.b32.xlu1 %v1033_v13, %s2373_s10 }
 0x111   : > { %v897_v12 = vpop.permute.xlu0 %896 }
 0x112   : > { %v899_v16 = vpop.permute.xlu1 %898  ;;  %v1183_v26 = vsel %vm1165_vm6, %v1150_v24, %v897_v12 }
 0x113   : > { %v1185_v36 = vsel %vm1165_vm6, %v1152_v34, %v899_v16 }
 0x115   : > { %v932_v17 = vpop.permute.xlu0 %931 }
 0x116   : > { %v934_v18 = vpop.permute.xlu1 %933  ;;  %v1216_v32 = vsel %vm1198_vm7, %v1183_v26, %v932_v17 }
 0x117   : > { %v1218_v38 = vsel %vm1198_vm7, %v1185_v36, %v934_v18 }
 0x119   : > { %v969_v19 = vpop.permute.xlu0 %968 }
 0x11a   : > { %v971_v20 = vpop.permute.xlu1 %970  ;;  %v1249_v33 = vsel %vm1231_vm8, %v1216_v32, %v969_v19 }
 0x11b   : > { %v1251_v48 = vsel %vm1231_vm8, %v1218_v38, %v971_v20 }
 0x11d   : > { %v1016_v25 = vpop.permute.xlu0 %1015 }
 0x11e   : > { %v1018_v3 = vpop.permute.xlu1 %1017  ;;  %v1282_v39 = vsel %vm1264_vm9, %v1249_v33, %v1016_v25 }
 0x11f   : > { %v1284_v49 = vsel %vm1264_vm9, %v1251_v48, %v1018_v3 }
 0x121   : > { %v1051_v35 = vpop.permute.xlu0 %1050 }
 0x122   : > { %v736_v37 = vpop.permute.xlu1 %735  ;;  %v1315_v0 = vsel %vm1297_vm10, %v1282_v39, %v1051_v35 }
 0x123   : > { %2244 = vmatprep.mubr.msk.bf16.mxu1 %vm1350_vm11, %v1315_v0  ;;  %v1088_v23 = vsel %vm1066_vm3, %v2611_v9, %v736_v37 }
 0x125   : > { %v1053_v40 = vpop.permute.xlu0 %1052 }
 0x126   : > { %v738_v14 = vpop.permute.xlu1 %737  ;;  %v1317_v41 = vsel %vm1297_vm10, %v1284_v49, %v1053_v40 }
 0x127   : > { %2245 = vmatmul.mubr.msk.bf16.vlgmr.msra.gmra.mrb[0].mxu1 %vm1350_vm11, %v1317_v41  ;;  %v1090_v57 = vsel %vm1066_vm3, %v2629_v28, %v738_v14 }
 0x129   : > { %v817_v42 = vpop.permute.xlu0 %816 }
 0x12a   : > { %v819_v43 = vpop.permute.xlu1 %818  ;;  %v1121_v52 = vsel %vm1099_vm4, %v1088_v23, %v817_v42 }
 0x12b   : > { %v1123_v59 = vsel %vm1099_vm4, %v1090_v57, %v819_v43 }
 0x12d   : > { %v854_v44 = vpop.permute.xlu0 %853 }
 0x12e   : > { %v856_v45 = vpop.permute.xlu1 %855  ;;  %v1154_v53 = vsel %vm1132_vm5, %v1121_v52, %v854_v44 }
 0x12f   : > { %v1156_v62 = vsel %vm1132_vm5, %v1123_v59, %v856_v45 }
 0x131   : > { %v901_v46 = vpop.permute.xlu0 %900 }
 0x132   : > { %v903_v47 = vpop.permute.xlu1 %902  ;;  %v1187_v55 = vsel %vm1165_vm6, %v1154_v53, %v901_v46 }
 0x133   : > { %v1189_v2 = vsel %vm1165_vm6, %v1156_v62, %v903_v47 }
 0x135   : > { %v936_v50 = vpop.permute.xlu0 %935 }
 0x136   : > { %v938_v30 = vpop.permute.xlu1 %937  ;;  %v1220_v58 = vsel %vm1198_vm7, %v1187_v55, %v936_v50 }
 0x137   : > { %v1222_v6 = vsel %vm1198_vm7, %v1189_v2, %v938_v30 }
 0x139   : > { %v973_v60 = vpop.permute.xlu0 %972 }
 0x13a   : > { %v975_v51 = vpop.permute.xlu1 %974  ;;  %v1253_v61 = vsel %vm1231_vm8, %v1220_v58, %v973_v60 }
 0x13b   : > { %v1255_v28 = vsel %vm1231_vm8, %v1222_v6, %v975_v51 }
 0x13d   : > { %v1020_v54 = vpop.permute.xlu0 %1019 }
 0x13e   : > { %v1022_v56 = vpop.permute.xlu1 %1021  ;;  %v1286_v9 = vsel %vm1264_vm9, %v1253_v61, %v1020_v54 }
 0x13f   : > { %v1288_v7 = vsel %vm1264_vm9, %v1255_v28, %v1022_v56 }
 0x141   : > { %v1055_v63 = vpop.permute.xlu0 %1054 }
 0x142   : > { %v740_v4 = vpop.permute.xlu1 %739  ;;  %v1319_v5 = vsel %vm1297_vm10, %v1286_v9, %v1055_v63 }
 0x143   : > { %2248 = vmatprep.mubr.msk.bf16.mxu1 %vm1350_vm11, %v1319_v5  ;;  %v1092_v26 = vsel %vm1066_vm3, %v2669_v10, %v740_v4 }
 0x145   : > { %v1057_v8 = vpop.permute.xlu0 %1056 }
 0x146   : > { %v742_v13 = vpop.permute.xlu1 %741  ;;  %v1321_v15 = vsel %vm1297_vm10, %v1288_v7, %v1057_v8 }
 0x147   : > { %2249 = vmatmul.mubr.msk.bf16.gmra.mrb[4].mxu1 %vm1350_vm11, %v1321_v15  ;;  %v1094_v34 = vsel %vm1066_vm3, %v2682_v27, %v742_v13 }
 0x149   : > { %v821_v12 = vpop.permute.xlu0 %820 }
 0x14a   : > { %v823_v16 = vpop.permute.xlu1 %822  ;;  %v1125_v3 = vsel %vm1099_vm4, %v1092_v26, %v821_v12 }
 0x14b   : > { %v1127_v35 = vsel %vm1099_vm4, %v1094_v34, %v823_v16 }
 0x14d   : > { %v858_v17 = vpop.permute.xlu0 %857 }
 0x14e   : > { %v860_v18 = vpop.permute.xlu1 %859  ;;  %v1158_v31 = vsel %vm1132_vm5, %v1125_v3, %v858_v17 }
 0x14f   : > { %v1160_v37 = vsel %vm1132_vm5, %v1127_v35, %v860_v18 }
 0x151   : > { %v905_v19 = vpop.permute.xlu0 %904 }
 0x152   : > { %v907_v20 = vpop.permute.xlu1 %906  ;;  %v1191_v1 = vsel %vm1165_vm6, %v1158_v31, %v905_v19 }
 0x153   : > { %v1193_v38 = vsel %vm1165_vm6, %v1160_v37, %v907_v20 }
 0x155   : > { %v940_v21 = vpop.permute.xlu0 %939 }
 0x156   : > { %v942_v22 = vpop.permute.xlu1 %941  ;;  %v1224_v39 = vsel %vm1198_vm7, %v1191_v1, %v940_v21 }
 0x157   : > { %v1226_v40 = vsel %vm1198_vm7, %v1193_v38, %v942_v22 }
 0x159   : > { %v977_v24 = vpop.permute.xlu0 %976 }
 0x15a   : > { %v979_v25 = vpop.permute.xlu1 %978  ;;  %v1257_v36 = vsel %vm1231_vm8, %v1224_v39, %v977_v24 }
 0x15b   : > { %v1259_v27 = vsel %vm1231_vm8, %v1226_v40, %v979_v25 }
 0x15d   : > { %v1024_v32 = vpop.permute.xlu0 %1023 }
 0x15e   : > { %v1026_v33 = vpop.permute.xlu1 %1025  ;;  %v1290_v10 = vsel %vm1264_vm9, %v1257_v36, %v1024_v32 }
 0x15f   : > { %v1292_v14 = vsel %vm1264_vm9, %v1259_v27, %v1026_v33 }
 0x161   : > { %v1059_v0 = vpop.permute.xlu0 %1058 }
 0x162   : > { %v744_v48 = vpop.permute.xlu1 %743  ;;  %v1323_v49 = vsel %vm1297_vm10, %v1290_v10, %v1059_v0 }
 0x163   : > { %2252 = vmatprep.mubr.msk.bf16.mxu1 %vm1350_vm11, %v1323_v49  ;;  %v1096_v52 = vsel %vm1066_vm3, %v2727_v11, %v744_v48 }
 0x165   : > { %v1061_v41 = vpop.permute.xlu0 %1060 }
 0x166   : > { %v746_v42 = vpop.permute.xlu1 %745  ;;  %v1325_v43 = vsel %vm1297_vm10, %v1292_v14, %v1061_v41 }
 0x167   : > { %2253 = vmatmul.mubr.msk.bf16.gmra.mrb[8].mxu1 %vm1350_vm11, %v1325_v43  ;;  %v1098_v53 = vsel %vm1066_vm3, %v2740_v29, %v746_v42 }
 0x169   : > { %v825_v44 = vpop.permute.xlu0 %824 }
 0x16a   : > { %v827_v45 = vpop.permute.xlu1 %826  ;;  %v1129_v57 = vsel %vm1099_vm4, %v1096_v52, %v825_v44 }
 0x16b   : > { %v1131_v56 = vsel %vm1099_vm4, %v1098_v53, %v827_v45 }
 0x16d   : > { %v862_v46 = vpop.permute.xlu0 %861 }
 0x16e   : > { %v864_v47 = vpop.permute.xlu1 %863  ;;  %v1162_v61 = vsel %vm1132_vm5, %v1129_v57, %v862_v46 }
 0x16f   : > { %v1164_v59 = vsel %vm1132_vm5, %v1131_v56, %v864_v47 }
 0x171   : > { %v909_v50 = vpop.permute.xlu0 %908 }
 0x172   : > { %v911_v30 = vpop.permute.xlu1 %910  ;;  %v1195_v62 = vsel %vm1165_vm6, %v1162_v61, %v909_v50 }
 0x173   : > { %v1197_v29 = vsel %vm1165_vm6, %v1164_v59, %v911_v30 }
 0x175   : > { %v944_v60 = vpop.permute.xlu0 %943 }
 0x176   : > { %v946_v51 = vpop.permute.xlu1 %945  ;;  %v1228_v13 = vsel %vm1198_vm7, %v1195_v62, %v944_v60 }
 0x177   : > { %v1230_v8 = vsel %vm1198_vm7, %v1197_v29, %v946_v51 }
 0x179   : > { %v981_v23 = vpop.permute.xlu0 %980 }
 0x17a   : > { %v983_v54 = vpop.permute.xlu1 %982  ;;  %v2230_v55 = vpop.f32.mrb[0].mxu0  ;;  %v1261_v15 = vsel %vm1231_vm8, %v1228_v13, %v981_v23 }
 0x17b   : > { %v1421_v58 = vpop.f32.mrb[1].mxu0  ;;  %v1748_v12 = vmul.f32 %v2230_v55, %v2230_v55  ;;  %v1263_v18 = vsel %vm1231_vm8, %v1230_v8, %v983_v54 }
 0x17c   : > { %v2231_v11 = vpop.f32.mrb[2].mxu0  ;;  %v1746_v4 = vmul.f32 %v1421_v58, %v1421_v58 }
 0x17d   : > { %v2116_v9 = vpack.c.bf16 %v2231_v11, %v2230_v55  ;;  %v1424_v63 = vpop.f32.mrb[3].mxu0  ;;  %v1028_v2 = vpop.permute.xlu0 %1027  ;;  %v1749_v19 = vmul.f32 %v2231_v11, %v2231_v11 }
 0x17e   : > { %v1030_v5 = vpop.permute.xlu1 %1029  ;;  %v2111_v6 = vpack.c.bf16 %v1424_v63, %v1421_v58  ;;  %v1708_v28 = vadd.f32 %v1424_v63, %v1421_v58  ;;  %v1747_v7 = vmul.f32 %v1424_v63, %v1424_v63  ;;  %v1294_v20 = vsel %vm1264_vm9, %v1261_v15, %v1028_v2 }
 0x17f   : > { %2188 = vst [vmem:[%s2911_s22 + $0x8] sm:$0xff] %v2116_v9   ;;  %v1296_v22 = vsel %vm1264_vm9, %v1263_v18, %v1030_v5 }
 0x180   : > { %2112 = vst [vmem:[%s2911_s22] sm:$0xff] %v2111_v6   ;;  %v1709_v16 = vadd.f32 %v2230_v55, %v1708_v28  ;;  %v1778_v17 = vadd.f32 %v1747_v7, %v1746_v4 }
 0x181   : > { %v1063_v21 = vpop.permute.xlu0 %1062 }
 0x182   : > { %v1779_v24 = vadd.f32 %v1778_v17, %v1748_v12  ;;  %v1065_v25 = vpop.permute.xlu1 %1064  ;;  %v1327_v26 = vsel %vm1297_vm10, %v1294_v20, %v1063_v21  ;;  %v1710_v3 = vadd.f32 %v2231_v11, %v1709_v16 }
 0x183   : > { %v1329_v31 = vsel %vm1297_vm10, %v1296_v22, %v1065_v25  ;;  %2256 = vmatprep.mubr.msk.bf16.mxu1 %vm1350_vm11, %v1327_v26 }
 0x184   : > { %2257 = vmatmul.mubr.msk.bf16.gmra.mrb[12].mxu1 %vm1350_vm11, %v1329_v31  ;;  %v1780_v32 = vadd.f32 %v1779_v24, %v1749_v19 }
 0x19a   : > { %v2234_v1 = vpop.f32.mrb[4].mxu0 }
 0x19b   : > { %v1437_v33 = vpop.f32.mrb[5].mxu0  ;;  %v1752_v49 = vmul.f32 %v2234_v1, %v2234_v1 }
 0x19c   : > { %v1711_v34 = vadd.f32 %v1710_v3, %v1437_v33  ;;  %v1750_v39 = vmul.f32 %v1437_v33, %v1437_v33  ;;  %v2235_v35 = vpop.f32.mrb[6].mxu0 }
 0x19d   : > { %v2126_v36 = vpack.c.bf16 %v2235_v35, %v2234_v1  ;;  %v1440_v37 = vpop.f32.mrb[7].mxu0  ;;  %v1753_v14 = vmul.f32 %v2235_v35, %v2235_v35 }
 0x19e   : > { %v1781_v10 = vadd.f32 %v1780_v32, %v1750_v39  ;;  %v2121_v0 = vpack.c.bf16 %v1440_v37, %v1437_v33  ;;  %v1712_v38 = vadd.f32 %v1711_v34, %v1440_v37  ;;  %v1751_v48 = vmul.f32 %v1440_v37, %v1440_v37 }
 0x19f   : > { %2190 = vst [vmem:[%s2911_s22 + $0x18] sm:$0xff] %v2126_v36  }
 0x1a0   : > { %2189 = vst [vmem:[%s2911_s22 + $0x10] sm:$0xff] %v2121_v0   ;;  %v1713_v40 = vadd.f32 %v2234_v1, %v1712_v38  ;;  %v1782_v27 = vadd.f32 %v1781_v10, %v1751_v48 }
 0x1a2   : > { %v1783_v41 = vadd.f32 %v1782_v27, %v1752_v49  ;;  %v1714_v42 = vadd.f32 %v2235_v35, %v1713_v40 }
 0x1a4   : > { %v1784_v43 = vadd.f32 %v1783_v41, %v1753_v14 }
 0x1ba   : > { %v2238_v44 = vpop.f32.mrb[8].mxu0 }
 0x1bb   : > { %v1453_v45 = vpop.f32.mrb[9].mxu0  ;;  %v1756_v54 = vmul.f32 %v2238_v44, %v2238_v44 }
 0x1bc   : > { %v1715_v46 = vadd.f32 %v1714_v42, %v1453_v45  ;;  %v1754_v47 = vmul.f32 %v1453_v45, %v1453_v45  ;;  %v2239_v50 = vpop.f32.mrb[10].mxu0 }
 0x1bd   : > { %v2136_v30 = vpack.c.bf16 %v2239_v50, %v2238_v44  ;;  %v1456_v60 = vpop.f32.mrb[11].mxu0  ;;  %v1757_v57 = vmul.f32 %v2239_v50, %v2239_v50 }
 0x1be   : > { %v1785_v51 = vadd.f32 %v1784_v43, %v1754_v47  ;;  %v2131_v23 = vpack.c.bf16 %v1456_v60, %v1453_v45  ;;  %v1716_v52 = vadd.f32 %v1715_v46, %v1456_v60  ;;  %v1755_v53 = vmul.f32 %v1456_v60, %v1456_v60 }
 0x1bf   : > { %2192 = vst [vmem:[%s2911_s22 + $0x28] sm:$0xff] %v2136_v30  }
 0x1c0   : > { %2191 = vst [vmem:[%s2911_s22 + $0x20] sm:$0xff] %v2131_v23   ;;  %v1717_v55 = vadd.f32 %v2238_v44, %v1716_v52  ;;  %v1786_v56 = vadd.f32 %v1785_v51, %v1755_v53 }
 0x1c2   : > { %v1787_v58 = vadd.f32 %v1786_v56, %v1756_v54  ;;  %v1718_v59 = vadd.f32 %v2239_v50, %v1717_v55 }
 0x1c4   : > { %v1788_v61 = vadd.f32 %v1787_v58, %v1757_v57 }
 0x1da   : > { %v2242_v11 = vpop.f32.mrb[12].mxu0 }
 0x1db   : > { %v1469_v29 = vpop.f32.mrb[13].mxu0  ;;  %v1760_v8 = vmul.f32 %v2242_v11, %v2242_v11 }
 0x1dc   : > { %v1719_v62 = vadd.f32 %v1718_v59, %v1469_v29  ;;  %v1758_v9 = vmul.f32 %v1469_v29, %v1469_v29  ;;  %v2243_v63 = vpop.f32.mrb[14].mxu0 }
 0x1dd   : > { %v2146_v2 = vpack.c.bf16 %v2243_v63, %v2242_v11  ;;  %v1472_v4 = vpop.f32.mrb[15].mxu0  ;;  %v1761_v12 = vmul.f32 %v2243_v63, %v2243_v63 }
 0x1de   : > { %v1789_v5 = vadd.f32 %v1788_v61, %v1758_v9  ;;  %v2141_v6 = vpack.c.bf16 %v1472_v4, %v1469_v29  ;;  %v1720_v28 = vadd.f32 %v1719_v62, %v1472_v4  ;;  %v1759_v7 = vmul.f32 %v1472_v4, %v1472_v4 }
 0x1df   : > { %2194 = vst [vmem:[%s2911_s22 + $0x38] sm:$0xff] %v2146_v2  }
 0x1e0   : > { %2193 = vst [vmem:[%s2911_s22 + $0x30] sm:$0xff] %v2141_v6   ;;  %v1721_v13 = vadd.f32 %v2242_v11, %v1720_v28  ;;  %v1790_v15 = vadd.f32 %v1789_v5, %v1759_v7 }
 0x1e2   : > { %v1791_v16 = vadd.f32 %v1790_v15, %v1760_v8  ;;  %v1722_v17 = vadd.f32 %v2243_v63, %v1721_v13 }
 0x1e4   : > { %v1792_v18 = vadd.f32 %v1791_v16, %v1761_v12 }
 0x1fa   : > { %v2246_v19 = vpop.f32.mrb[0].mxu1 }
 0x1fb   : > { %v1485_v20 = vpop.f32.mrb[1].mxu1  ;;  %v1764_v33 = vmul.f32 %v2246_v19, %v2246_v19 }
 0x1fc   : > { %v1723_v21 = vadd.f32 %v1722_v17, %v1485_v20  ;;  %v1762_v22 = vmul.f32 %v1485_v20, %v1485_v20  ;;  %v2247_v24 = vpop.f32.mrb[2].mxu1 }
 0x1fd   : > { %v2156_v25 = vpack.c.bf16 %v2247_v24, %v2246_v19  ;;  %v1488_v26 = vpop.f32.mrb[3].mxu1  ;;  %v1765_v35 = vmul.f32 %v2247_v24, %v2247_v24 }
 0x1fe   : > { %v1793_v3 = vadd.f32 %v1792_v18, %v1762_v22  ;;  %v2151_v31 = vpack.c.bf16 %v1488_v26, %v1485_v20  ;;  %v1724_v32 = vadd.f32 %v1723_v21, %v1488_v26  ;;  %v1763_v1 = vmul.f32 %v1488_v26, %v1488_v26 }
 0x1ff   : > { %2196 = vst [vmem:[%s2911_s22 + $0x48] sm:$0xff] %v2156_v25  }
 0x200   : > { %2195 = vst [vmem:[%s2911_s22 + $0x40] sm:$0xff] %v2151_v31   ;;  %v1725_v34 = vadd.f32 %v2246_v19, %v1724_v32  ;;  %v1794_v39 = vadd.f32 %v1793_v3, %v1763_v1 }
 0x202   : > { %v1795_v36 = vadd.f32 %v1794_v39, %v1764_v33  ;;  %v1726_v37 = vadd.f32 %v2247_v24, %v1725_v34 }
 0x204   : > { %v1796_v10 = vadd.f32 %v1795_v36, %v1765_v35 }
 0x21a   : > { %v2250_v0 = vpop.f32.mrb[4].mxu1 }
 0x21b   : > { %v1501_v38 = vpop.f32.mrb[5].mxu1  ;;  %v1768_v45 = vmul.f32 %v2250_v0, %v2250_v0 }
 0x21c   : > { %v1727_v48 = vadd.f32 %v1726_v37, %v1501_v38  ;;  %v1766_v49 = vmul.f32 %v1501_v38, %v1501_v38  ;;  %v2251_v40 = vpop.f32.mrb[6].mxu1 }
 0x21d   : > { %v2166_v27 = vpack.c.bf16 %v2251_v40, %v2250_v0  ;;  %v1504_v14 = vpop.f32.mrb[7].mxu1  ;;  %v1769_v50 = vmul.f32 %v2251_v40, %v2251_v40 }
 0x21e   : > { %v1797_v41 = vadd.f32 %v1796_v10, %v1766_v49  ;;  %v2161_v42 = vpack.c.bf16 %v1504_v14, %v1501_v38  ;;  %v1728_v43 = vadd.f32 %v1727_v48, %v1504_v14  ;;  %v1767_v44 = vmul.f32 %v1504_v14, %v1504_v14 }
 0x21f   : > { %2198 = vst [vmem:[%s2911_s22 + $0x58] sm:$0xff] %v2166_v27  }
 0x220   : > { %2197 = vst [vmem:[%s2911_s22 + $0x50] sm:$0xff] %v2161_v42   ;;  %v1729_v46 = vadd.f32 %v2250_v0, %v1728_v43  ;;  %v1798_v47 = vadd.f32 %v1797_v41, %v1767_v44 }
 0x222   : > { %v1799_v30 = vadd.f32 %v1798_v47, %v1768_v45  ;;  %v1730_v60 = vadd.f32 %v2251_v40, %v1729_v46 }
 0x224   : > { %v1800_v51 = vadd.f32 %v1799_v30, %v1769_v50 }
 0x23a   : > { %v2254_v23 = vpop.f32.mrb[8].mxu1 }
 0x23b   : > { %v1517_v52 = vpop.f32.mrb[9].mxu1  ;;  %v1772_v29 = vmul.f32 %v2254_v23, %v2254_v23 }
 0x23c   : > { %v1731_v53 = vadd.f32 %v1730_v60, %v1517_v52  ;;  %v1770_v54 = vmul.f32 %v1517_v52, %v1517_v52  ;;  %v2255_v55 = vpop.f32.mrb[10].mxu1 }
 0x23d   : > { %v2176_v56 = vpack.c.bf16 %v2255_v55, %v2254_v23  ;;  %v1520_v57 = vpop.f32.mrb[11].mxu1  ;;  %v1773_v63 = vmul.f32 %v2255_v55, %v2255_v55 }
 0x23e   : > { %v1801_v58 = vadd.f32 %v1800_v51, %v1770_v54  ;;  %v2171_v59 = vpack.c.bf16 %v1520_v57, %v1517_v52  ;;  %v1732_v61 = vadd.f32 %v1731_v53, %v1520_v57  ;;  %v1771_v11 = vmul.f32 %v1520_v57, %v1520_v57 }
 0x23f   : > { %2200 = vst [vmem:[%s2911_s22 + $0x68] sm:$0xff] %v2176_v56  }
 0x240   : > { %2199 = vst [vmem:[%s2911_s22 + $0x60] sm:$0xff] %v2171_v59   ;;  %v1733_v62 = vadd.f32 %v2254_v23, %v1732_v61  ;;  %v1802_v9 = vadd.f32 %v1801_v58, %v1771_v11 }
 0x242   : > { %v1803_v2 = vadd.f32 %v1802_v9, %v1772_v29  ;;  %v1734_v4 = vadd.f32 %v2255_v55, %v1733_v62 }
 0x244   : > { %v1804_v5 = vadd.f32 %v1803_v2, %v1773_v63 }
 0x257   : > { %v2258_v6 = vpop.f32.mrb[12].mxu1 }
 0x258   : > { %v1533_v28 = vpop.f32.mrb[13].mxu1  ;;  %v1776_v20 = vmul.f32 %v2258_v6, %v2258_v6 }
 0x259   : > { %v1735_v7 = vadd.f32 %v1734_v4, %v1533_v28  ;;  %v1774_v8 = vmul.f32 %v1533_v28, %v1533_v28  ;;  %v2259_v13 = vpop.f32.mrb[14].mxu1 }
 0x25a   : > { %v2186_v15 = vpack.c.bf16 %v2259_v13, %v2258_v6  ;;  %v1536_v12 = vpop.f32.mrb[15].mxu1  ;;  %v1777_v24 = vmul.f32 %v2259_v13, %v2259_v13 }
 0x25b   : > { %v1805_v16 = vadd.f32 %v1804_v5, %v1774_v8  ;;  %v2181_v17 = vpack.c.bf16 %v1536_v12, %v1533_v28  ;;  %v1736_v18 = vadd.f32 %v1735_v7, %v1536_v12  ;;  %v1775_v19 = vmul.f32 %v1536_v12, %v1536_v12 }
 0x25c   : > { %2202 = vst [vmem:[%s2911_s22 + $0x78] sm:$0xff] %v2186_v15  }
 0x25d   : > { %2201 = vst [vmem:[%s2911_s22 + $0x70] sm:$0xff] %v2181_v17   ;;  %v1737_v21 = vadd.f32 %v2258_v6, %v1736_v18  ;;  %v1806_v22 = vadd.f32 %v1805_v16, %v1775_v19 }
 0x25f   : > { %v1738_v25 = vadd.f32 %v2259_v13, %v1737_v21  ;;  %v1807_v26 = vadd.f32 %v1806_v22, %v1776_v20 }
 0x261   : > { %v1739_v3 = vrot.slane %v1738_v25, 4  ;;  %v1808_v31 = vadd.f32 %v1807_v26, %v1777_v24 }
 0x263   : > { %v1740_v32 = vadd.f32 %v1739_v3, %v1738_v25  ;;  %v1809_v1 = vrot.slane %v1808_v31, 4 }
 0x265   : > { %v1741_v33 = vrot.slane %v1740_v32, 2  ;;  %v1810_v34 = vadd.f32 %v1809_v1, %v1808_v31 }
 0x267   : > { %v1742_v39 = vadd.f32 %v1741_v33, %v1740_v32  ;;  %v1811_v35 = vrot.slane %v1810_v34, 2 }
 0x269   : > { %v1743_v36 = vrot.slane %v1742_v39, 1  ;;  %v1812_v37 = vadd.f32 %v1811_v35, %v1810_v34 }
 0x26b   : > { %v1744_v10 = vadd.f32 %v1743_v36, %v1742_v39  ;;  %v1813_v0 = vrot.slane %v1812_v37, 1 }
 0x26d   : > { %1745 = vst [vmem:[%s338_s26] sm:$0x1] %v1744_v10  ;;  %v1814_v38 = vadd.f32 %v1813_v0, %v1812_v37 }
 0x26f   : > { %1815 = vst [vmem:[%s338_s26 + $0x1] sm:$0x1] %v1814_v38 }
 0x270 PF: > { %s15_s17 = sadd.s32 1, %s2364_s17   ;;  %s2959_s15 = smov %s2360_s16 }
 0x271   : > { %p12_p5 = scmp.ge.s32.totalorder %s15_s17, 4   ;;  %s2960_s16 = smov %s2962_s18 }
 0x273   :  { %14 = sbr.rel (!%p12_p5) target bundleno = 2 (0x2), region = 77 }

// kernel: unet_conv_block.4
= control target key start
LH: loop header
LB: loop body
LE: loop exit
PB: predicated region body
PF: predicated region fallthrough
CT: control target
= control target key end

     0   :  { %s3924_s18 = smov 0   ;;  %s3926_s19 = smov 0   ;;  %s5141_s0 = inlined_call_operand.vmem [shape: bf16[2,18,18,128], index: 0, kind: input, shape index: {}, may-alias: {0,1}]   ;;  %s5142_s1 = inlined_call_operand.vmem [shape: bf16[2,18,18,128], index: 1, kind: input, shape index: {}, may-alias: {0,1}]   ;;  %s5143_s2 = inlined_call_operand.vmem [shape: bf16[1152,128], index: 2, kind: input, shape index: {}]   ;;  %s5144_s3 = inlined_call_operand.vmem [shape: f32[2,128], index: 3, kind: input, shape index: {}]   ;;  %s5145_s4 = inlined_call_operand.vmem [shape: bf16[2,16,16,128], index: 4, kind: output, shape index: {0}]   ;;  %s5146_s5 = inlined_call_operand.vmem [shape: f32[2,1,2,128], index: 5, kind: output, shape index: {1}]  }
   0x1   :  { %s3928_s20 = smov 0  }
   0x2 LB: > { %s28_s21 = sadd.s32 1, %s3888_s19  ;;  %p2946_p0 = scmp.ge.s32.totalorder %s3892_s20, 1  ;;  %s3892_s20 = sphi %s3928_s20, %s16_s20   ;;  %s3888_s19 = sphi %s3926_s19, %s5148_s19   ;;  %s3884_s18 = sphi %s3924_s18, %s5147_s18  }
   0x3   : > { %p30_p1 = scmp.ge.s32.totalorder %s28_s21, 2  ;;  %p250_p2 = scmp.lt.s32.totalorder %s3892_s20, 3 }
   0x5   : > { %s5150_s21 = smov (%p30_p1, %s28_s21), 0  ;;  %p251_p3 = pnand %p2946_p0, %p250_p2 }
   0x6   : > { %v3796_v0 = vld [vmem:[%s5143_s2 + $0x40] sm:$0xff] (!%p251_p3)   ;;  %p318_p4 = scmp.lt.s32.totalorder (!%p251_p3), %s3884_s18, 1  ;;  %v3798_v2 = vld [vmem:[%s5143_s2 + $0x48] sm:$0xff] (!%p251_p3)   ;;  %v3800_v4 = vld [vmem:[%s5143_s2 + $0x50] sm:$0xff] (!%p251_p3)   ;;  %vm791_vm3 = vsmask.f32 (!%p251_p3), 7424 }
   0x7   : > { %254 = sbr.rel (%p251_p3) target bundleno = 576 (0x240), region = 36  ;;  %v3797_v1 = vld [vmem:[%s5143_s2] sm:$0xff] (!%p251_p3)   ;;  %3233 = vmatprep.subr.bf16.mxu0 (!%p251_p3), %v3796_v0  ;;  %3753 = vmatprep.subr.bf16.mxu1 (!%p251_p3), %v3796_v0  ;;  %v3799_v3 = vld [vmem:[%s5143_s2 + $0x8] sm:$0xff] (!%p251_p3)   ;;  %v3801_v5 = vld [vmem:[%s5143_s2 + $0x10] sm:$0xff] (!%p251_p3)  }
   0x8   : > { %3234 = vmatpush3.bf16.msra.mxu0 (!%p251_p3), %v3797_v1  ;;  %3761 = vmatpush3.bf16.msra.mxu1 (!%p251_p3), %v3797_v1  ;;  %v3802_v6 = vld [vmem:[%s5143_s2 + $0x58] sm:$0xff] (!%p251_p3)   ;;  %v3804_v8 = vld [vmem:[%s5143_s2 + $0x60] sm:$0xff] (!%p251_p3)   ;;  %v3806_v10 = vld [vmem:[%s5143_s2 + $0x68] sm:$0xff] (!%p251_p3)  }
   0x9   : > { %3235 = vmatprep.subr.bf16.mxu0 (!%p251_p3), %v3798_v2  ;;  %3754 = vmatprep.subr.bf16.mxu1 (!%p251_p3), %v3798_v2  ;;  %v3803_v7 = vld [vmem:[%s5143_s2 + $0x18] sm:$0xff] (!%p251_p3)   ;;  %v3805_v9 = vld [vmem:[%s5143_s2 + $0x20] sm:$0xff] (!%p251_p3)   ;;  %v3807_v22 = vld [vmem:[%s5143_s2 + $0x28] sm:$0xff] (!%p251_p3)  }
   0xa   : > { %v3990_v13 = vld [vmem:[%s5144_s3] ss:$0 sm:$0xff] (!%p251_p3)  ;;  %v3995_v16 = vld [vmem:[%s5144_s3 + $0x1] ss:$0 sm:$0xff] (!%p251_p3)  ;;  %v3808_v27 = vld [vmem:[%s5143_s2 + $0x70] sm:$0xff] (!%p251_p3)  }
   0xb   : > { %v3809_v34 = vld [vmem:[%s5143_s2 + $0x30] sm:$0xff] (!%p251_p3)   ;;  %v3810_v37 = vld [vmem:[%s5143_s2 + $0x78] sm:$0xff] (!%p251_p3)   ;;  %v3812_v50 = vld [vmem:[%s5143_s2 + $0xc0] sm:$0xff] (!%p251_p3)  }
   0xc   : > { %3236 = vmatpush3.bf16.msra.mxu0 (!%p251_p3), %v3799_v3  ;;  %3762 = vmatpush3.bf16.msra.mxu1 (!%p251_p3), %v3799_v3  ;;  %v3811_v43 = vld [vmem:[%s5143_s2 + $0x38] sm:$0xff] (!%p251_p3)   ;;  %v3813_v51 = vld [vmem:[%s5143_s2 + $0x140] sm:$0xff] (!%p251_p3)  }
   0xd   : > { %3237 = vmatprep.subr.bf16.mxu0 (!%p251_p3), %v3800_v4  ;;  %3755 = vmatprep.subr.bf16.mxu1 (!%p251_p3), %v3800_v4 }
   0xe   : > { %s5152_s18 = smov (!%p318_p4, %s3884_s18), 1 }
   0xf   : > { %s3769_s11 = smul.u32 216, %s5152_s18  ;;  %s3062_s26 = sshll.u32 %s5152_s18, 7 }
  0x10   : > { %3238 = vmatpush3.bf16.msra.mxu0 %v3801_v5  ;;  %3763 = vmatpush3.bf16.msra.mxu1 %v3801_v5  ;;  %s2951_s29 = sshll.u32 %s5152_s18, 1 }
  0x11   : > { %3239 = vmatprep.subr.bf16.mxu0 %v3802_v6  ;;  %3756 = vmatprep.subr.bf16.mxu1 %v3802_v6  ;;  %s3977_s22 = scalar_lea.vmem %s5141_s0, %s3769_s11  ;;  %s3061_s14 = sadd.s32 192, %s3769_s11 }
  0x12   : > { %v3096_v11 = vld [vmem:[%s3977_s22] sm:$0xff]   ;;  %v369_v12 = vld [vmem:[%s3977_s22 + $0x8] sm:$0x1]  ;;  %v3216_v18 = vld [vmem:[%s3977_s22 + $0x90] sm:$0xff]   ;;  %s4616_s24 = scalar_lea.vmem %s5142_s1, %s3061_s14  ;;  %s365_s7 = scalar_lea.vmem %s5146_s5, %s2951_s29 }
  0x13   : > { %v3097_v14 = vunpack.c.l.bf16 %v3096_v11  ;;  %v3098_v15 = vunpack.c.h.bf16 %v3096_v11  ;;  %v425_v17 = vunpack.c.l.bf16 %v369_v12  ;;  %v3121_v19 = vunpack.c.l.bf16 %v3216_v18  ;;  %v405_v21 = vld [vmem:[%s3977_s22 + $0x98] sm:$0x1]  ;;  %v370_v42 = vld [vmem:[%s3977_s22 + $0xc] sm:$0xff]   ;;  %v372_v55 = vld [vmem:[%s3977_s22 + $0x14] sm:$0x1] }
  0x14   : > { %3240 = vmatpush3.bf16.msra.mxu0 %v3803_v7  ;;  %3764 = vmatpush3.bf16.msra.mxu1 %v3803_v7  ;;  %v3122_v20 = vunpack.c.h.bf16 %v3216_v18  ;;  %v461_v26 = vunpack.c.l.bf16 %v405_v21  ;;  %v426_v56 = vunpack.c.l.bf16 %v370_v42  ;;  %v406_v57 = vld [vmem:[%s3977_s22 + $0x9c] sm:$0xff]   ;;  %v427_v60 = vunpack.c.h.bf16 %v370_v42 }
  0x15   : > { %3241 = vmatprep.subr.bf16.mxu0 %v3804_v8  ;;  %3757 = vmatprep.subr.bf16.mxu1 %v3804_v8  ;;  %v481_v23 = vmul.f32 %v3097_v14, %v3990_v13  ;;  %v482_v24 = vmul.f32 %v3098_v15, %v3990_v13  ;;  %v483_v25 = vmul.f32 %v3990_v13, %v425_v17  ;;  %v428_v61 = vunpack.c.l.bf16 %v372_v55  ;;  %v3815_v15 = vld [vmem:[%s5143_s2 + $0x100] sm:$0xff]  }
  0x16   : > { %v517_v28 = vmul.f32 %v3121_v19, %v3990_v13  ;;  %v518_v29 = vmul.f32 %v3122_v20, %v3990_v13  ;;  %v519_v33 = vmul.f32 %v3990_v13, %v461_v26  ;;  %v484_v4 = vmul.f32 %v3990_v13, %v426_v56 }
  0x17   : > { %v539_v30 = vadd.f32 %v3995_v16, %v481_v23  ;;  %v540_v31 = vadd.f32 %v3995_v16, %v482_v24  ;;  %v541_v32 = vadd.f32 %v3995_v16, %v483_v25  ;;  %v485_v5 = vmul.f32 %v3990_v13, %v427_v60  ;;  %v3821_v25 = vld [vmem:[%s5143_s2 + $0x148] sm:$0xff]  }
  0x18   : > { %3242 = vmatpush3.bf16.msra.mxu0 %v3805_v9  ;;  %3765 = vmatpush3.bf16.msra.mxu1 %v3805_v9  ;;  %v575_v35 = vadd.f32 %v3995_v16, %v517_v28  ;;  %v576_v36 = vadd.f32 %v3995_v16, %v518_v29  ;;  %v577_v41 = vadd.f32 %v3995_v16, %v519_v33  ;;  %v408_v9 = vld [vmem:[%s3977_s22 + $0xa4] sm:$0x1]  ;;  %v463_v21 = vunpack.c.h.bf16 %v406_v57 }
  0x19   : > { %3243 = vmatprep.subr.bf16.mxu0 %v3806_v10  ;;  %3758 = vmatprep.subr.bf16.mxu1 %v3806_v10  ;;  %vm593_vm0 = vcmp.gt.f32.partialorder %v539_v30, 0.0  ;;  %vm594_vm1 = vcmp.gt.f32.partialorder %v540_v31, 0.0  ;;  %vm595_vm2 = vcmp.gt.f32.partialorder %v541_v32, 0.0  ;;  %v647_v38 = vmul.f32 0.2, %v539_v30  ;;  %v3814_v29 = vld [vmem:[%s5143_s2 + $0x80] sm:$0xff]  }
  0x1a   : > { %v648_v39 = vmul.f32 0.2, %v540_v31  ;;  %v649_v40 = vmul.f32 0.2, %v541_v32  ;;  %vm629_vm4 = vcmp.gt.f32.partialorder %v575_v35, 0.0  ;;  %vm630_vm5 = vcmp.gt.f32.partialorder %v576_v36, 0.0 }
  0x1b   : > { %v701_v44 = vsel %vm593_vm0, %v539_v30, %v647_v38  ;;  %v683_v45 = vmul.f32 0.2, %v575_v35  ;;  %v684_v46 = vmul.f32 0.2, %v576_v36  ;;  %vm631_vm6 = vcmp.gt.f32.partialorder %v577_v41, 0.0  ;;  %v3816_v30 = vld [vmem:[%s5143_s2 + $0xc8] sm:$0xff]  }
  0x1c   : > { %3244 = vmatpush3.bf16.msra.mxu0 %v3807_v22  ;;  %3766 = vmatpush3.bf16.msra.mxu1 %v3807_v22  ;;  %v702_v47 = vsel %vm594_vm1, %v540_v31, %v648_v39  ;;  %v703_v48 = vsel %vm595_vm2, %v541_v32, %v649_v40  ;;  %v685_v49 = vmul.f32 0.2, %v577_v41  ;;  %v486_v8 = vmul.f32 %v3990_v13, %v428_v61  ;;  %v375_v39 = vld [vmem:[%s3977_s22 + $0x20] sm:$0x1] }
  0x1d   : > { %3245 = vmatprep.subr.bf16.mxu0 %v3808_v27  ;;  %3759 = vmatprep.subr.bf16.mxu1 %v3808_v27  ;;  %v4035_v52 = vpack.c.bf16 %v702_v47, %v701_v44  ;;  %v4037_v53 = vpack.c.bf16 %v703_v48, %v703_v48  ;;  %v737_v54 = vsel %vm629_vm4, %v575_v35, %v683_v45  ;;  %v462_v10 = vunpack.c.l.bf16 %v406_v57  ;;  %v3823_v44 = vld [vmem:[%s5143_s2 + $0x108] sm:$0xff]  }
  0x1e   : > { %v738_v58 = vsel %vm630_vm5, %v576_v36, %v684_v46  ;;  %v739_v59 = vsel %vm631_vm6, %v577_v41, %v685_v49  ;;  %v542_v17 = vadd.f32 %v3995_v16, %v484_v4  ;;  %v543_v19 = vadd.f32 %v3995_v16, %v485_v5  ;;  %v3817_v49 = vld [vmem:[%s5143_s2 + $0x88] sm:$0xff]  }
  0x1f   : > { %v793_v62 = vshrl.u32 %v4035_v52, 16  ;;  %v795_v63 = vshll.u32 %v4035_v52, 16  ;;  %v800_v0 = vshll.u32 %v4037_v53, 16  ;;  %v1034_v1 = vrot.slane %v4037_v53, 1 }
  0x20   : > { %3246 = vmatpush3.bf16.msra.mxu0 %v3809_v34  ;;  %3767 = vmatpush3.bf16.msra.mxu1 %v3809_v34  ;;  %v4047_v2 = vpack.c.bf16 %v738_v58, %v737_v54  ;;  %v4049_v3 = vpack.c.bf16 %v739_v59, %v739_v59  ;;  %v544_v20 = vadd.f32 %v3995_v16, %v486_v8  ;;  %vm596_vm7 = vcmp.gt.f32.partialorder %v542_v17, 0.0  ;;  %v3211_v34 = vld [vmem:[%s3977_s22 + $0x18] sm:$0xff]   ;;  %v3818_v58 = vld [vmem:[%s5143_s2 + $0xd0] sm:$0xff]  }
  0x21   : > { %3247 = vmatprep.subr.bf16.mxu0 %v3810_v37  ;;  %3760 = vmatprep.subr.bf16.mxu1 %v3810_v37  ;;  %v797_v6 = vrot.slane %v795_v63, 1  ;;  %v802_v7 = vrot.slane %v800_v0, 1  ;;  %v650_v24 = vmul.f32 0.2, %v542_v17  ;;  %vm597_vm8 = vcmp.gt.f32.partialorder %v543_v19, 0.0  ;;  %v3819_v0 = vld [vmem:[%s5143_s2 + $0x90] sm:$0xff]  }
  0x22   : > { %v937_v11 = vshrl.u32 %v4047_v2, 16  ;;  %v939_v12 = vshll.u32 %v4047_v2, 16  ;;  %v944_v14 = vshll.u32 %v4049_v3, 16  ;;  %vm598_vm9 = vcmp.gt.f32.partialorder %v544_v20, 0.0 }
  0x23   : > { %v798_v18 = vor.u32 %v797_v6, %v793_v62  ;;  %v651_v27 = vmul.f32 0.2, %v543_v19  ;;  %v652_v31 = vmul.f32 0.2, %v544_v20  ;;  %v704_v32 = vsel %vm596_vm7, %v542_v17, %v650_v24  ;;  %v3217_v6 = vld [vmem:[%s3977_s22 + $0xa8] sm:$0xff]  }
  0x24   : > { %3248 = vmatpush3.bf16.msra.mxu0 %v3811_v43  ;;  %3768 = vmatpush3.bf16.msra.mxu1 %v3811_v43  ;;  %v941_v22 = vrot.slane %v939_v12, 1  ;;  %v946_v23 = vrot.slane %v944_v14, 1  ;;  %v464_v33 = vunpack.c.l.bf16 %v408_v9  ;;  %v520_v36 = vmul.f32 %v3990_v13, %v462_v10  ;;  %v3820_v10 = vld [vmem:[%s5143_s2 + $0xd8] sm:$0xff]  }
  0x25   : > { %3345 = vmatprep.subr.bf16.mxu1 %v3812_v50  ;;  %3457 = vmatprep.subr.bf16.mxu0 %v3813_v51  ;;  %v803_v26 = vsel %vm791_vm3, %v798_v18, %v802_v7  ;;  %v705_v35 = vsel %vm597_vm8, %v543_v19, %v651_v27  ;;  %v521_v37 = vmul.f32 %v3990_v13, %v463_v21  ;;  %v3101_v38 = vunpack.c.l.bf16 %v3211_v34  ;;  %v411_v18 = vld [vmem:[%s3977_s22 + $0xb0] sm:$0x1]  ;;  %v3822_v27 = vld [vmem:[%s5143_s2 + $0x98] sm:$0xff]  }
  0x26   : > { %1743 = vmatprep.mubr.bf16.mxu0 %v803_v26  ;;  %v942_v28 = vor.u32 %v941_v22, %v937_v11  ;;  %v706_v41 = vsel %vm598_vm9, %v544_v20, %v652_v31  ;;  %v4083_v42 = vpack.c.bf16 %v705_v35, %v704_v32  ;;  %v522_v43 = vmul.f32 %v3990_v13, %v464_v33  ;;  %v3824_v32 = vld [vmem:[%s5143_s2 + $0xe0] sm:$0xff]  }
  0x27   : > { %1744 = vmatmul.mubr.bf16.vlgmr.msra.gmra.mrb[0].mxu0 %v4035_v52  ;;  %v4090_v45 = vpack.c.bf16 %v706_v41, %v706_v41  ;;  %v578_v46 = vadd.f32 %v3995_v16, %v520_v36  ;;  %v579_v47 = vadd.f32 %v3995_v16, %v521_v37  ;;  %v3102_v48 = vunpack.c.h.bf16 %v3211_v34 }
  0x28   : > { %v4080_v40 = vsel %vm791_vm3, %v942_v28, %v946_v23  ;;  %3458 = vmatpush3.bf16.msra.mxu0 %v3815_v15  ;;  %v805_v50 = vshrl.u32 %v4083_v42, 16  ;;  %v807_v51 = vshll.u32 %v4083_v42, 16  ;;  %v580_v54 = vadd.f32 %v3995_v16, %v522_v43  ;;  %v3829_v23 = vld [vmem:[%s5143_s2 + $0x150] sm:$0xff]   ;;  %v4138_v28 = vld [vmem:[%s3977_s22 + $0x24] sm:$0xff]  }
  0x29   : > { %1839 = vmatprep.mubr.bf16.mxu1 %v4080_v40  ;;  %3459 = vmatprep.subr.bf16.mxu0 %v3821_v25  ;;  %v431_v55 = vunpack.c.l.bf16 %v375_v39  ;;  %v812_v56 = vshll.u32 %v4090_v45, 16  ;;  %vm632_vm10 = vcmp.gt.f32.partialorder %v578_v46, 0.0  ;;  %vm633_vm11 = vcmp.gt.f32.partialorder %v579_v47, 0.0 }
  0x2a   : > { %1840 = vmatmul.mubr.bf16.vlgmr.msra.gmra.mrb[0].mxu1 %v4047_v2  ;;  %v686_v57 = vmul.f32 0.2, %v578_v46  ;;  %v809_v59 = vrot.slane %v807_v51, 1  ;;  %vm634_vm12 = vcmp.gt.f32.partialorder %v580_v54, 0.0  ;;  %v687_v60 = vmul.f32 0.2, %v579_v47 }
  0x2b   : > { %3346 = vmatpush3.bf16.msra.mxu1 %v3814_v29  ;;  %v688_v61 = vmul.f32 0.2, %v580_v54  ;;  %v814_v62 = vrot.slane %v812_v56, 1  ;;  %v487_v4 = vmul.f32 %v3101_v38, %v3990_v13  ;;  %v488_v5 = vmul.f32 %v3102_v48, %v3990_v13  ;;  %v3831_v29 = vld [vmem:[%s5143_s2 + $0x110] sm:$0xff]   ;;  %v3825_v51 = vld [vmem:[%s5143_s2 + $0xa0] sm:$0xff]  }
  0x2c   : > { %3347 = vmatprep.subr.bf16.mxu1 %v3816_v30  ;;  %3460 = vmatpush3.bf16.msra.mxu0 %v3823_v44  ;;  %v740_v63 = vsel %vm632_vm10, %v578_v46, %v686_v57  ;;  %v810_v7 = vor.u32 %v809_v59, %v805_v50  ;;  %v741_v8 = vsel %vm633_vm11, %v579_v47, %v687_v60  ;;  %v3125_v21 = vunpack.c.l.bf16 %v3217_v6 }
  0x2d   : > { %v742_v9 = vsel %vm634_vm12, %v580_v54, %v688_v61  ;;  %v489_v11 = vmul.f32 %v3990_v13, %v431_v55  ;;  %v4116_v12 = vpack.c.bf16 %v741_v8, %v740_v63  ;;  %v545_v15 = vadd.f32 %v3995_v16, %v487_v4  ;;  %3461 = vmatprep.subr.bf16.mxu0 %v3829_v23  ;;  %v3826_v54 = vld [vmem:[%s5143_s2 + $0xe8] sm:$0xff]   ;;  %v412_v63 = vld [vmem:[%s3977_s22 + $0xb4] sm:$0xff]  }
  0x2e   : > { %v4118_v14 = vpack.c.bf16 %v742_v9, %v742_v9  ;;  %v546_v17 = vadd.f32 %v3995_v16, %v488_v5  ;;  %v4124_v19 = vsel %vm791_vm3, %v810_v7, %v814_v62  ;;  %v3126_v22 = vunpack.c.h.bf16 %v3217_v6  ;;  %v378_v55 = vld [vmem:[%s3977_s22 + $0x2c] sm:$0x1] }
  0x2f   : > { %3348 = vmatpush3.bf16.msra.mxu1 %v3817_v49  ;;  %v547_v20 = vadd.f32 %v3995_v16, %v489_v11  ;;  %1751 = vmatprep.mubr.bf16.mxu0 %v4124_v19  ;;  %v949_v24 = vshrl.u32 %v4116_v12, 16  ;;  %v951_v25 = vshll.u32 %v4116_v12, 16  ;;  %vm599_vm13 = vcmp.gt.f32.partialorder %v545_v15, 0.0  ;;  %v3827_v6 = vld [vmem:[%s5143_s2 + $0xa8] sm:$0xff]   ;;  %v414_v11 = vld [vmem:[%s3977_s22 + $0xbc] sm:$0x1] }
  0x30   : > { %3349 = vmatprep.subr.bf16.mxu1 %v3818_v58  ;;  %v956_v26 = vshll.u32 %v4118_v14, 16  ;;  %1752 = vmatmul.mubr.bf16.gmra.mrb[4].mxu0 %v4083_v42  ;;  %vm600_vm14 = vcmp.gt.f32.partialorder %v546_v17, 0.0  ;;  %v653_v30 = vmul.f32 0.2, %v545_v15  ;;  %v654_v31 = vmul.f32 0.2, %v546_v17 }
  0x31   : > { %vm601_vm15 = vcmp.gt.f32.partialorder %v547_v20, 0.0  ;;  %v953_v33 = vrot.slane %v951_v25, 1  ;;  %v655_v35 = vmul.f32 0.2, %v547_v20  ;;  %v467_v36 = vunpack.c.l.bf16 %v411_v18  ;;  %3462 = vmatpush3.bf16.msra.mxu0 %v3831_v29 }
  0x32   : > { %v958_v34 = vrot.slane %v956_v26, 1  ;;  %v707_v37 = vsel %vm599_vm13, %v545_v15, %v653_v30  ;;  %v708_v38 = vsel %vm600_vm14, %v546_v17, %v654_v31  ;;  %v523_v39 = vmul.f32 %v3125_v21, %v3990_v13  ;;  %v3828_v15 = vld [vmem:[%s5143_s2 + $0xf0] sm:$0xff]  }
  0x33   : > { %3350 = vmatpush3.bf16.msra.mxu1 %v3819_v0  ;;  %v524_v41 = vmul.f32 %v3126_v22, %v3990_v13  ;;  %v954_v43 = vor.u32 %v953_v33, %v949_v24  ;;  %v709_v44 = vsel %vm601_vm15, %v547_v20, %v655_v35  ;;  %v4151_v46 = vpack.c.bf16 %v708_v38, %v707_v37  ;;  %v3836_v22 = vld [vmem:[%s5143_s2 + $0x158] sm:$0xff]   ;;  %v3838_v38 = vld [vmem:[%s5143_s2 + $0x160] sm:$0xff]  }
  0x34   : > { %3351 = vmatprep.subr.bf16.mxu1 %v3820_v10  ;;  %v525_v47 = vmul.f32 %v3990_v13, %v467_v36  ;;  %v4154_v48 = vpack.c.bf16 %v709_v44, %v709_v44  ;;  %v581_v49 = vadd.f32 %v3995_v16, %v523_v39  ;;  %v432_v56 = vunpack.c.l.bf16 %v4138_v28  ;;  %3463 = vmatprep.subr.bf16.mxu0 %v3836_v22  ;;  %v3830_v36 = vld [vmem:[%s5143_s2 + $0xb0] sm:$0xff]   ;;  %v3832_v37 = vld [vmem:[%s5143_s2 + $0xf8] sm:$0xff]  }
  0x35   : > { %v582_v50 = vadd.f32 %v3995_v16, %v524_v41  ;;  %v4167_v57 = vsel %vm791_vm3, %v954_v43, %v958_v34  ;;  %v817_v58 = vshrl.u32 %v4151_v46, 16  ;;  %v819_v59 = vshll.u32 %v4151_v46, 16  ;;  %v3212_v44 = vld [vmem:[%s3977_s22 + $0x30] sm:$0xff]  }
  0x36   : > { %v583_v60 = vadd.f32 %v3995_v16, %v525_v47  ;;  %1847 = vmatprep.mubr.bf16.mxu1 %v4167_v57  ;;  %v824_v61 = vshll.u32 %v4154_v48, 16  ;;  %vm635_vm0 = vcmp.gt.f32.partialorder %v581_v49, 0.0  ;;  %v689_v62 = vmul.f32 0.2, %v581_v49 }
  0x37   : > { %3352 = vmatpush3.bf16.msra.mxu1 %v3822_v27  ;;  %vm636_vm1 = vcmp.gt.f32.partialorder %v582_v50, 0.0  ;;  %v821_v0 = vrot.slane %v819_v59, 1  ;;  %v690_v4 = vmul.f32 0.2, %v582_v50  ;;  %v433_v9 = vunpack.c.h.bf16 %v4138_v28  ;;  %v3837_v27 = vld [vmem:[%s5143_s2 + $0x118] sm:$0xff]  }
  0x38   : > { %3353 = vmatprep.subr.bf16.mxu1 %v3824_v32  ;;  %1848 = vmatmul.mubr.bf16.gmra.mrb[4].mxu1 %v4116_v12  ;;  %vm637_vm2 = vcmp.gt.f32.partialorder %v583_v60, 0.0  ;;  %v691_v5 = vmul.f32 0.2, %v583_v60  ;;  %v826_v7 = vrot.slane %v824_v61, 1  ;;  %v743_v8 = vsel %vm635_vm0, %v581_v49, %v689_v62 }
  0x39   : > { %v434_v10 = vunpack.c.l.bf16 %v378_v55  ;;  %v822_v17 = vor.u32 %v821_v0, %v817_v58  ;;  %v744_v18 = vsel %vm636_vm1, %v582_v50, %v690_v4  ;;  %v490_v21 = vmul.f32 %v3990_v13, %v432_v56  ;;  %3464 = vmatpush3.bf16.msra.mxu0 %v3837_v27  ;;  %v3833_v58 = vld [vmem:[%s5143_s2 + $0xb8] sm:$0xff]  }
  0x3a   : > { %v745_v20 = vsel %vm637_vm2, %v583_v60, %v691_v5  ;;  %v4189_v23 = vpack.c.bf16 %v744_v18, %v743_v8  ;;  %v491_v25 = vmul.f32 %v3990_v13, %v433_v9  ;;  %v468_v30 = vunpack.c.l.bf16 %v412_v63  ;;  %3465 = vmatprep.subr.bf16.mxu0 %v3838_v38 }
  0x3b   : > { %3354 = vmatpush3.bf16.msra.mxu1 %v3825_v51  ;;  %v4191_v24 = vpack.c.bf16 %v745_v20, %v745_v20  ;;  %v492_v26 = vmul.f32 %v3990_v13, %v434_v10  ;;  %v4199_v28 = vsel %vm791_vm3, %v822_v17, %v826_v7  ;;  %v548_v29 = vadd.f32 %v3995_v16, %v490_v21  ;;  %v3840_v51 = vld [vmem:[%s5143_s2 + $0x120] sm:$0xff]   ;;  %v381_v10 = vld [vmem:[%s3977_s22 + $0x38] sm:$0x1]  ;;  %v3842_v20 = vld [vmem:[%s5143_s2 + $0x168] sm:$0xff]  }
  0x3c   : > { %3355 = vmatprep.subr.bf16.mxu1 %v3826_v54  ;;  %v469_v31 = vunpack.c.h.bf16 %v412_v63  ;;  %1759 = vmatprep.mubr.bf16.mxu0 %v4199_v28  ;;  %v961_v32 = vshrl.u32 %v4189_v23, 16  ;;  %v963_v33 = vshll.u32 %v4189_v23, 16  ;;  %v549_v35 = vadd.f32 %v3995_v16, %v491_v25  ;;  %v3843_v25 = vld [vmem:[%s5143_s2 + $0x128] sm:$0xff]  }
  0x3d   : > { %v968_v34 = vshll.u32 %v4191_v24, 16  ;;  %1760 = vmatmul.mubr.bf16.gmra.mrb[8].mxu0 %v4151_v46  ;;  %v550_v39 = vadd.f32 %v3995_v16, %v492_v26  ;;  %vm602_vm4 = vcmp.gt.f32.partialorder %v548_v29, 0.0  ;;  %v656_v41 = vmul.f32 0.2, %v548_v29 }
  0x3e   : > { %v470_v43 = vunpack.c.l.bf16 %v414_v11  ;;  %v965_v47 = vrot.slane %v963_v33, 1  ;;  %vm603_vm5 = vcmp.gt.f32.partialorder %v549_v35, 0.0  ;;  %v657_v50 = vmul.f32 0.2, %v549_v35  ;;  %3466 = vmatpush3.bf16.msra.mxu0 %v3840_v51  ;;  %v3834_v11 = vld [vmem:[%s5143_s2 + $0x1c0] sm:$0xff]  }
  0x3f   : > { %3356 = vmatpush3.bf16.msra.mxu1 %v3827_v6  ;;  %v970_v49 = vrot.slane %v968_v34, 1  ;;  %vm604_vm6 = vcmp.gt.f32.partialorder %v550_v39, 0.0  ;;  %v658_v54 = vmul.f32 0.2, %v550_v39  ;;  %v710_v55 = vsel %vm602_vm4, %v548_v29, %v656_v41  ;;  %3467 = vmatprep.subr.bf16.mxu0 %v3842_v20  ;;  %v3213_v20 = vld [vmem:[%s3977_s22 + $0x48] sm:$0xff]  }
  0x40   : > { %3357 = vmatprep.subr.bf16.mxu1 %v3828_v15  ;;  %v526_v56 = vmul.f32 %v3990_v13, %v468_v30  ;;  %v966_v59 = vor.u32 %v965_v47, %v961_v32  ;;  %v711_v60 = vsel %vm603_vm5, %v549_v35, %v657_v50  ;;  %v527_v61 = vmul.f32 %v3990_v13, %v469_v31 }
  0x41   : > { %v528_v62 = vmul.f32 %v3990_v13, %v470_v43  ;;  %v712_v63 = vsel %vm604_vm6, %v550_v39, %v658_v54  ;;  %v4228_v0 = vpack.c.bf16 %v711_v60, %v710_v55  ;;  %v3105_v5 = vunpack.c.l.bf16 %v3212_v44  ;;  %v382_v54 = vld [vmem:[%s3977_s22 + $0x3c] sm:$0xff]   ;;  %v384_v55 = vld [vmem:[%s3977_s22 + $0x44] sm:$0x1] }
  0x42   : > { %v584_v4 = vadd.f32 %v3995_v16, %v526_v56  ;;  %v4232_v6 = vsel %vm791_vm3, %v966_v59, %v970_v49  ;;  %v4234_v7 = vpack.c.bf16 %v712_v63, %v712_v63  ;;  %v585_v8 = vadd.f32 %v3995_v16, %v527_v61  ;;  %3468 = vmatpush3.bf16.msra.mxu0 %v3843_v25  ;;  %v3846_v56 = vld [vmem:[%s5143_s2 + $0x170] sm:$0xff]  }
  0x43   : > { %3358 = vmatpush3.bf16.msra.mxu1 %v3830_v36  ;;  %v586_v9 = vadd.f32 %v3995_v16, %v528_v62  ;;  %1855 = vmatprep.mubr.bf16.mxu1 %v4232_v6  ;;  %v829_v15 = vshrl.u32 %v4228_v0, 16  ;;  %v831_v17 = vshll.u32 %v4228_v0, 16  ;;  %v3106_v30 = vunpack.c.h.bf16 %v3212_v44 }
  0x44   : > { %3359 = vmatprep.subr.bf16.mxu1 %v3832_v37  ;;  %vm638_vm7 = vcmp.gt.f32.partialorder %v584_v4, 0.0  ;;  %v692_v18 = vmul.f32 0.2, %v584_v4  ;;  %1856 = vmatmul.mubr.bf16.gmra.mrb[8].mxu1 %v4189_v23  ;;  %v836_v21 = vshll.u32 %v4234_v7, 16  ;;  %vm639_vm8 = vcmp.gt.f32.partialorder %v585_v8, 0.0 }
  0x45   : > { %vm640_vm9 = vcmp.gt.f32.partialorder %v586_v9, 0.0  ;;  %v693_v22 = vmul.f32 0.2, %v585_v8  ;;  %v833_v26 = vrot.slane %v831_v17, 1  ;;  %v694_v27 = vmul.f32 0.2, %v586_v9  ;;  %3469 = vmatprep.subr.bf16.mxu0 %v3846_v56 }
  0x46   : > { %v746_v29 = vsel %vm638_vm7, %v584_v4, %v692_v18  ;;  %vm1032_vm10 = vcmask 1046528   ;;  %v838_v31 = vrot.slane %v836_v21, 1  ;;  %v437_v33 = vunpack.c.l.bf16 %v381_v10 }
  0x47   : > { %3360 = vmatpush3.bf16.msra.mxu1 %v3833_v58  ;;  %v747_v32 = vsel %vm639_vm8, %v585_v8, %v693_v22  ;;  %v493_v34 = vmul.f32 %v3105_v5, %v3990_v13  ;;  %v834_v35 = vor.u32 %v833_v26, %v829_v15  ;;  %v748_v36 = vsel %vm640_vm9, %v586_v9, %v694_v27 }
  0x48   : > { %3569 = vmatprep.subr.bf16.mxu1 %v3834_v11  ;;  %v4255_v37 = vpack.c.bf16 %v747_v32, %v746_v29  ;;  %v494_v38 = vmul.f32 %v3106_v30, %v3990_v13  ;;  %v4258_v39 = vpack.c.bf16 %v748_v36, %v748_v36  ;;  %v495_v41 = vmul.f32 %v3990_v13, %v437_v33  ;;  %v3847_v11 = vld [vmem:[%s5143_s2 + $0x130] sm:$0xff]  }
  0x49   : > { %v551_v43 = vadd.f32 %v3995_v16, %v493_v34  ;;  %v1033_v44 = vrot.slane %v4035_v52, 1  ;;  %v4264_v47 = vsel %vm791_vm3, %v834_v35, %v838_v31  ;;  %v438_v9 = vunpack.c.l.bf16 %v382_v54  ;;  %3470 = vmatpush3.bf16.msra.mxu0 %v3847_v11  ;;  %v387_v32 = vld [vmem:[%s3977_s22 + $0x50] sm:$0x1] }
  0x4a   : > { %v973_v49 = vshrl.u32 %v4255_v37, 16  ;;  %v975_v50 = vshll.u32 %v4255_v37, 16  ;;  %v552_v51 = vadd.f32 %v3995_v16, %v494_v38  ;;  %1767 = vmatprep.mubr.bf16.mxu0 %v4264_v47  ;;  %v980_v58 = vshll.u32 %v4258_v39, 16  ;;  %v3850_v38 = vld [vmem:[%s5143_s2 + $0x178] sm:$0xff]  }
  0x4b   : > { %v553_v52 = vadd.f32 %v3995_v16, %v495_v41  ;;  %vm605_vm11 = vcmp.gt.f32.partialorder %v551_v43, 0.0  ;;  %v659_v59 = vmul.f32 0.2, %v551_v43  ;;  %1768 = vmatmul.mubr.bf16.gmra.mrb[12].mxu0 %v4228_v0  ;;  %v439_v10 = vunpack.c.h.bf16 %v382_v54  ;;  %3471 = vmatprep.subr.bf16.mxu0 %v3850_v38  ;;  %v3835_v54 = vld [vmem:[%s5143_s2 + $0x180] sm:$0xff]  }
  0x4c   : > { %v977_v60 = vrot.slane %v975_v50, 1  ;;  %vm606_vm12 = vcmp.gt.f32.partialorder %v552_v51, 0.0  ;;  %v660_v61 = vmul.f32 0.2, %v552_v51  ;;  %v982_v62 = vrot.slane %v980_v58, 1 }
  0x4d   : > { %vm607_vm13 = vcmp.gt.f32.partialorder %v553_v52, 0.0  ;;  %v661_v63 = vmul.f32 0.2, %v553_v52  ;;  %v713_v4 = vsel %vm605_vm11, %v551_v43, %v659_v59  ;;  %v440_v18 = vunpack.c.l.bf16 %v384_v55 }
  0x4e   : > { %v978_v5 = vor.u32 %v977_v60, %v973_v49  ;;  %v714_v8 = vsel %vm606_vm12, %v552_v51, %v660_v61  ;;  %v496_v25 = vmul.f32 %v3990_v13, %v438_v9  ;;  %v497_v26 = vmul.f32 %v3990_v13, %v439_v10  ;;  %v388_v61 = vld [vmem:[%s3977_s22 + $0x54] sm:$0xff]  }
  0x4f   : > { %v715_v15 = vsel %vm607_vm13, %v553_v52, %v661_v63  ;;  %v4281_v17 = vpack.c.bf16 %v714_v8, %v713_v4  ;;  %v1035_v30 = vsel %vm1032_vm10, %v1033_v44, %v1034_v1  ;;  %v498_v31 = vmul.f32 %v3990_v13, %v440_v18  ;;  %v3851_v44 = vld [vmem:[%s5143_s2 + $0x138] sm:$0xff]   ;;  %v3839_v8 = vld [vmem:[%s5143_s2 + $0x1c8] sm:$0xff]  }
  0x50   : > { %v4285_v21 = vsel %vm791_vm3, %v978_v5, %v982_v62  ;;  %v4287_v22 = vpack.c.bf16 %v715_v15, %v715_v15  ;;  %v554_v34 = vadd.f32 %v3995_v16, %v496_v25  ;;  %v555_v35 = vadd.f32 %v3995_v16, %v497_v26  ;;  %3472 = vmatpush3.bf16.msra.mxu0 %v3851_v44  ;;  %v390_v18 = vld [vmem:[%s3977_s22 + $0x5c] sm:$0x1] }
  0x51   : > { %1863 = vmatprep.mubr.bf16.mxu1 %v4285_v21  ;;  %v841_v27 = vshrl.u32 %v4281_v17, 16  ;;  %v843_v29 = vshll.u32 %v4281_v17, 16  ;;  %v3109_v36 = vunpack.c.l.bf16 %v3213_v20  ;;  %v556_v53 = vadd.f32 %v3995_v16, %v498_v31 }
  0x52   : > { %1864 = vmatmul.mubr.bf16.gmra.mrb[12].mxu1 %v4255_v37  ;;  %v848_v33 = vshll.u32 %v4287_v22, 16  ;;  %v1036_v1 = vrot.slane %v4083_v42, 1  ;;  %v3110_v43 = vunpack.c.h.bf16 %v3213_v20  ;;  %vm608_vm14 = vcmp.gt.f32.partialorder %v554_v34, 0.0 }
  0x53   : > { %v845_v41 = vrot.slane %v843_v29, 1  ;;  %1904 = vmatprep.mubr.bf16.mxu1 %v4083_v42  ;;  %vm609_vm15 = vcmp.gt.f32.partialorder %v555_v35, 0.0  ;;  %v662_v50 = vmul.f32 0.2, %v554_v34  ;;  %vm610_vm0 = vcmp.gt.f32.partialorder %v556_v53, 0.0  ;;  %v4318_v42 = vld [vmem:[%s5143_s2 + $0x200] sm:$0xff]  }
  0x54   : > { %v850_v49 = vrot.slane %v848_v33, 1  ;;  %v663_v55 = vmul.f32 0.2, %v555_v35  ;;  %v664_v56 = vmul.f32 0.2, %v556_v53  ;;  %v443_v52 = vunpack.c.l.bf16 %v387_v32  ;;  %3705 = vmatprep.subr.bf16.mxu0 %v4318_v42  ;;  %v3841_v32 = vld [vmem:[%s5143_s2 + $0x188] sm:$0xff]  }
  0x55   : > { %v846_v51 = vor.u32 %v845_v41, %v841_v27  ;;  %v716_v58 = vsel %vm608_vm14, %v554_v34, %v662_v50  ;;  %v499_v59 = vmul.f32 %v3109_v36, %v3990_v13  ;;  %v500_v60 = vmul.f32 %v3110_v43, %v3990_v13 }
  0x56   : > { %v717_v63 = vsel %vm609_vm15, %v555_v35, %v663_v55  ;;  %v718_v4 = vsel %vm610_vm0, %v556_v53, %v664_v56  ;;  %v1037_v5 = vrot.slane %v4090_v45, 1  ;;  %v501_v11 = vmul.f32 %v3990_v13, %v443_v52  ;;  %v3214_v55 = vld [vmem:[%s3977_s22 + $0x60] sm:$0xff]  }
  0x57   : > { %v4324_v62 = vsel %vm791_vm3, %v846_v51, %v850_v49  ;;  %v4333_v9 = vpack.c.bf16 %v717_v63, %v716_v58  ;;  %v4335_v10 = vpack.c.bf16 %v718_v4, %v718_v4  ;;  %v557_v15 = vadd.f32 %v3995_v16, %v499_v59  ;;  %v4362_v51 = vld [vmem:[%s5144_s3] ss:$0 sm:$0xff]  ;;  %v3845_v59 = vld [vmem:[%s5143_s2 + $0x190] sm:$0xff]  }
  0x58   : > { %1775 = vmatprep.mubr.bf16.mxu0 %v4324_v62  ;;  %v558_v45 = vadd.f32 %v3995_v16, %v500_v60  ;;  %v1039_v20 = vrot.slane %v4151_v46, 1  ;;  %v444_v25 = vunpack.c.l.bf16 %v388_v61  ;;  %v445_v26 = vunpack.c.h.bf16 %v388_v61 }
  0x59   : > { %1776 = vmatmul.mubr.bf16.gmra.mrb[16].mxu0 %v4281_v17  ;;  %v853_v27 = vshrl.u32 %v4333_v9, 16  ;;  %v855_v29 = vshll.u32 %v4333_v9, 16  ;;  %v860_v31 = vshll.u32 %v4335_v10, 16  ;;  %v559_v13 = vadd.f32 %v3995_v16, %v501_v11  ;;  %v3844_v16 = vld [vmem:[%s5143_s2 + $0x1d0] sm:$0xff]  }
  0x5a   : > { %1905 = vmatmul.mubr.bf16.vlgmr.msra.gmra.mrb[16].mxu1 %v1035_v30  ;;  %vm611_vm1 = vcmp.gt.f32.partialorder %v557_v15, 0.0  ;;  %vm612_vm2 = vcmp.gt.f32.partialorder %v558_v45, 0.0  ;;  %v665_v33 = vmul.f32 0.2, %v557_v15  ;;  %v666_v34 = vmul.f32 0.2, %v558_v45 }
  0x5b   : > { %3570 = vmatpush3.bf16.msra.mxu1 %v3835_v54  ;;  %1912 = vmatprep.mubr.bf16.mxu1 %v4151_v46  ;;  %v857_v30 = vrot.slane %v855_v29, 1  ;;  %v862_v35 = vrot.slane %v860_v31, 1  ;;  %vm613_vm4 = vcmp.gt.f32.partialorder %v559_v13, 0.0  ;;  %v667_v36 = vmul.f32 0.2, %v559_v13 }
  0x5c   : > { %3571 = vmatprep.subr.bf16.mxu1 %v3839_v8  ;;  %v4355_v38 = vsel %vm1032_vm10, %v1036_v1, %v1037_v5  ;;  %v719_v41 = vsel %vm611_vm1, %v557_v15, %v665_v33  ;;  %v720_v53 = vsel %vm612_vm2, %v558_v45, %v666_v34  ;;  %v446_v43 = vunpack.c.l.bf16 %v390_v18  ;;  %v393_v5 = vld [vmem:[%s3977_s22 + $0x68] sm:$0x1]  ;;  %v3848_v8 = vld [vmem:[%s5143_s2 + $0x1d8] sm:$0xff]  }
  0x5d   : > { %v858_v44 = vor.u32 %v857_v30, %v853_v27  ;;  %v721_v49 = vsel %vm613_vm4, %v559_v13, %v667_v36  ;;  %v4357_v50 = vpack.c.bf16 %v720_v53, %v719_v41  ;;  %v502_v54 = vmul.f32 %v4362_v51, %v444_v25  ;;  %v3849_v13 = vld [vmem:[%s5143_s2 + $0x198] sm:$0xff]   ;;  %v394_v53 = vld [vmem:[%s3977_s22 + $0x6c] sm:$0xff]  }
  0x5e   : > { %v4366_v56 = vpack.c.bf16 %v721_v49, %v721_v49  ;;  %v1040_v1 = vrot.slane %v4154_v48, 1  ;;  %v503_v58 = vmul.f32 %v4362_v51, %v445_v26  ;;  %v504_v52 = vmul.f32 %v4362_v51, %v446_v43  ;;  %v4382_v48 = vld [vmem:[%s5144_s3 + $0x1] ss:$0 sm:$0xff] }
  0x5f   : > { %3572 = vmatpush3.bf16.msra.mxu1 %v3841_v32  ;;  %v4375_v60 = vsel %vm791_vm3, %v858_v44, %v862_v35  ;;  %v865_v61 = vshrl.u32 %v4357_v50, 16  ;;  %v867_v63 = vshll.u32 %v4357_v50, 16  ;;  %v560_v4 = vadd.f32 %v4382_v48, %v502_v54  ;;  %v3852_v43 = vld [vmem:[%s5143_s2 + $0x1e0] sm:$0xff]  }
  0x60   : > { %3573 = vmatprep.subr.bf16.mxu1 %v3844_v16  ;;  %1783 = vmatprep.mubr.bf16.mxu0 %v4375_v60  ;;  %v872_v11 = vshll.u32 %v4366_v56, 16  ;;  %v561_v15 = vadd.f32 %v4382_v48, %v503_v58  ;;  %v562_v18 = vadd.f32 %v4382_v48, %v504_v52  ;;  %v1042_v45 = vrot.slane %v4228_v0, 1 }
  0x61   : > { %1784 = vmatmul.mubr.bf16.gmra.mrb[20].mxu0 %v4333_v9  ;;  %v869_v25 = vrot.slane %v867_v63, 1  ;;  %vm614_vm5 = vcmp.gt.f32.partialorder %v560_v4, 0.0  ;;  %v668_v26 = vmul.f32 0.2, %v560_v4  ;;  %v3113_v27 = vunpack.c.l.bf16 %v3214_v55 }
  0x62   : > { %1913 = vmatmul.mubr.bf16.gmra.mrb[20].mxu1 %v4355_v38  ;;  %v874_v29 = vrot.slane %v872_v11, 1  ;;  %vm615_vm6 = vcmp.gt.f32.partialorder %v561_v15, 0.0  ;;  %vm616_vm7 = vcmp.gt.f32.partialorder %v562_v18, 0.0  ;;  %v669_v31 = vmul.f32 0.2, %v561_v15 }
  0x63   : > { %1920 = vmatprep.mubr.bf16.mxu1 %v4228_v0  ;;  %3574 = vmatpush3.bf16.msra.mxu1 %v3845_v59  ;;  %v870_v32 = vor.u32 %v869_v25, %v865_v61  ;;  %v4403_v33 = vsel %vm1032_vm10, %v1039_v20, %v1040_v1  ;;  %v670_v34 = vmul.f32 0.2, %v562_v18  ;;  %v722_v30 = vsel %vm614_vm5, %v560_v4, %v668_v26  ;;  %v396_v59 = vld [vmem:[%s3977_s22 + $0x74] sm:$0x1] }
  0x64   : > { %3575 = vmatprep.subr.bf16.mxu1 %v3848_v8  ;;  %v723_v35 = vsel %vm615_vm6, %v561_v15, %v669_v31  ;;  %v3114_v36 = vunpack.c.h.bf16 %v3214_v55  ;;  %v449_v16 = vunpack.c.l.bf16 %v393_v5  ;;  %v505_v41 = vmul.f32 %v4362_v51, %v3113_v27  ;;  %v3855_v5 = vld [vmem:[%s5143_s2 + $0x1e8] sm:$0xff]  }
  0x65   : > { %v4411_v44 = vsel %vm791_vm3, %v870_v32, %v874_v29  ;;  %v724_v20 = vsel %vm616_vm7, %v562_v18, %v670_v34  ;;  %v4414_v49 = vpack.c.bf16 %v723_v35, %v722_v30  ;;  %v1043_v54 = vrot.slane %v4234_v7, 1  ;;  %v3854_v7 = vld [vmem:[%s5143_s2 + $0x1a0] sm:$0xff]   ;;  %v3857_v35 = vld [vmem:[%s5143_s2 + $0x1a8] sm:$0xff]  }
  0x66   : > { %1791 = vmatprep.mubr.bf16.mxu0 %v4411_v44  ;;  %v4418_v55 = vpack.c.bf16 %v724_v20, %v724_v20  ;;  %v506_v1 = vmul.f32 %v4362_v51, %v3114_v36  ;;  %v507_v58 = vmul.f32 %v4362_v51, %v449_v16  ;;  %v563_v52 = vadd.f32 %v4382_v48, %v505_v41 }
  0x67   : > { %v877_v61 = vshrl.u32 %v4414_v49, 16  ;;  %v879_v63 = vshll.u32 %v4414_v49, 16  ;;  %v450_v4 = vunpack.c.l.bf16 %v394_v53  ;;  %3576 = vmatpush3.bf16.msra.mxu1 %v3849_v13  ;;  %v4438_v25 = vsel %vm1032_vm10, %v1042_v45, %v1043_v54 }
  0x68   : > { %v884_v8 = vshll.u32 %v4418_v55, 16  ;;  %v564_v11 = vadd.f32 %v4382_v48, %v506_v1  ;;  %v565_v15 = vadd.f32 %v4382_v48, %v507_v58  ;;  %vm617_vm8 = vcmp.gt.f32.partialorder %v563_v52, 0.0  ;;  %3577 = vmatprep.subr.bf16.mxu1 %v3852_v43  ;;  %v3858_v43 = vld [vmem:[%s5143_s2 + $0x1f0] sm:$0xff]  }
  0x69   : > { %1792 = vmatmul.mubr.bf16.gmra.mrb[24].mxu0 %v4357_v50  ;;  %v881_v18 = vrot.slane %v879_v63, 1  ;;  %v671_v26 = vmul.f32 0.2, %v563_v52  ;;  %v451_v27 = vunpack.c.h.bf16 %v394_v53  ;;  %v452_v30 = vunpack.c.l.bf16 %v396_v59  ;;  %v3215_v53 = vld [vmem:[%s3977_s22 + $0x78] sm:$0xff]  }
  0x6a   : > { %1921 = vmatmul.mubr.bf16.gmra.mrb[24].mxu1 %v4403_v33  ;;  %v886_v29 = vrot.slane %v884_v8, 1  ;;  %vm618_vm9 = vcmp.gt.f32.partialorder %v564_v11, 0.0  ;;  %vm619_vm11 = vcmp.gt.f32.partialorder %v565_v15, 0.0  ;;  %v672_v31 = vmul.f32 0.2, %v564_v11 }
  0x6b   : > { %1928 = vmatprep.mubr.bf16.mxu1 %v4281_v17  ;;  %v882_v13 = vor.u32 %v881_v18, %v877_v61  ;;  %v673_v32 = vmul.f32 0.2, %v565_v15  ;;  %v725_v34 = vsel %vm617_vm8, %v563_v52, %v671_v26  ;;  %3578 = vmatpush3.bf16.msra.mxu1 %v3854_v7  ;;  %v1045_v36 = vrot.slane %v4281_v17, 1  ;;  %v3861_v26 = vld [vmem:[%s5143_s2 + $0x1f8] sm:$0xff]  }
  0x6c   : > { %v726_v45 = vsel %vm618_vm9, %v564_v11, %v672_v31  ;;  %v508_v16 = vmul.f32 %v4362_v51, %v450_v4  ;;  %v509_v41 = vmul.f32 %v4362_v51, %v451_v27  ;;  %3579 = vmatprep.subr.bf16.mxu1 %v3855_v5  ;;  %v510_v58 = vmul.f32 %v4362_v51, %v452_v30  ;;  %v399_v11 = vld [vmem:[%s3977_s22 + $0x80] sm:$0x1] }
  0x6d   : > { %v4452_v20 = vsel %vm791_vm3, %v882_v13, %v886_v29  ;;  %v727_v54 = vsel %vm619_vm11, %v565_v15, %v673_v32  ;;  %v4455_v1 = vpack.c.bf16 %v726_v45, %v725_v34  ;;  %v1046_v59 = vrot.slane %v4287_v22, 1  ;;  %v3860_v15 = vld [vmem:[%s5143_s2 + $0x1b0] sm:$0xff]  }
  0x6e   : > { %1799 = vmatprep.mubr.bf16.mxu0 %v4452_v20  ;;  %v4459_v52 = vpack.c.bf16 %v727_v54, %v727_v54  ;;  %v566_v61 = vadd.f32 %v4382_v48, %v508_v16  ;;  %v567_v63 = vadd.f32 %v4382_v48, %v509_v41  ;;  %v568_v5 = vadd.f32 %v4382_v48, %v510_v58  ;;  %v3863_v41 = vld [vmem:[%s5143_s2 + $0x1b8] sm:$0xff]  }
  0x6f   : > { %v889_v4 = vshrl.u32 %v4455_v1, 16  ;;  %v891_v7 = vshll.u32 %v4455_v1, 16  ;;  %v3117_v8 = vunpack.c.l.bf16 %v3215_v53  ;;  %3580 = vmatpush3.bf16.msra.mxu1 %v3857_v35  ;;  %v3118_v34 = vunpack.c.h.bf16 %v3215_v53 }
  0x70   : > { %v896_v18 = vshll.u32 %v4459_v52, 16  ;;  %vm620_vm12 = vcmp.gt.f32.partialorder %v566_v61, 0.0  ;;  %vm621_vm13 = vcmp.gt.f32.partialorder %v567_v63, 0.0  ;;  %v674_v22 = vmul.f32 0.2, %v566_v61  ;;  %3581 = vmatprep.subr.bf16.mxu1 %v3858_v43 }
  0x71   : > { %1800 = vmatmul.mubr.bf16.gmra.mrb[28].mxu0 %v4414_v49  ;;  %v893_v27 = vrot.slane %v891_v7, 1  ;;  %vm622_vm14 = vcmp.gt.f32.partialorder %v568_v5, 0.0  ;;  %v675_v29 = vmul.f32 0.2, %v567_v63  ;;  %v676_v31 = vmul.f32 0.2, %v568_v5 }
  0x72   : > { %1929 = vmatmul.mubr.bf16.gmra.mrb[28].mxu1 %v4438_v25  ;;  %v898_v13 = vrot.slane %v896_v18, 1  ;;  %v728_v32 = vsel %vm620_vm12, %v566_v61, %v674_v22  ;;  %v455_v16 = vunpack.c.l.bf16 %v399_v11  ;;  %v511_v58 = vmul.f32 %v4362_v51, %v3117_v8  ;;  %v400_v61 = vld [vmem:[%s3977_s22 + $0x84] sm:$0xff]  }
  0x73   : > { %1936 = vmatprep.mubr.bf16.mxu1 %v4333_v9  ;;  %v894_v30 = vor.u32 %v893_v27, %v889_v4  ;;  %v729_v35 = vsel %vm621_vm13, %v567_v63, %v675_v29  ;;  %v730_v45 = vsel %vm622_vm14, %v568_v5, %v676_v31  ;;  %3582 = vmatpush3.bf16.msra.mxu1 %v3860_v15  ;;  %v1048_v4 = vrot.slane %v4333_v9, 1 }
  0x74   : > { %v4481_v43 = vpack.c.bf16 %v729_v35, %v728_v32  ;;  %v4483_v54 = vpack.c.bf16 %v730_v45, %v730_v45  ;;  %v512_v7 = vmul.f32 %v4362_v51, %v3118_v34  ;;  %3583 = vmatprep.subr.bf16.mxu1 %v3861_v26  ;;  %v4492_v63 = vsel %vm1032_vm10, %v1045_v36, %v1046_v59  ;;  %v402_v59 = vld [vmem:[%s3977_s22 + $0x8c] sm:$0x1]  ;;  %s5063_s22 = scalar_lea.vmem %s5145_s4, %s3062_s26 }
  0x75   : > { %v4489_v53 = vsel %vm791_vm3, %v894_v30, %v898_v13  ;;  %v513_v5 = vmul.f32 %v4362_v51, %v455_v16  ;;  %v569_v18 = vadd.f32 %v4382_v48, %v511_v58  ;;  %v1049_v22 = vrot.slane %v4335_v10, 1 }
  0x76   : > { %1807 = vmatprep.mubr.bf16.mxu0 %v4489_v53  ;;  %v901_v11 = vshrl.u32 %v4481_v43, 16  ;;  %v903_v8 = vshll.u32 %v4481_v43, 16  ;;  %v908_v15 = vshll.u32 %v4483_v54, 16  ;;  %v570_v26 = vadd.f32 %v4382_v48, %v512_v7 }
  0x77   : > { %v571_v36 = vadd.f32 %v4382_v48, %v513_v5  ;;  %v456_v27 = vunpack.c.l.bf16 %v400_v61  ;;  %3584 = vmatpush3.bf16.msra.mxu1 %v3863_v41  ;;  %vm623_vm15 = vcmp.gt.f32.partialorder %v569_v18, 0.0  ;;  %v677_v13 = vmul.f32 0.2, %v569_v18 }
  0x78   : > { %v905_v29 = vrot.slane %v903_v8, 1  ;;  %v910_v31 = vrot.slane %v908_v15, 1  ;;  %vm624_vm0 = vcmp.gt.f32.partialorder %v570_v26, 0.0  ;;  %v678_v32 = vmul.f32 0.2, %v570_v26 }
  0x79   : > { %1808 = vmatmul.mubr.bf16.gmra.mrb[32].mxu0 %v4455_v1  ;;  %vm625_vm1 = vcmp.gt.f32.partialorder %v571_v36, 0.0  ;;  %v679_v34 = vmul.f32 0.2, %v571_v36  ;;  %v731_v30 = vsel %vm623_vm15, %v569_v18, %v677_v13  ;;  %v457_v35 = vunpack.c.h.bf16 %v400_v61 }
  0x7a   : > { %1937 = vmatmul.mubr.bf16.gmra.mrb[32].mxu1 %v4492_v63  ;;  %v906_v10 = vor.u32 %v905_v29, %v901_v11  ;;  %v458_v45 = vunpack.c.l.bf16 %v402_v59  ;;  %v732_v16 = vsel %vm624_vm0, %v570_v26, %v678_v32  ;;  %v514_v58 = vmul.f32 %v4362_v51, %v456_v27 }
  0x7b   : > { %1944 = vmatprep.mubr.bf16.mxu1 %v4357_v50  ;;  %v733_v41 = vsel %vm625_vm1, %v571_v36, %v679_v34  ;;  %v4512_v5 = vpack.c.bf16 %v732_v16, %v731_v30  ;;  %v515_v15 = vmul.f32 %v4362_v51, %v457_v35  ;;  %v4519_v11 = vsel %vm1032_vm10, %v1048_v4, %v1049_v22 }
  0x7c   : > { %v4510_v7 = vsel %vm791_vm3, %v906_v10, %v910_v31  ;;  %v4514_v8 = vpack.c.bf16 %v733_v41, %v733_v41  ;;  %v516_v61 = vmul.f32 %v4362_v51, %v458_v45  ;;  %v572_v18 = vadd.f32 %v4382_v48, %v514_v58 }
  0x7d   : > { %1815 = vmatprep.mubr.bf16.mxu0 %v4510_v7  ;;  %v913_v26 = vshrl.u32 %v4512_v5, 16  ;;  %v915_v36 = vshll.u32 %v4512_v5, 16  ;;  %v573_v27 = vadd.f32 %v4382_v48, %v515_v15  ;;  %v1051_v30 = vrot.slane %v4357_v50, 1 }
  0x7e   : > { %v920_v59 = vshll.u32 %v4514_v8, 16  ;;  %v574_v29 = vadd.f32 %v4382_v48, %v516_v61  ;;  %vm626_vm2 = vcmp.gt.f32.partialorder %v572_v18, 0.0  ;;  %v680_v31 = vmul.f32 0.2, %v572_v18 }
  0x7f   : > { %v917_v13 = vrot.slane %v915_v36, 1  ;;  %vm627_vm4 = vcmp.gt.f32.partialorder %v573_v27, 0.0  ;;  %v681_v4 = vmul.f32 0.2, %v573_v27  ;;  %v1052_v35 = vrot.slane %v4366_v56, 1 }
  0x80   : > { %v922_v32 = vrot.slane %v920_v59, 1  ;;  %vm628_vm5 = vcmp.gt.f32.partialorder %v574_v29, 0.0  ;;  %v682_v22 = vmul.f32 0.2, %v574_v29  ;;  %v734_v34 = vsel %vm626_vm2, %v572_v18, %v680_v31 }
  0x81   : > { %1816 = vmatmul.mubr.bf16.gmra.mrb[36].mxu0 %v4481_v43  ;;  %v918_v10 = vor.u32 %v917_v13, %v913_v26  ;;  %v735_v45 = vsel %vm627_vm4, %v573_v27, %v681_v4  ;;  %v4544_v26 = vsel %vm1032_vm10, %v1051_v30, %v1052_v35  ;;  %v1055_v31 = vrot.slane %v4418_v55, 1  ;;  %v3864_v35 = vld [vmem:[%s5143_s2 + $0x220] sm:$0xff]  }
  0x82   : > { %1945 = vmatmul.mubr.bf16.gmra.mrb[36].mxu1 %v4519_v11  ;;  %v736_v16 = vsel %vm628_vm5, %v574_v29, %v682_v22  ;;  %v4533_v41 = vpack.c.bf16 %v735_v45, %v734_v34  ;;  %v1054_v29 = vrot.slane %v4414_v49, 1  ;;  %v1057_v4 = vrot.slane %v4455_v1, 1  ;;  %v3856_v34 = vld [vmem:[%s5143_s2 + $0x208] sm:$0xff]  }
  0x83   : > { %1952 = vmatprep.mubr.bf16.mxu1 %v4414_v49  ;;  %v4536_v58 = vsel %vm791_vm3, %v918_v10, %v922_v32  ;;  %v4538_v15 = vpack.c.bf16 %v736_v16, %v736_v16  ;;  %v1058_v55 = vrot.slane %v4459_v52, 1  ;;  %v1061_v10 = vrot.slane %v4483_v54, 1  ;;  %v3859_v52 = vld [vmem:[%s5143_s2 + $0x210] sm:$0xff]   ;;  %v3865_v16 = vld [vmem:[%s5143_s2 + $0x228] sm:$0xff]  }
  0x84   : > { %1823 = vmatprep.mubr.bf16.mxu0 %v4536_v58  ;;  %v925_v61 = vshrl.u32 %v4533_v41, 16  ;;  %v927_v18 = vshll.u32 %v4533_v41, 16  ;;  %v4557_v32 = vsel %vm1032_vm10, %v1054_v29, %v1055_v31  ;;  %v1064_v54 = vrot.slane %v4514_v8, 1 }
  0x85   : > { %v932_v56 = vshll.u32 %v4538_v15, 16  ;;  %v4566_v22 = vsel %vm1032_vm10, %v1057_v4, %v1058_v55  ;;  %v1066_v8 = vrot.slane %v4533_v41, 1 }
  0x86   : > { %v929_v36 = vrot.slane %v927_v18, 1  ;;  %v3866_v18 = vld [vmem:[%s5143_s2 + $0x230] sm:$0xff]  }
  0x87   : > { %v934_v59 = vrot.slane %v932_v56, 1 }
  0x88   : > { %v930_v27 = vor.u32 %v929_v36, %v925_v61  ;;  %v1067_v61 = vrot.slane %v4538_v15, 1  ;;  %v3128_v36 = vld [vmem:[%s4616_s24] sm:$0xff]   ;;  %v3867_v15 = vld [vmem:[%s5143_s2 + $0x238] sm:$0xff]  }
  0x89   : > { %1824 = vmatmul.mubr.bf16.gmra.mrb[40].mxu0 %v4512_v5  ;;  %v3129_v29 = vunpack.c.l.bf16 %v3128_v36  ;;  %v3130_v31 = vunpack.c.h.bf16 %v3128_v36  ;;  %v1078_v36 = vrot.slane %v4255_v37, 1 }
  0x8a   : > { %1953 = vmatmul.mubr.bf16.gmra.mrb[40].mxu1 %v4544_v26  ;;  %v4553_v13 = vsel %vm791_vm3, %v930_v27, %v934_v59  ;;  %v4619_v56 = vsel %vm1032_vm10, %v1066_v8, %v1067_v61  ;;  %v1069_v59 = vrot.slane %v4047_v2, 1  ;;  %v1070_v27 = vrot.slane %v4049_v3, 1 }
  0x8b   : > { %1960 = vmatprep.mubr.bf16.mxu1 %v4455_v1  ;;  %1831 = vmatprep.mubr.bf16.mxu0 %v4553_v13  ;;  %v529_v55 = vmul.f32 %v4362_v51, %v3129_v29  ;;  %v1072_v3 = vrot.slane %v4116_v12, 1 }
  0x8c   : > { %v4632_v4 = vsel %vm1032_vm10, %v1069_v59, %v1070_v27 }
  0x91   : > { %1832 = vmatmul.mubr.bf16.gmra.mrb[44].mxu0 %v4533_v41 }
  0x92   : > { %1961 = vmatmul.mubr.bf16.gmra.mrb[44].mxu1 %v4557_v32  ;;  %2065 = vmatprep.mubr.bf16.mxu0 %v4355_v38  ;;  %v1060_v38 = vrot.slane %v4481_v43, 1 }
  0x93   : > { %1968 = vmatprep.mubr.bf16.mxu1 %v4481_v43 }
  0x94   : > { %v4582_v30 = vsel %vm1032_vm10, %v1060_v38, %v1061_v10  ;;  %v1073_v38 = vrot.slane %v4118_v14, 1  ;;  %v587_v10 = vadd.f32 %v4382_v48, %v529_v55  ;;  %v1075_v14 = vrot.slane %v4189_v23, 1 }
  0x96   : > { %vm641_vm6 = vcmp.gt.f32.partialorder %v587_v10, 0.0 }
  0x99   : > { %2066 = vmatmul.mubr.bf16.vlgmr.msra.gmra.mrb[48].mxu0 %v4124_v19  ;;  %v3862_v19 = vld [vmem:[%s5143_s2 + $0x218] sm:$0xff]  }
  0x9a   : > { %1969 = vmatmul.mubr.bf16.gmra.mrb[48].mxu1 %v4566_v22  ;;  %3706 = vmatpush3.bf16.msra.mxu0 %v4318_v42  ;;  %v1063_v42 = vrot.slane %v4512_v5, 1 }
  0x9b   : > { %1976 = vmatprep.mubr.bf16.mxu1 %v4512_v5  ;;  %2073 = vmatprep.mubr.bf16.mxu0 %v4403_v33 }
  0x9c   : > { %3707 = vmatprep.subr.bf16.mxu0 %v3856_v34  ;;  %v4597_v45 = vsel %vm1032_vm10, %v1063_v42, %v1064_v54  ;;  %v695_v42 = vmul.f32 0.2, %v587_v10 }
  0x9e   : > { %3708 = vmatpush3.bf16.msra.mxu0 %v3856_v34  ;;  %v530_v34 = vmul.f32 %v4362_v51, %v3130_v31 }
  0x9f   : > { %3709 = vmatprep.subr.bf16.mxu0 %v3859_v52 }
  0xa1   : > { %2074 = vmatmul.mubr.bf16.gmra.mrb[52].mxu0 %v4199_v28 }
  0xa2   : > { %1977 = vmatmul.mubr.bf16.gmra.mrb[52].mxu1 %v4582_v30  ;;  %2081 = vmatprep.mubr.bf16.mxu0 %v4438_v25 }
  0xa3   : > { %1984 = vmatprep.mubr.bf16.mxu1 %v4533_v41  ;;  %3710 = vmatpush3.bf16.msra.mxu0 %v3859_v52  ;;  %v588_v52 = vadd.f32 %v4382_v48, %v530_v34 }
  0xa4   : > { %3711 = vmatprep.subr.bf16.mxu0 %v3862_v19 }
  0xa5   : > { %v696_v54 = vmul.f32 0.2, %v588_v52  ;;  %vm642_vm7 = vcmp.gt.f32.partialorder %v588_v52, 0.0 }
  0xa7   : > { %3712 = vmatpush3.bf16.msra.mxu0 %v3862_v19  ;;  %v4645_v19 = vsel %vm1032_vm10, %v1072_v3, %v1073_v38  ;;  %v750_v8 = vsel %vm642_vm7, %v588_v52, %v696_v54 }
  0xa8   : > { %3713 = vmatprep.subr.bf16.mxu0 %v3864_v35 }
  0xa9   : > { %2082 = vmatmul.mubr.bf16.gmra.mrb[56].mxu0 %v4264_v47 }
  0xaa   : > { %1985 = vmatmul.mubr.bf16.gmra.mrb[56].mxu1 %v4597_v45  ;;  %2089 = vmatprep.mubr.bf16.mxu0 %v4492_v63 }
  0xab   : > { %1992 = vmatprep.mubr.bf16.mxu1 %v4047_v2  ;;  %3714 = vmatpush3.bf16.msra.mxu0 %v3864_v35  ;;  %v1076_v35 = vrot.slane %v4191_v24, 1 }
  0xac   : > { %3715 = vmatprep.subr.bf16.mxu0 %v3865_v16 }
  0xad   : > { %v4654_v61 = vsel %vm1032_vm10, %v1075_v14, %v1076_v35 }
  0xaf   : > { %3716 = vmatpush3.bf16.msra.mxu0 %v3865_v16  ;;  %v749_v16 = vsel %vm641_vm6, %v587_v10, %v695_v42 }
  0xb0   : > { %3717 = vmatprep.subr.bf16.mxu0 %v3866_v18 }
  0xb1   : > { %2090 = vmatmul.mubr.bf16.gmra.mrb[60].mxu0 %v4324_v62 }
  0xb2   : > { %1993 = vmatmul.mubr.bf16.gmra.mrb[60].mxu1 %v4619_v56  ;;  %2097 = vmatprep.mubr.bf16.mxu0 %v4519_v11 }
  0xb3   : > { %2000 = vmatprep.mubr.bf16.mxu1 %v4116_v12  ;;  %3718 = vmatpush3.bf16.msra.mxu0 %v3866_v18  ;;  %v4656_v18 = vpack.c.bf16 %v750_v8, %v749_v16 }
  0xb4   : > { %3719 = vmatprep.subr.bf16.mxu0 %v3867_v15 }
  0xb5   : > { %v1112_v10 = vrot.slane %v4656_v18, 1  ;;  %v1098_v16 = vshrl.u32 %v4656_v18, 16 }
  0xb7   : > { %3720 = vmatpush3.bf16.msra.mxu0 %v3867_v15  ;;  %v1079_v15 = vrot.slane %v4258_v39, 1 }
  0xb9   : > { %2098 = vmatmul.mubr.bf16.gmra.mrb[64].mxu0 %v4375_v60  ;;  %v4665_v24 = vsel %vm1032_vm10, %v1078_v36, %v1079_v15 }
  0xba   : > { %2001 = vmatmul.mubr.bf16.gmra.mrb[64].mxu1 %v4632_v4  ;;  %2105 = vmatprep.mubr.bf16.mxu0 %v4544_v26 }
  0xbb   : > { %2008 = vmatprep.mubr.bf16.mxu1 %v4189_v23 }
  0xc1   : > { %2106 = vmatmul.mubr.bf16.gmra.mrb[68].mxu0 %v4411_v44 }
  0xc2   : > { %2009 = vmatmul.mubr.bf16.gmra.mrb[68].mxu1 %v4645_v19  ;;  %2113 = vmatprep.mubr.bf16.mxu0 %v4557_v32 }
  0xc3   : > { %2016 = vmatprep.mubr.bf16.mxu1 %v4255_v37 }
  0xc9   : > { %2114 = vmatmul.mubr.bf16.gmra.mrb[72].mxu0 %v4452_v20 }
  0xca   : > { %2017 = vmatmul.mubr.bf16.gmra.mrb[72].mxu1 %v4654_v61  ;;  %2121 = vmatprep.mubr.bf16.mxu0 %v4566_v22 }
  0xcb   : > { %2024 = vmatprep.mubr.bf16.mxu1 %v4656_v18 }
  0xd1   : > { %2122 = vmatmul.mubr.bf16.gmra.mrb[76].mxu0 %v4489_v53 }
  0xd2   : > { %2025 = vmatmul.mubr.bf16.gmra.mrb[76].mxu1 %v4665_v24  ;;  %2129 = vmatprep.mubr.bf16.mxu0 %v4582_v30 }
  0xd3   : > { %2226 = vmatprep.mubr.bf16.mxu1 %v4199_v28  ;;  %v417_v28 = vld [vmem:[%s4616_s24 + $0x8] sm:$0x1] }
  0xd9   : > { %2130 = vmatmul.mubr.bf16.gmra.mrb[80].mxu0 %v4510_v7 }
  0xda   : > { %2227 = vmatmul.mubr.bf16.vlgmr.msra.gmra.mrb[80].mxu1 %v4151_v46  ;;  %2137 = vmatprep.mubr.bf16.mxu0 %v4597_v45  ;;  %v473_v46 = vunpack.c.l.bf16 %v417_v28 }
  0xdb   : > { %2234 = vmatprep.mubr.bf16.mxu1 %v4264_v47 }
  0xdc   : > { %v531_v39 = vmul.f32 %v4362_v51, %v473_v46 }
  0xe1   : > { %2138 = vmatmul.mubr.bf16.gmra.mrb[84].mxu0 %v4536_v58 }
  0xe2   : > { %2235 = vmatmul.mubr.bf16.gmra.mrb[84].mxu1 %v4228_v0  ;;  %2145 = vmatprep.mubr.bf16.mxu0 %v4619_v56  ;;  %v589_v0 = vadd.f32 %v4382_v48, %v531_v39 }
  0xe3   : > { %2242 = vmatprep.mubr.bf16.mxu1 %v4324_v62 }
  0xe4   : > { %vm643_vm8 = vcmp.gt.f32.partialorder %v589_v0, 0.0 }
  0xe9   : > { %2146 = vmatmul.mubr.bf16.gmra.mrb[88].mxu0 %v4553_v13 }
  0xea   : > { %2243 = vmatmul.mubr.bf16.gmra.mrb[88].mxu1 %v4281_v17  ;;  %2153 = vmatprep.mubr.bf16.mxu0 %v4632_v4  ;;  %v697_v17 = vmul.f32 0.2, %v589_v0 }
  0xeb   : > { %2250 = vmatprep.mubr.bf16.mxu1 %v4375_v60 }
  0xec   : > { %v751_v31 = vsel %vm643_vm8, %v589_v0, %v697_v17 }
  0xed   : > { %v788_v38 = vpack.c.bf16 %v751_v31, %v751_v31 }
  0xef   : > { %v1113_v52 = vrot.slane %v788_v38, 1  ;;  %v1105_v36 = vshll.u32 %v788_v38, 16 }
  0xf1   : > { %2154 = vmatmul.mubr.bf16.gmra.mrb[92].mxu0 %v4080_v40  ;;  %v1107_v46 = vrot.slane %v1105_v36, 1 }
  0xf2   : > { %2251 = vmatmul.mubr.bf16.gmra.mrb[92].mxu1 %v4333_v9  ;;  %2161 = vmatprep.mubr.bf16.mxu0 %v4645_v19 }
  0xf3   : > { %2258 = vmatprep.mubr.bf16.mxu1 %v4411_v44 }
  0xf9   : > { %2162 = vmatmul.mubr.bf16.gmra.mrb[96].mxu0 %v4167_v57 }
  0xfa   : > { %v3249_v47 = vpop.f32.mrb[0].mxu0  ;;  %2259 = vmatmul.mubr.bf16.gmra.mrb[96].mxu1 %v4357_v50  ;;  %2169 = vmatprep.mubr.bf16.mxu0 %v4654_v61 }
  0xfb   : > { %v3250_v62 = vpop.f32.mrb[1].mxu0  ;;  %2266 = vmatprep.mubr.bf16.mxu1 %v4452_v20  ;;  %v1100_v20 = vshll.u32 %v4656_v18, 16 }
  0xfc   : > { %v4694_v60 = vadd.f32 %v3250_v62, %v3249_v47  ;;  %v3252_v9 = vpop.f32.mrb[2].mxu0 }
  0xfd   : > { %v3321_v59 = vpop.f32.mrb[0].mxu1  ;;  %v3253_v27 = vpop.f32.mrb[3].mxu0  ;;  %v1102_v8 = vrot.slane %v1100_v20, 1 }
  0xfe   : > { %v3322_v44 = vpop.f32.mrb[1].mxu1  ;;  %v4696_v29 = vadd.f32 %v3253_v27, %v3252_v9 }
  0xff   : > { %v4698_v55 = vadd.f32 %v3322_v44, %v3321_v59  ;;  %v3324_v34 = vpop.f32.mrb[2].mxu1 }
 0x100   : > { %v3325_v3 = vpop.f32.mrb[3].mxu1 }
 0x101   : > { %v4700_v50 = vadd.f32 %v3325_v3, %v3324_v34  ;;  %2170 = vmatmul.mubr.bf16.gmra.mrb[100].mxu0 %v4232_v6 }
 0x102   : > { %2267 = vmatmul.mubr.bf16.gmra.mrb[100].mxu1 %v4414_v49  ;;  %2177 = vmatprep.mubr.bf16.mxu0 %v4665_v24  ;;  %v4712_v49 = vsel %vm1032_vm10, %v1112_v10, %v1113_v52 }
 0x103   : > { %2274 = vmatprep.mubr.bf16.mxu1 %v4489_v53  ;;  %v3255_v42 = vpop.f32.mrb[4].mxu0  ;;  %v1103_v53 = vor.u32 %v1102_v8, %v1098_v16 }
 0x104   : > { %v3256_v54 = vpop.f32.mrb[5].mxu0 }
 0x105   : > { %v4708_v14 = vadd.f32 %v3256_v54, %v3255_v42  ;;  %v3258_v35 = vpop.f32.mrb[6].mxu0  ;;  %v4723_v9 = vsel %vm791_vm3, %v1103_v53, %v1107_v46 }
 0x106   : > { %v3259_v15 = vpop.f32.mrb[7].mxu0 }
 0x107   : > { %v4714_v28 = vadd.f32 %v3259_v15, %v3258_v35 }
 0x109   : > { %2178 = vmatmul.mubr.bf16.gmra.mrb[104].mxu0 %v4285_v21 }
 0x10a   : > { %2275 = vmatmul.mubr.bf16.gmra.mrb[104].mxu1 %v4455_v1  ;;  %2185 = vmatprep.mubr.bf16.mxu0 %v4712_v49 }
 0x10b   : > { %2282 = vmatprep.mubr.bf16.mxu1 %v4510_v7  ;;  %v3327_v39 = vpop.f32.mrb[4].mxu1 }
 0x10c   : > { %v3328_v0 = vpop.f32.mrb[5].mxu1 }
 0x10d   : > { %v4720_v47 = vadd.f32 %v3328_v0, %v3327_v39  ;;  %v3330_v17 = vpop.f32.mrb[6].mxu1 }
 0x10e   : > { %v3331_v62 = vpop.f32.mrb[7].mxu1 }
 0x10f   : > { %v4725_v59 = vadd.f32 %v3331_v62, %v3330_v17 }
 0x110   : > { %v3261_v27 = vpop.f32.mrb[8].mxu0 }
 0x111   : > { %2186 = vmatmul.mubr.bf16.gmra.mrb[108].mxu0 %v4723_v9  ;;  %v3262_v1 = vpop.f32.mrb[9].mxu0 }
 0x112   : > { %2283 = vmatmul.mubr.bf16.gmra.mrb[108].mxu1 %v4481_v43  ;;  %3721 = vmatprep.mubr.bf16.mxu0 %v4403_v33  ;;  %v4731_v7 = vadd.f32 %v3262_v1, %v3261_v27  ;;  %v3264_v44 = vpop.f32.mrb[10].mxu0 }
 0x113   : > { %2290 = vmatprep.mubr.bf16.mxu1 %v4536_v58  ;;  %v3265_v31 = vpop.f32.mrb[11].mxu0 }
 0x114   : > { %v4733_v34 = vadd.f32 %v3265_v31, %v3264_v44 }
 0x117   : > { %v3333_v3 = vpop.f32.mrb[8].mxu1 }
 0x118   : > { %v3334_v38 = vpop.f32.mrb[9].mxu1 }
 0x119   : > { %3722 = vmatmul.mubr.bf16.vlgmr.msra.gmra.mrb[112].mxu0 %v4438_v25  ;;  %v4737_v20 = vadd.f32 %v3334_v38, %v3333_v3  ;;  %v3336_v43 = vpop.f32.mrb[10].mxu1 }
 0x11a   : > { %2291 = vmatmul.mubr.bf16.gmra.mrb[112].mxu1 %v4512_v5  ;;  %v3337_v10 = vpop.f32.mrb[11].mxu1  ;;  %3725 = vmatprep.mubr.bf16.mxu0 %v4492_v63  ;;  %v418_v5 = vld [vmem:[%s4616_s24 + $0xc] sm:$0xff]  }
 0x11b   : > { %2298 = vmatprep.mubr.bf16.mxu1 %v4553_v13  ;;  %v4741_v33 = vadd.f32 %v3337_v10, %v3336_v43  ;;  %v420_v13 = vld [vmem:[%s4616_s24 + $0x14] sm:$0x1]  ;;  %v474_v16 = vunpack.c.l.bf16 %v418_v5  ;;  %v475_v8 = vunpack.c.h.bf16 %v418_v5 }
 0x11d   : > { %v533_v0 = vmul.f32 %v4362_v51, %v475_v8 }
 0x11e   : > { %v3267_v58 = vpop.f32.mrb[12].mxu0 }
 0x11f   : > { %v3268_v52 = vpop.f32.mrb[13].mxu0  ;;  %v591_v1 = vadd.f32 %v4382_v48, %v533_v0 }
 0x120   : > { %v4743_v42 = vadd.f32 %v3268_v52, %v3267_v58  ;;  %v3270_v54 = vpop.f32.mrb[14].mxu0 }
 0x121   : > { %3726 = vmatmul.mubr.bf16.gmra.mrb[116].mxu0 %v4519_v11  ;;  %v3271_v25 = vpop.f32.mrb[15].mxu0  ;;  %v532_v11 = vmul.f32 %v4362_v51, %v474_v16  ;;  %v699_v52 = vmul.f32 0.2, %v591_v1  ;;  %vm645_vm11 = vcmp.gt.f32.partialorder %v591_v1, 0.0 }
 0x122   : > { %2299 = vmatmul.mubr.bf16.gmra.mrb[116].mxu1 %v4533_v41  ;;  %v4748_v35 = vadd.f32 %v3271_v25, %v3270_v54  ;;  %3729 = vmatprep.mubr.bf16.mxu0 %v4544_v26  ;;  %v476_v41 = vunpack.c.l.bf16 %v420_v13 }
 0x123   : > { %2306 = vmatprep.mubr.bf16.mxu1 %v4080_v40  ;;  %v590_v27 = vadd.f32 %v4382_v48, %v532_v11 }
 0x124   : > { %v534_v26 = vmul.f32 %v4362_v51, %v476_v41 }
 0x125   : > { %v3339_v63 = vpop.f32.mrb[12].mxu1  ;;  %v698_v58 = vmul.f32 0.2, %v590_v27  ;;  %vm644_vm9 = vcmp.gt.f32.partialorder %v590_v27, 0.0 }
 0x126   : > { %v3340_v36 = vpop.f32.mrb[13].mxu1 }
 0x127   : > { %v4753_v15 = vadd.f32 %v3340_v36, %v3339_v63  ;;  %v3342_v53 = vpop.f32.mrb[14].mxu1  ;;  %v752_v5 = vsel %vm644_vm9, %v590_v27, %v698_v58  ;;  %v753_v63 = vsel %vm645_vm11, %v591_v1, %v699_v52 }
 0x128   : > { %v3343_v46 = vpop.f32.mrb[15].mxu1 }
 0x129   : > { %v4755_v39 = vadd.f32 %v3343_v46, %v3342_v53  ;;  %3730 = vmatmul.mubr.bf16.gmra.mrb[120].mxu0 %v4557_v32  ;;  %v4783_v46 = vpack.c.bf16 %v753_v63, %v752_v5 }
 0x12a   : > { %2307 = vmatmul.mubr.bf16.gmra.mrb[120].mxu1 %v4047_v2  ;;  %3733 = vmatprep.mubr.bf16.mxu0 %v4566_v22  ;;  %v592_v22 = vadd.f32 %v4382_v48, %v534_v26 }
 0x12b   : > { %2314 = vmatprep.mubr.bf16.mxu1 %v4167_v57  ;;  %v1119_v26 = vshll.u32 %v4783_v46, 16 }
 0x12c   : > { %v3273_v40 = vpop.f32.mrb[16].mxu0  ;;  %vm646_vm12 = vcmp.gt.f32.partialorder %v592_v22, 0.0 }
 0x12d   : > { %v3361_v17 = vpop.f32.mrb[16].mxu1  ;;  %v3274_v62 = vpop.f32.mrb[17].mxu0 }
 0x12e   : > { %v4766_v44 = vadd.f32 %v3274_v62, %v3273_v40  ;;  %v3362_v31 = vpop.f32.mrb[17].mxu1  ;;  %v3276_v3 = vpop.f32.mrb[18].mxu0 }
 0x12f   : > { %v3363_v2 = vadd.f32 %v3362_v31, %v3361_v17  ;;  %v3364_v38 = vpop.f32.mrb[18].mxu1  ;;  %v3277_v32 = vpop.f32.mrb[19].mxu0 }
 0x130   : > { %v4768_v43 = vadd.f32 %v3277_v32, %v3276_v3  ;;  %v3365_v57 = vpop.f32.mrb[19].mxu1 }
 0x131   : > { %v4772_v51 = vadd.f32 %v3363_v2, %v4694_v60  ;;  %v3366_v10 = vadd.f32 %v3365_v57, %v3364_v38  ;;  %3734 = vmatmul.mubr.bf16.gmra.mrb[124].mxu0 %v4582_v30  ;;  %v700_v60 = vmul.f32 0.2, %v592_v22  ;;  %v1121_v38 = vrot.slane %v1119_v26, 1 }
 0x132   : > { %2315 = vmatmul.mubr.bf16.gmra.mrb[124].mxu1 %v4116_v12  ;;  %3737 = vmatprep.mubr.bf16.mxu0 %v4597_v45 }
 0x133   : > { %v4777_v54 = vadd.f32 %v3366_v10, %v4696_v29  ;;  %2322 = vmatprep.mubr.bf16.mxu1 %v4232_v6  ;;  %v754_v11 = vsel %vm646_vm12, %v592_v22, %v700_v60 }
 0x134   : > { %v3279_v48 = vpop.f32.mrb[20].mxu0  ;;  %v790_v40 = vpack.c.bf16 %v754_v11, %v754_v11 }
 0x135   : > { %v3367_v25 = vpop.f32.mrb[20].mxu1  ;;  %v3280_v13 = vpop.f32.mrb[21].mxu0 }
 0x136   : > { %v3368_v16 = vpop.f32.mrb[21].mxu1  ;;  %v4781_v12 = vadd.f32 %v3280_v13, %v3279_v48  ;;  %v3282_v8 = vpop.f32.mrb[22].mxu0 }
 0x137   : > { %v3369_v30 = vadd.f32 %v3368_v16, %v3367_v25  ;;  %v3370_v36 = vpop.f32.mrb[22].mxu1  ;;  %v3283_v53 = vpop.f32.mrb[23].mxu0 }
 0x138   : > { %v3371_v29 = vpop.f32.mrb[23].mxu1  ;;  %v4788_v45 = vadd.f32 %v3283_v53, %v3282_v8  ;;  %v1131_v8 = vrot.slane %v4783_v46, 1 }
 0x139   : > { %v4786_v6 = vadd.f32 %v3369_v30, %v4708_v14  ;;  %v3372_v41 = vadd.f32 %v3371_v29, %v3370_v36  ;;  %3738 = vmatmul.mubr.bf16.gmra.mrb[128].mxu0 %v4619_v56  ;;  %v1132_v36 = vrot.slane %v790_v40, 1 }
 0x13a   : > { %2323 = vmatmul.mubr.bf16.gmra.mrb[128].mxu1 %v4189_v23  ;;  %3741 = vmatprep.mubr.bf16.mxu0 %v4632_v4 }
 0x13b   : > { %v4793_v0 = vadd.f32 %v3372_v41, %v4714_v28  ;;  %2330 = vmatprep.mubr.bf16.mxu1 %v4285_v21  ;;  %v1117_v28 = vshrl.u32 %v4783_v46, 16  ;;  %v1124_v21 = vshll.u32 %v790_v40, 16 }
 0x13c   : > { %v3285_v14 = vpop.f32.mrb[24].mxu0 }
 0x13d   : > { %v3373_v17 = vpop.f32.mrb[24].mxu1  ;;  %v3286_v62 = vpop.f32.mrb[25].mxu0  ;;  %v1122_v10 = vor.u32 %v1121_v38, %v1117_v28  ;;  %v1126_v58 = vrot.slane %v1124_v21, 1 }
 0x13e   : > { %v3374_v27 = vpop.f32.mrb[25].mxu1  ;;  %v4798_v1 = vadd.f32 %v3286_v62, %v3285_v14  ;;  %v3288_v23 = vpop.f32.mrb[26].mxu0 }
 0x13f   : > { %v3375_v31 = vadd.f32 %v3374_v27, %v3373_v17  ;;  %v3376_v3 = vpop.f32.mrb[26].mxu1  ;;  %v3289_v56 = vpop.f32.mrb[27].mxu0 }
 0x140   : > { %v3377_v2 = vpop.f32.mrb[27].mxu1  ;;  %v4804_v32 = vadd.f32 %v3289_v56, %v3288_v23 }
 0x141   : > { %v4802_v4 = vadd.f32 %v3375_v31, %v4731_v7  ;;  %v3378_v57 = vadd.f32 %v3377_v2, %v3376_v3  ;;  %3742 = vmatmul.mubr.bf16.gmra.mrb[132].mxu0 %v4645_v19 }
 0x142   : > { %2331 = vmatmul.mubr.bf16.gmra.mrb[132].mxu1 %v4255_v37  ;;  %3745 = vmatprep.mubr.bf16.mxu0 %v4654_v61 }
 0x143   : > { %v4809_v22 = vadd.f32 %v3378_v57, %v4733_v34  ;;  %2338 = vmatprep.mubr.bf16.mxu1 %v4723_v9  ;;  %v1127_v34 = vsel %vm791_vm3, %v1122_v10, %v1126_v58 }
 0x144   : > { %v3291_v52 = vpop.f32.mrb[28].mxu0 }
 0x145   : > { %v3379_v48 = vpop.f32.mrb[28].mxu1  ;;  %v3292_v7 = vpop.f32.mrb[29].mxu0 }
 0x146   : > { %v3380_v25 = vpop.f32.mrb[29].mxu1  ;;  %v4813_v60 = vadd.f32 %v3292_v7, %v3291_v52  ;;  %v3294_v63 = vpop.f32.mrb[30].mxu0 }
 0x147   : > { %v3381_v5 = vadd.f32 %v3380_v25, %v3379_v48  ;;  %v3382_v37 = vpop.f32.mrb[30].mxu1  ;;  %v3295_v13 = vpop.f32.mrb[31].mxu0 }
 0x148   : > { %v3383_v19 = vpop.f32.mrb[31].mxu1  ;;  %v4819_v9 = vadd.f32 %v3295_v13, %v3294_v63 }
 0x149   : > { %v4817_v16 = vadd.f32 %v3381_v5, %v4743_v42  ;;  %v3384_v61 = vadd.f32 %v3383_v19, %v3382_v37  ;;  %3746 = vmatmul.mubr.bf16.gmra.mrb[136].mxu0 %v4665_v24  ;;  %v1133_v24 = vsel %vm1032_vm10, %v1131_v8, %v1132_v36 }
 0x14a   : > { %2339 = vmatmul.mubr.bf16.gmra.mrb[136].mxu1 %v4656_v18  ;;  %3749 = vmatprep.mubr.bf16.mxu0 %v4712_v49 }
 0x14b   : > { %v4824_v30 = vadd.f32 %v3384_v61, %v4748_v35  ;;  %2346 = vmatprep.mubr.bf16.mxu1 %v1127_v34 }
 0x14c   : > { %v3297_v53 = vpop.f32.mrb[32].mxu0 }
 0x14d   : > { %v3385_v29 = vpop.f32.mrb[32].mxu1  ;;  %v3298_v42 = vpop.f32.mrb[33].mxu0 }
 0x14e   : > { %v3386_v41 = vpop.f32.mrb[33].mxu1  ;;  %v4828_v11 = vadd.f32 %v3298_v42, %v3297_v53  ;;  %v3300_v14 = vpop.f32.mrb[34].mxu0 }
 0x14f   : > { %v3387_v26 = vadd.f32 %v3386_v41, %v3385_v29  ;;  %v3388_v18 = vpop.f32.mrb[34].mxu1  ;;  %v3301_v17 = vpop.f32.mrb[35].mxu0 }
 0x150   : > { %v3389_v35 = vpop.f32.mrb[35].mxu1  ;;  %v3302_v49 = vadd.f32 %v3301_v17, %v3300_v14 }
 0x151   : > { %v4832_v62 = vadd.f32 %v3387_v26, %v4766_v44  ;;  %v3390_v27 = vadd.f32 %v3389_v35, %v3388_v18  ;;  %3750 = vmatmul.mubr.bf16.gmra.mrb[140].mxu0 %v1133_v24 }
 0x152   : > { %2347 = vmatmul.mubr.bf16.gmra.mrb[140].mxu1 %v4783_v46 }
 0x153   : > { %v4836_v40 = vadd.f32 %v3390_v27, %v4768_v43 }
 0x154   : > { %v3303_v31 = vpop.f32.mrb[36].mxu0 }
 0x155   : > { %v3391_v23 = vpop.f32.mrb[36].mxu1  ;;  %v3304_v3 = vpop.f32.mrb[37].mxu0 }
 0x156   : > { %v3392_v56 = vpop.f32.mrb[37].mxu1  ;;  %v4838_v2 = vadd.f32 %v3304_v3, %v3303_v31  ;;  %v3306_v38 = vpop.f32.mrb[38].mxu0 }
 0x157   : > { %v3393_v28 = vadd.f32 %v3392_v56, %v3391_v23  ;;  %v3394_v21 = vpop.f32.mrb[38].mxu1  ;;  %v3307_v57 = vpop.f32.mrb[39].mxu0 }
 0x158   : > { %v3395_v44 = vpop.f32.mrb[39].mxu1  ;;  %v3308_v58 = vadd.f32 %v3307_v57, %v3306_v38 }
 0x159   : > { %v4841_v10 = vadd.f32 %v3393_v28, %v4781_v12  ;;  %v3396_v46 = vadd.f32 %v3395_v44, %v3394_v21 }
 0x15b   : > { %v4844_v52 = vadd.f32 %v3396_v46, %v4788_v45 }
 0x15c   : > { %v3309_v43 = vpop.f32.mrb[40].mxu0 }
 0x15d   : > { %v3397_v48 = vpop.f32.mrb[40].mxu1  ;;  %v3310_v7 = vpop.f32.mrb[41].mxu0 }
 0x15e   : > { %v3398_v25 = vpop.f32.mrb[41].mxu1  ;;  %v4846_v5 = vadd.f32 %v3310_v7, %v3309_v43  ;;  %v3312_v37 = vpop.f32.mrb[42].mxu0 }
 0x15f   : > { %v3399_v63 = vadd.f32 %v3398_v25, %v3397_v48  ;;  %v3400_v13 = vpop.f32.mrb[42].mxu1  ;;  %v3313_v19 = vpop.f32.mrb[43].mxu0 }
 0x160   : > { %v3401_v34 = vpop.f32.mrb[43].mxu1  ;;  %v4851_v12 = vadd.f32 %v3313_v19, %v3312_v37 }
 0x161   : > { %v4849_v61 = vadd.f32 %v3399_v63, %v4798_v1  ;;  %v3402_v8 = vadd.f32 %v3401_v34, %v3400_v13 }
 0x163   : > { %v4854_v45 = vadd.f32 %v3402_v8, %v4804_v32 }
 0x164   : > { %v3315_v36 = vpop.f32.mrb[44].mxu0 }
 0x165   : > { %v3403_v53 = vpop.f32.mrb[44].mxu1  ;;  %v3316_v29 = vpop.f32.mrb[45].mxu0 }
 0x166   : > { %v3404_v42 = vpop.f32.mrb[45].mxu1  ;;  %v4856_v41 = vadd.f32 %v3316_v29, %v3315_v36  ;;  %v3318_v14 = vpop.f32.mrb[46].mxu0 }
 0x167   : > { %v3405_v26 = vadd.f32 %v3404_v42, %v3403_v53  ;;  %v3406_v18 = vpop.f32.mrb[46].mxu1  ;;  %v3319_v24 = vpop.f32.mrb[47].mxu0 }
 0x168   : > { %v3407_v17 = vpop.f32.mrb[47].mxu1  ;;  %v4861_v35 = vadd.f32 %v3319_v24, %v3318_v14 }
 0x169   : > { %v4859_v1 = vadd.f32 %v3405_v26, %v4813_v60  ;;  %v3408_v27 = vadd.f32 %v3407_v17, %v3406_v18 }
 0x16b   : > { %v4864_v32 = vadd.f32 %v3408_v27, %v4819_v9 }
 0x16c   : > { %v3473_v23 = vpop.f32.mrb[48].mxu0 }
 0x16d   : > { %v3409_v31 = vpop.f32.mrb[48].mxu1  ;;  %v3474_v56 = vpop.f32.mrb[49].mxu0 }
 0x16e   : > { %v3410_v3 = vpop.f32.mrb[49].mxu1  ;;  %v3475_v38 = vadd.f32 %v3474_v56, %v3473_v23  ;;  %v3476_v57 = vpop.f32.mrb[50].mxu0 }
 0x16f   : > { %v3411_v28 = vadd.f32 %v3410_v3, %v3409_v31  ;;  %v3412_v21 = vpop.f32.mrb[50].mxu1  ;;  %v3477_v46 = vpop.f32.mrb[51].mxu0 }
 0x170   : > { %v3413_v44 = vpop.f32.mrb[51].mxu1  ;;  %v4870_v60 = vadd.f32 %v3475_v38, %v4772_v51  ;;  %v3478_v7 = vadd.f32 %v3477_v46, %v3476_v57 }
 0x171   : > { %v4867_v43 = vadd.f32 %v3411_v28, %v4828_v11  ;;  %v3414_v48 = vadd.f32 %v3413_v44, %v3412_v21 }
 0x172   : > { %v4875_v25 = vadd.f32 %v3478_v7, %v4777_v54 }
 0x173   : > { %v4872_v9 = vadd.f32 %v3414_v48, %v3302_v49 }
 0x174   : > { %v3479_v37 = vpop.f32.mrb[52].mxu0 }
 0x175   : > { %v3415_v63 = vpop.f32.mrb[52].mxu1  ;;  %v3480_v19 = vpop.f32.mrb[53].mxu0 }
 0x176   : > { %v3416_v13 = vpop.f32.mrb[53].mxu1  ;;  %v3481_v8 = vadd.f32 %v3480_v19, %v3479_v37  ;;  %v3482_v53 = vpop.f32.mrb[54].mxu0 }
 0x177   : > { %v3417_v34 = vadd.f32 %v3416_v13, %v3415_v63  ;;  %v3418_v36 = vpop.f32.mrb[54].mxu1  ;;  %v3483_v29 = vpop.f32.mrb[55].mxu0 }
 0x178   : > { %v3419_v11 = vpop.f32.mrb[55].mxu1  ;;  %v4881_v42 = vadd.f32 %v3481_v8, %v4786_v6  ;;  %v3484_v26 = vadd.f32 %v3483_v29, %v3482_v53 }
 0x179   : > { %v4878_v51 = vadd.f32 %v3417_v34, %v4838_v2  ;;  %v3420_v49 = vadd.f32 %v3419_v11, %v3418_v36 }
 0x17a   : > { %v4886_v14 = vadd.f32 %v3484_v26, %v4793_v0 }
 0x17b   : > { %v4883_v54 = vadd.f32 %v3420_v49, %v3308_v58 }
 0x17c   : > { %v3485_v24 = vpop.f32.mrb[56].mxu0 }
 0x17d   : > { %v3421_v18 = vpop.f32.mrb[56].mxu1  ;;  %v3486_v27 = vpop.f32.mrb[57].mxu0 }
 0x17e   : > { %v3422_v17 = vpop.f32.mrb[57].mxu1  ;;  %v3487_v23 = vadd.f32 %v3486_v27, %v3485_v24  ;;  %v3488_v56 = vpop.f32.mrb[58].mxu0 }
 0x17f   : > { %v3423_v31 = vadd.f32 %v3422_v17, %v3421_v18  ;;  %v3424_v3 = vpop.f32.mrb[58].mxu1  ;;  %v3489_v28 = vpop.f32.mrb[59].mxu0 }
 0x180   : > { %v3425_v2 = vpop.f32.mrb[59].mxu1  ;;  %v4892_v38 = vadd.f32 %v3487_v23, %v4802_v4  ;;  %v3490_v21 = vadd.f32 %v3489_v28, %v3488_v56 }
 0x181   : > { %v4889_v6 = vadd.f32 %v3423_v31, %v4846_v5  ;;  %v3426_v58 = vadd.f32 %v3425_v2, %v3424_v3 }
 0x182   : > { %v4898_v57 = vadd.f32 %v3490_v21, %v4809_v22 }
 0x183   : > { %v4895_v0 = vadd.f32 %v3426_v58, %v4851_v12 }
 0x184   : > { %v3491_v46 = vpop.f32.mrb[60].mxu0 }
 0x185   : > { %v3427_v44 = vpop.f32.mrb[60].mxu1  ;;  %v3492_v7 = vpop.f32.mrb[61].mxu0 }
 0x186   : > { %v3428_v48 = vpop.f32.mrb[61].mxu1  ;;  %v3493_v37 = vadd.f32 %v3492_v7, %v3491_v46  ;;  %v3494_v5 = vpop.f32.mrb[62].mxu0 }
 0x187   : > { %v3429_v63 = vadd.f32 %v3428_v48, %v3427_v44  ;;  %v3430_v13 = vpop.f32.mrb[62].mxu1  ;;  %v3495_v34 = vpop.f32.mrb[63].mxu0 }
 0x188   : > { %v3431_v19 = vpop.f32.mrb[63].mxu1  ;;  %v4904_v8 = vadd.f32 %v3493_v37, %v4817_v16  ;;  %v3496_v36 = vadd.f32 %v3495_v34, %v3494_v5 }
 0x189   : > { %v4901_v4 = vadd.f32 %v3429_v63, %v4856_v41  ;;  %v3432_v12 = vadd.f32 %v3431_v19, %v3430_v13 }
 0x18a   : > { %v4910_v53 = vadd.f32 %v3496_v36, %v4824_v30 }
 0x18b   : > { %v4907_v22 = vadd.f32 %v3432_v12, %v4861_v35 }
 0x18c   : > { %v3497_v29 = vpop.f32.mrb[64].mxu0 }
 0x18d   : > { %v3433_v11 = vpop.f32.mrb[64].mxu1  ;;  %v3498_v26 = vpop.f32.mrb[65].mxu0 }
 0x18e   : > { %v3434_v49 = vpop.f32.mrb[65].mxu1  ;;  %v3499_v24 = vadd.f32 %v3498_v26, %v3497_v29  ;;  %v3500_v41 = vpop.f32.mrb[66].mxu0 }
 0x18f   : > { %v3435_v18 = vadd.f32 %v3434_v49, %v3433_v11  ;;  %v3436_v17 = vpop.f32.mrb[66].mxu1  ;;  %v3501_v31 = vpop.f32.mrb[67].mxu0 }
 0x190   : > { %v3437_v27 = vpop.f32.mrb[67].mxu1  ;;  %v4916_v23 = vadd.f32 %v3499_v24, %v4832_v62  ;;  %v3502_v3 = vadd.f32 %v3501_v31, %v3500_v41 }
 0x191   : > { %v4913_v16 = vadd.f32 %v3435_v18, %v4698_v55  ;;  %v3438_v35 = vadd.f32 %v3437_v27, %v3436_v17 }
 0x192   : > { %v4922_v56 = vadd.f32 %v3502_v3, %v4836_v40 }
 0x193   : > { %v4919_v30 = vadd.f32 %v3438_v35, %v4700_v50 }
 0x194   : > { %v3503_v28 = vpop.f32.mrb[68].mxu0 }
 0x195   : > { %v3439_v2 = vpop.f32.mrb[68].mxu1  ;;  %v3504_v21 = vpop.f32.mrb[69].mxu0 }
 0x196   : > { %v3440_v58 = vpop.f32.mrb[69].mxu1  ;;  %v3505_v46 = vadd.f32 %v3504_v21, %v3503_v28  ;;  %v3506_v55 = vpop.f32.mrb[70].mxu0 }
 0x197   : > { %v3441_v44 = vadd.f32 %v3440_v58, %v3439_v2  ;;  %v3442_v48 = vpop.f32.mrb[70].mxu1  ;;  %v3507_v63 = vpop.f32.mrb[71].mxu0 }
 0x198   : > { %v3443_v7 = vpop.f32.mrb[71].mxu1  ;;  %v4928_v37 = vadd.f32 %v3505_v46, %v4841_v10  ;;  %v3508_v13 = vadd.f32 %v3507_v63, %v3506_v55 }
 0x199   : > { %v4925_v62 = vadd.f32 %v3441_v44, %v4720_v47  ;;  %v3444_v50 = vadd.f32 %v3443_v7, %v3442_v48 }
 0x19a   : > { %v4934_v5 = vadd.f32 %v3508_v13, %v4844_v52 }
 0x19b   : > { %v4931_v40 = vadd.f32 %v3444_v50, %v4725_v59 }
 0x19c   : > { %v3509_v34 = vpop.f32.mrb[72].mxu0 }
 0x19d   : > { %v3445_v19 = vpop.f32.mrb[72].mxu1  ;;  %v3510_v36 = vpop.f32.mrb[73].mxu0 }
 0x19e   : > { %v3446_v12 = vpop.f32.mrb[73].mxu1  ;;  %v3511_v29 = vadd.f32 %v3510_v36, %v3509_v34  ;;  %v3512_v47 = vpop.f32.mrb[74].mxu0 }
 0x19f   : > { %v3447_v11 = vadd.f32 %v3446_v12, %v3445_v19  ;;  %v3448_v49 = vpop.f32.mrb[74].mxu1  ;;  %v3513_v18 = vpop.f32.mrb[75].mxu0 }
 0x1a0   : > { %v3449_v26 = vpop.f32.mrb[75].mxu1  ;;  %v4940_v24 = vadd.f32 %v3511_v29, %v4849_v61  ;;  %v3514_v17 = vadd.f32 %v3513_v18, %v3512_v47 }
 0x1a1   : > { %v4937_v10 = vadd.f32 %v3447_v11, %v4737_v20  ;;  %v3450_v59 = vadd.f32 %v3449_v26, %v3448_v49 }
 0x1a2   : > { %v4946_v41 = vadd.f32 %v3514_v17, %v4854_v45 }
 0x1a3   : > { %v4943_v52 = vadd.f32 %v3450_v59, %v4741_v33 }
 0x1a4   : > { %v3515_v31 = vpop.f32.mrb[76].mxu0 }
 0x1a5   : > { %v3451_v27 = vpop.f32.mrb[76].mxu1  ;;  %v3516_v3 = vpop.f32.mrb[77].mxu0 }
 0x1a6   : > { %v3452_v35 = vpop.f32.mrb[77].mxu1  ;;  %v3517_v28 = vadd.f32 %v3516_v3, %v3515_v31  ;;  %v3518_v20 = vpop.f32.mrb[78].mxu0 }
 0x1a7   : > { %v3453_v2 = vadd.f32 %v3452_v35, %v3451_v27  ;;  %v3454_v58 = vpop.f32.mrb[78].mxu1  ;;  %v3519_v44 = vpop.f32.mrb[79].mxu0 }
 0x1a8   : > { %v3455_v21 = vpop.f32.mrb[79].mxu1  ;;  %v4952_v46 = vadd.f32 %v3517_v28, %v4859_v1  ;;  %v3520_v48 = vadd.f32 %v3519_v44, %v3518_v20 }
 0x1a9   : > { %v4949_v61 = vadd.f32 %v3453_v2, %v4753_v15  ;;  %v3456_v33 = vadd.f32 %v3455_v21, %v3454_v58 }
 0x1aa   : > { %v4958_v55 = vadd.f32 %v3520_v48, %v4864_v32 }
 0x1ab   : > { %v4955_v45 = vadd.f32 %v3456_v33, %v4755_v39 }
 0x1ac   : > { %v3521_v7 = vpop.f32.mrb[80].mxu0 }
 0x1ad   : > { %v3585_v63 = vpop.f32.mrb[80].mxu1  ;;  %v3522_v50 = vpop.f32.mrb[81].mxu0 }
 0x1ae   : > { %v3586_v13 = vpop.f32.mrb[81].mxu1  ;;  %v3523_v19 = vadd.f32 %v3522_v50, %v3521_v7  ;;  %v3524_v12 = vpop.f32.mrb[82].mxu0 }
 0x1af   : > { %v3587_v34 = vadd.f32 %v3586_v13, %v3585_v63  ;;  %v3588_v15 = vpop.f32.mrb[82].mxu1  ;;  %v3525_v36 = vpop.f32.mrb[83].mxu0 }
 0x1b0   : > { %v3589_v11 = vpop.f32.mrb[83].mxu1  ;;  %v4961_v1 = vadd.f32 %v3523_v19, %v4867_v43  ;;  %v3526_v29 = vadd.f32 %v3525_v36, %v3524_v12 }
 0x1b1   : > { %v3590_v49 = vadd.f32 %v3589_v11, %v3588_v15  ;;  %v4964_v39 = vadd.f32 %v3587_v34, %v4870_v60 }
 0x1b2   : > { %v4967_v32 = vadd.f32 %v3526_v29, %v4872_v9 }
 0x1b3   : > { %v4970_v47 = vadd.f32 %v3590_v49, %v4875_v25 }
 0x1b4   : > { %v3527_v26 = vpop.f32.mrb[84].mxu0 }
 0x1b5   : > { %v3591_v18 = vpop.f32.mrb[84].mxu1  ;;  %v3528_v59 = vpop.f32.mrb[85].mxu0 }
 0x1b6   : > { %v3592_v17 = vpop.f32.mrb[85].mxu1  ;;  %v3529_v27 = vadd.f32 %v3528_v59, %v3527_v26  ;;  %v3530_v35 = vpop.f32.mrb[86].mxu0 }
 0x1b7   : > { %v3593_v31 = vadd.f32 %v3592_v17, %v3591_v18  ;;  %v3594_v43 = vpop.f32.mrb[86].mxu1  ;;  %v3531_v3 = vpop.f32.mrb[87].mxu0 }
 0x1b8   : > { %v3595_v2 = vpop.f32.mrb[87].mxu1  ;;  %v4973_v28 = vadd.f32 %v3529_v27, %v4878_v51  ;;  %v3532_v60 = vadd.f32 %v3531_v3, %v3530_v35 }
 0x1b9   : > { %v3596_v58 = vadd.f32 %v3595_v2, %v3594_v43  ;;  %v4976_v9 = vadd.f32 %v3593_v31, %v4881_v42 }
 0x1ba   : > { %v4979_v25 = vadd.f32 %v3532_v60, %v4883_v54 }
 0x1bb   : > { %v4982_v20 = vadd.f32 %v3596_v58, %v4886_v14 }
 0x1bc   : > { %v3533_v21 = vpop.f32.mrb[88].mxu0 }
 0x1bd   : > { %v3597_v44 = vpop.f32.mrb[88].mxu1  ;;  %v3534_v33 = vpop.f32.mrb[89].mxu0 }
 0x1be   : > { %v3598_v48 = vpop.f32.mrb[89].mxu1  ;;  %v3535_v7 = vadd.f32 %v3534_v33, %v3533_v21  ;;  %v3536_v50 = vpop.f32.mrb[90].mxu0 }
 0x1bf   : > { %v3599_v63 = vadd.f32 %v3598_v48, %v3597_v44  ;;  %v3600_v51 = vpop.f32.mrb[90].mxu1  ;;  %v3537_v13 = vpop.f32.mrb[91].mxu0 }
 0x1c0   : > { %v3601_v19 = vpop.f32.mrb[91].mxu1  ;;  %v4985_v34 = vadd.f32 %v3535_v7, %v4889_v6  ;;  %v3538_v42 = vadd.f32 %v3537_v13, %v3536_v50 }
 0x1c1   : > { %v3602_v12 = vadd.f32 %v3601_v19, %v3600_v51  ;;  %v4988_v54 = vadd.f32 %v3599_v63, %v4892_v38 }
 0x1c2   : > { %v4991_v14 = vadd.f32 %v3538_v42, %v4895_v0 }
 0x1c3   : > { %v4994_v15 = vadd.f32 %v3602_v12, %v4898_v57 }
 0x1c4   : > { %v3539_v36 = vpop.f32.mrb[92].mxu0 }
 0x1c5   : > { %v3603_v11 = vpop.f32.mrb[92].mxu1  ;;  %v3540_v29 = vpop.f32.mrb[93].mxu0 }
 0x1c6   : > { %v3604_v49 = vpop.f32.mrb[93].mxu1  ;;  %v3541_v26 = vadd.f32 %v3540_v29, %v3539_v36  ;;  %v3542_v59 = vpop.f32.mrb[94].mxu0 }
 0x1c7   : > { %v3605_v18 = vadd.f32 %v3604_v49, %v3603_v11  ;;  %v3606_v6 = vpop.f32.mrb[94].mxu1  ;;  %v3543_v17 = vpop.f32.mrb[95].mxu0 }
 0x1c8   : > { %v3607_v27 = vpop.f32.mrb[95].mxu1  ;;  %v4997_v31 = vadd.f32 %v3541_v26, %v4901_v4  ;;  %v3544_v38 = vadd.f32 %v3543_v17, %v3542_v59 }
 0x1c9   : > { %v3608_v35 = vadd.f32 %v3607_v27, %v3606_v6  ;;  %v5000_v0 = vadd.f32 %v3605_v18, %v4904_v8 }
 0x1ca   : > { %v5003_v57 = vadd.f32 %v3544_v38, %v4907_v22 }
 0x1cb   : > { %v5006_v43 = vadd.f32 %v3608_v35, %v4910_v53 }
 0x1cc   : > { %v3545_v3 = vpop.f32.mrb[96].mxu0 }
 0x1cd   : > { %v3609_v2 = vpop.f32.mrb[96].mxu1  ;;  %v3546_v60 = vpop.f32.mrb[97].mxu0 }
 0x1ce   : > { %v3610_v58 = vpop.f32.mrb[97].mxu1  ;;  %v3547_v21 = vadd.f32 %v3546_v60, %v3545_v3  ;;  %v3548_v33 = vpop.f32.mrb[98].mxu0 }
 0x1cf   : > { %v3611_v44 = vadd.f32 %v3610_v58, %v3609_v2  ;;  %v3612_v4 = vpop.f32.mrb[98].mxu1  ;;  %v3549_v48 = vpop.f32.mrb[99].mxu0 }
 0x1d0   : > { %v3613_v7 = vpop.f32.mrb[99].mxu1  ;;  %v5009_v63 = vadd.f32 %v3547_v21, %v4913_v16  ;;  %v3550_v8 = vadd.f32 %v3549_v48, %v3548_v33 }
 0x1d1   : > { %v3614_v50 = vadd.f32 %v3613_v7, %v3612_v4  ;;  %v5012_v22 = vadd.f32 %v3611_v44, %v4916_v23 }
 0x1d2   : > { %v5015_v53 = vadd.f32 %v3550_v8, %v4919_v30 }
 0x1d3   : > { %v5018_v51 = vadd.f32 %v3614_v50, %v4922_v56 }
 0x1d4   : > { %v3551_v13 = vpop.f32.mrb[100].mxu0 }
 0x1d5   : > { %v3615_v19 = vpop.f32.mrb[100].mxu1  ;;  %v3552_v42 = vpop.f32.mrb[101].mxu0 }
 0x1d6   : > { %v3616_v12 = vpop.f32.mrb[101].mxu1  ;;  %v3553_v36 = vadd.f32 %v3552_v42, %v3551_v13  ;;  %v3554_v29 = vpop.f32.mrb[102].mxu0 }
 0x1d7   : > { %v3617_v11 = vadd.f32 %v3616_v12, %v3615_v19  ;;  %v3618_v16 = vpop.f32.mrb[102].mxu1  ;;  %v3555_v49 = vpop.f32.mrb[103].mxu0 }
 0x1d8   : > { %v3619_v26 = vpop.f32.mrb[103].mxu1  ;;  %v5021_v18 = vadd.f32 %v3553_v36, %v4925_v62  ;;  %v3556_v23 = vadd.f32 %v3555_v49, %v3554_v29 }
 0x1d9   : > { %v3620_v59 = vadd.f32 %v3619_v26, %v3618_v16  ;;  %v5024_v30 = vadd.f32 %v3617_v11, %v4928_v37 }
 0x1da   : > { %v5027_v56 = vadd.f32 %v3556_v23, %v4931_v40 }
 0x1db   : > { %v5030_v6 = vadd.f32 %v3620_v59, %v4934_v5 }
 0x1dc   : > { %v3557_v17 = vpop.f32.mrb[104].mxu0 }
 0x1dd   : > { %v3621_v27 = vpop.f32.mrb[104].mxu1  ;;  %v3558_v38 = vpop.f32.mrb[105].mxu0 }
 0x1de   : > { %v3622_v35 = vpop.f32.mrb[105].mxu1  ;;  %v3559_v3 = vadd.f32 %v3558_v38, %v3557_v17  ;;  %v3560_v60 = vpop.f32.mrb[106].mxu0 }
 0x1df   : > { %v3623_v2 = vadd.f32 %v3622_v35, %v3621_v27  ;;  %v3624_v62 = vpop.f32.mrb[106].mxu1  ;;  %v3561_v58 = vpop.f32.mrb[107].mxu0 }
 0x1e0   : > { %v3625_v21 = vpop.f32.mrb[107].mxu1  ;;  %v5033_v44 = vadd.f32 %v3559_v3, %v4937_v10  ;;  %v3562_v37 = vadd.f32 %v3561_v58, %v3560_v60 }
 0x1e1   : > { %v3626_v33 = vadd.f32 %v3625_v21, %v3624_v62  ;;  %v5036_v40 = vadd.f32 %v3623_v2, %v4940_v24 }
 0x1e2   : > { %v5039_v5 = vadd.f32 %v3562_v37, %v4943_v52 }
 0x1e3   : > { %v5042_v4 = vadd.f32 %v3626_v33, %v4946_v41 }
 0x1e4   : > { %v3563_v48 = vpop.f32.mrb[108].mxu0 }
 0x1e5   : > { %v3627_v7 = vpop.f32.mrb[108].mxu1  ;;  %v3564_v8 = vpop.f32.mrb[109].mxu0 }
 0x1e6   : > { %v3628_v50 = vpop.f32.mrb[109].mxu1  ;;  %v3565_v13 = vadd.f32 %v3564_v8, %v3563_v48  ;;  %v3566_v10 = vpop.f32.mrb[110].mxu0 }
 0x1e7   : > { %v3629_v19 = vadd.f32 %v3628_v50, %v3627_v7  ;;  %v3630_v42 = vpop.f32.mrb[110].mxu1  ;;  %v3567_v12 = vpop.f32.mrb[111].mxu0 }
 0x1e8   : > { %v3631_v36 = vpop.f32.mrb[111].mxu1  ;;  %v5045_v24 = vadd.f32 %v3565_v13, %v4949_v61  ;;  %v3568_v11 = vadd.f32 %v3567_v12, %v3566_v10 }
 0x1e9   : > { %v3632_v52 = vadd.f32 %v3631_v36, %v3630_v42  ;;  %v5048_v29 = vadd.f32 %v3629_v19, %v4952_v46 }
 0x1ea   : > { %v5051_v41 = vadd.f32 %v3568_v11, %v4955_v45 }
 0x1eb   : > { %v5054_v16 = vadd.f32 %v3632_v52, %v4958_v55 }
 0x1ec   : > { %v3723_v26 = vpop.f32.mrb[112].mxu0 }
 0x1ed   : > { %v3633_v49 = vpop.f32.mrb[112].mxu1  ;;  %v2398_v23 = vadd.f32 %v3723_v26, %v4976_v9  ;;  %v2389_v17 = vpop.f32.mrb[113].mxu0 }
 0x1ee   : > { %v3634_v59 = vpop.f32.mrb[113].mxu1  ;;  %v2390_v27 = vadd.f32 %v2389_v17, %v4964_v39  ;;  %v3724_v35 = vpop.f32.mrb[114].mxu0 }
 0x1ef   : > { %v3635_v61 = vadd.f32 %v3634_v59, %v3633_v49  ;;  %v3636_v38 = vpop.f32.mrb[114].mxu1  ;;  %v2401_v46 = vadd.f32 %v3724_v35, %v4982_v20  ;;  %v2392_v45 = vpop.f32.mrb[115].mxu0  ;;  %v2716_v37 = vmul.f32 %v2398_v23, %v2398_v23 }
 0x1f0   : > { %v3637_v3 = vpop.f32.mrb[115].mxu1  ;;  %v2393_v9 = vadd.f32 %v2392_v45, %v4970_v47  ;;  %v2714_v39 = vmul.f32 %v2390_v27, %v2390_v27 }
 0x1f1   : > { %v3638_v55 = vadd.f32 %v3637_v3, %v3636_v38  ;;  %v5067_v2 = vadd.f32 %v3635_v61, %v4961_v1  ;;  %v3139_v60 = vpack.c.bf16 %v2401_v46, %v2398_v23  ;;  %v2717_v50 = vmul.f32 %v2401_v46, %v2401_v46 }
 0x1f2   : > { %v3134_v62 = vpack.c.bf16 %v2393_v9, %v2390_v27  ;;  %v2676_v58 = vadd.f32 %v2393_v9, %v2390_v27  ;;  %v2715_v20 = vmul.f32 %v2393_v9, %v2393_v9 }
 0x1f3   : > { %v5070_v21 = vadd.f32 %v3638_v55, %v4967_v32  ;;  %3218 = vst [vmem:[%s5063_s22 + $0x8] sm:$0xff] %v3139_v60  }
 0x1f4   : > { %3135 = vst [vmem:[%s5063_s22] sm:$0xff] %v3134_v62   ;;  %v2677_v33 = vadd.f32 %v2676_v58, %v2398_v23  ;;  %v2746_v48 = vadd.f32 %v2715_v20, %v2714_v39  ;;  %v3727_v8 = vpop.f32.mrb[116].mxu0 }
 0x1f5   : > { %v3639_v7 = vpop.f32.mrb[116].mxu1  ;;  %v2414_v47 = vadd.f32 %v3727_v8, %v5000_v0  ;;  %v2405_v13 = vpop.f32.mrb[117].mxu0 }
 0x1f6   : > { %v3640_v1 = vpop.f32.mrb[117].mxu1  ;;  %v2747_v19 = vadd.f32 %v2746_v48, %v2716_v37  ;;  %v2406_v42 = vadd.f32 %v2405_v13, %v4988_v54  ;;  %v2678_v12 = vadd.f32 %v2677_v33, %v2401_v46  ;;  %v3728_v36 = vpop.f32.mrb[118].mxu0 }
 0x1f7   : > { %v3641_v10 = vadd.f32 %v3640_v1, %v3639_v7  ;;  %v3642_v32 = vpop.f32.mrb[118].mxu1  ;;  %v2417_v11 = vadd.f32 %v3728_v36, %v5006_v43  ;;  %v2408_v49 = vpop.f32.mrb[119].mxu0  ;;  %v2720_v55 = vmul.f32 %v2414_v47, %v2414_v47 }
 0x1f8   : > { %v3643_v52 = vpop.f32.mrb[119].mxu1  ;;  %v2679_v26 = vadd.f32 %v2678_v12, %v2406_v42  ;;  %v2718_v23 = vmul.f32 %v2406_v42, %v2406_v42  ;;  %v2748_v59 = vadd.f32 %v2747_v19, %v2717_v50  ;;  %v2409_v61 = vadd.f32 %v2408_v49, %v4994_v15 }
 0x1f9   : > { %v3644_v17 = vadd.f32 %v3643_v52, %v3642_v32  ;;  %v3149_v0 = vpack.c.bf16 %v2417_v11, %v2414_v47  ;;  %v5079_v27 = vadd.f32 %v3641_v10, %v4973_v28  ;;  %v2721_v37 = vmul.f32 %v2417_v11, %v2417_v11 }
 0x1fa   : > { %v2749_v54 = vadd.f32 %v2748_v59, %v2718_v23  ;;  %v3144_v35 = vpack.c.bf16 %v2409_v61, %v2406_v42  ;;  %v2680_v43 = vadd.f32 %v2679_v26, %v2409_v61  ;;  %v2719_v46 = vmul.f32 %v2409_v61, %v2409_v61 }
 0x1fb   : > { %v5082_v38 = vadd.f32 %v3644_v17, %v4979_v25  ;;  %3220 = vst [vmem:[%s5063_s22 + $0x18] sm:$0xff] %v3149_v0  }
 0x1fc   : > { %v3731_v45 = vpop.f32.mrb[120].mxu0  ;;  %3219 = vst [vmem:[%s5063_s22 + $0x10] sm:$0xff] %v3144_v35   ;;  %v2681_v9 = vadd.f32 %v2680_v43, %v2414_v47  ;;  %v2750_v39 = vadd.f32 %v2749_v54, %v2719_v46 }
 0x1fd   : > { %v3645_v3 = vpop.f32.mrb[120].mxu1  ;;  %v2430_v60 = vadd.f32 %v3731_v45, %v5024_v30  ;;  %v2421_v62 = vpop.f32.mrb[121].mxu0 }
 0x1fe   : > { %v3646_v15 = vpop.f32.mrb[121].mxu1  ;;  %v2422_v58 = vadd.f32 %v2421_v62, %v5012_v22  ;;  %v3732_v25 = vpop.f32.mrb[122].mxu0  ;;  %v2751_v33 = vadd.f32 %v2750_v39, %v2720_v55  ;;  %v2682_v48 = vadd.f32 %v2681_v9, %v2417_v11 }
 0x1ff   : > { %v3647_v28 = vadd.f32 %v3646_v15, %v3645_v3  ;;  %v3648_v20 = vpop.f32.mrb[122].mxu1  ;;  %v2433_v7 = vadd.f32 %v3732_v25, %v5030_v6  ;;  %v2424_v50 = vpop.f32.mrb[123].mxu0  ;;  %v2724_v49 = vmul.f32 %v2430_v60, %v2430_v60 }
 0x200   : > { %v3649_v8 = vpop.f32.mrb[123].mxu1  ;;  %v2722_v47 = vmul.f32 %v2422_v58, %v2422_v58  ;;  %v2425_v30 = vadd.f32 %v2424_v50, %v5018_v51  ;;  %v2683_v19 = vadd.f32 %v2682_v48, %v2422_v58  ;;  %v2752_v22 = vadd.f32 %v2751_v33, %v2721_v37 }
 0x201   : > { %v3650_v1 = vadd.f32 %v3649_v8, %v3648_v20  ;;  %v5091_v13 = vadd.f32 %v3647_v28, %v4985_v34  ;;  %v3159_v10 = vpack.c.bf16 %v2433_v7, %v2430_v60 }
 0x202   : > { %v3154_v42 = vpack.c.bf16 %v2425_v30, %v2422_v58  ;;  %v2723_v12 = vmul.f32 %v2425_v30, %v2425_v30  ;;  %v2753_v36 = vadd.f32 %v2752_v22, %v2722_v47  ;;  %v2684_v6 = vadd.f32 %v2683_v19, %v2425_v30 }
 0x203   : > { %v5094_v32 = vadd.f32 %v3650_v1, %v4991_v14  ;;  %3222 = vst [vmem:[%s5063_s22 + $0x28] sm:$0xff] %v3159_v10   ;;  %v2725_v14 = vmul.f32 %v2433_v7, %v2433_v7 }
 0x204   : > { %3221 = vst [vmem:[%s5063_s22 + $0x20] sm:$0xff] %v3154_v42   ;;  %v3735_v52 = vpop.f32.mrb[124].mxu0  ;;  %v2685_v26 = vadd.f32 %v2684_v6, %v2430_v60  ;;  %v2754_v51 = vadd.f32 %v2753_v36, %v2723_v12 }
 0x205   : > { %v3651_v11 = vpop.f32.mrb[124].mxu1  ;;  %v2446_v34 = vadd.f32 %v3735_v52, %v5048_v29  ;;  %v2437_v59 = vpop.f32.mrb[125].mxu0 }
 0x206   : > { %v3652_v23 = vpop.f32.mrb[125].mxu1  ;;  %v2438_v0 = vadd.f32 %v2437_v59, %v5036_v40  ;;  %v3736_v54 = vpop.f32.mrb[126].mxu0  ;;  %v2755_v35 = vadd.f32 %v2754_v51, %v2724_v49  ;;  %v2686_v43 = vadd.f32 %v2685_v26, %v2433_v7 }
 0x207   : > { %v3653_v17 = vadd.f32 %v3652_v23, %v3651_v11  ;;  %v3654_v61 = vpop.f32.mrb[126].mxu1  ;;  %v2449_v46 = vadd.f32 %v3736_v54, %v5054_v16  ;;  %v2440_v45 = vpop.f32.mrb[127].mxu0  ;;  %v2728_v33 = vmul.f32 %v2446_v34, %v2446_v34 }
 0x208   : > { %v3655_v3 = vpop.f32.mrb[127].mxu1  ;;  %v2726_v55 = vmul.f32 %v2438_v0, %v2438_v0  ;;  %v2441_v29 = vadd.f32 %v2440_v45, %v5042_v4  ;;  %v2687_v60 = vadd.f32 %v2686_v43, %v2438_v0  ;;  %v2756_v15 = vadd.f32 %v2755_v35, %v2725_v14 }
 0x209   : > { %v3656_v9 = vadd.f32 %v3655_v3, %v3654_v61  ;;  %v2317_v39 = vadd.f32 %v3653_v17, %v4997_v31  ;;  %v3169_v40 = vpack.c.bf16 %v2449_v46, %v2446_v34  ;;  %v2729_v19 = vmul.f32 %v2449_v46, %v2449_v46 }
 0x20a   : > { %v3164_v62 = vpack.c.bf16 %v2441_v29, %v2438_v0  ;;  %v2727_v28 = vmul.f32 %v2441_v29, %v2441_v29  ;;  %v2757_v20 = vadd.f32 %v2756_v15, %v2726_v55  ;;  %v2688_v25 = vadd.f32 %v2687_v60, %v2441_v29 }
 0x20b   : > { %v2320_v58 = vadd.f32 %v3656_v9, %v5003_v57  ;;  %3224 = vst [vmem:[%s5063_s22 + $0x38] sm:$0xff] %v3169_v40  }
 0x20c   : > { %3223 = vst [vmem:[%s5063_s22 + $0x30] sm:$0xff] %v3164_v62   ;;  %v3739_v37 = vpop.f32.mrb[128].mxu0  ;;  %v2689_v48 = vadd.f32 %v2688_v25, %v2446_v34  ;;  %v2758_v7 = vadd.f32 %v2757_v20, %v2727_v28 }
 0x20d   : > { %v3657_v16 = vpop.f32.mrb[128].mxu1  ;;  %v2462_v4 = vadd.f32 %v3739_v37, %v5079_v27  ;;  %v2453_v31 = vpop.f32.mrb[129].mxu0 }
 0x20e   : > { %v3658_v8 = vpop.f32.mrb[129].mxu1  ;;  %v2454_v47 = vadd.f32 %v2453_v31, %v5067_v2  ;;  %v3740_v30 = vpop.f32.mrb[130].mxu0  ;;  %v2759_v57 = vadd.f32 %v2758_v7, %v2728_v33  ;;  %v2690_v22 = vadd.f32 %v2689_v48, %v2449_v46 }
 0x20f   : > { %v3659_v50 = vadd.f32 %v3658_v8, %v3657_v16  ;;  %v3660_v1 = vpop.f32.mrb[130].mxu1  ;;  %v2465_v10 = vadd.f32 %v3740_v30, %v5082_v38  ;;  %v2456_v12 = vpop.f32.mrb[131].mxu0  ;;  %v2732_v0 = vmul.f32 %v2462_v4, %v2462_v4 }
 0x210   : > { %v3661_v42 = vpop.f32.mrb[131].mxu1  ;;  %v2730_v36 = vmul.f32 %v2454_v47, %v2454_v47  ;;  %v2457_v27 = vadd.f32 %v2456_v12, %v5070_v21  ;;  %v2691_v52 = vadd.f32 %v2690_v22, %v2454_v47  ;;  %v2760_v49 = vadd.f32 %v2759_v57, %v2729_v19 }
 0x211   : > { %v3662_v6 = vadd.f32 %v3661_v42, %v3660_v1  ;;  %v2325_v11 = vadd.f32 %v3659_v50, %v5009_v63  ;;  %v3179_v2 = vpack.c.bf16 %v2465_v10, %v2462_v4  ;;  %v2733_v45 = vmul.f32 %v2465_v10, %v2465_v10 }
 0x212   : > { %v3174_v26 = vpack.c.bf16 %v2457_v27, %v2454_v47  ;;  %v2731_v51 = vmul.f32 %v2457_v27, %v2457_v27  ;;  %v2761_v23 = vadd.f32 %v2760_v49, %v2730_v36  ;;  %v2692_v59 = vadd.f32 %v2691_v52, %v2457_v27 }
 0x213   : > { %v2328_v34 = vadd.f32 %v3662_v6, %v5015_v53  ;;  %3226 = vst [vmem:[%s5063_s22 + $0x48] sm:$0xff] %v3179_v2  }
 0x214   : > { %3225 = vst [vmem:[%s5063_s22 + $0x40] sm:$0xff] %v3174_v26   ;;  %v3743_v17 = vpop.f32.mrb[132].mxu0  ;;  %v2693_v61 = vadd.f32 %v2692_v59, %v2462_v4  ;;  %v2762_v54 = vadd.f32 %v2761_v23, %v2731_v51 }
 0x215   : > { %v3663_v38 = vpop.f32.mrb[132].mxu1  ;;  %v2478_v14 = vadd.f32 %v3743_v17, %v2317_v39  ;;  %v2469_v35 = vpop.f32.mrb[133].mxu0 }
 0x216   : > { %v3664_v21 = vpop.f32.mrb[133].mxu1  ;;  %v2470_v43 = vadd.f32 %v2469_v35, %v5091_v13  ;;  %v3744_v3 = vpop.f32.mrb[134].mxu0  ;;  %v2763_v55 = vadd.f32 %v2762_v54, %v2732_v0  ;;  %v2694_v53 = vadd.f32 %v2693_v61, %v2465_v10 }
 0x217   : > { %v3665_v63 = vadd.f32 %v3664_v21, %v3663_v38  ;;  %v3666_v46 = vpop.f32.mrb[134].mxu1  ;;  %v2481_v9 = vadd.f32 %v3744_v3, %v2320_v58  ;;  %v2472_v60 = vpop.f32.mrb[135].mxu0  ;;  %v2736_v4 = vmul.f32 %v2478_v14, %v2478_v14 }
 0x218   : > { %v3667_v29 = vpop.f32.mrb[135].mxu1  ;;  %v2734_v15 = vmul.f32 %v2470_v43, %v2470_v43  ;;  %v2473_v62 = vadd.f32 %v2472_v60, %v5094_v32  ;;  %v2695_v28 = vadd.f32 %v2694_v53, %v2470_v43  ;;  %v2764_v20 = vadd.f32 %v2763_v55, %v2733_v45 }
 0x219   : > { %v3668_v40 = vadd.f32 %v3667_v29, %v3666_v46  ;;  %v2333_v39 = vadd.f32 %v3665_v63, %v5021_v18  ;;  %v3189_v25 = vpack.c.bf16 %v2481_v9, %v2478_v14  ;;  %v2737_v57 = vmul.f32 %v2481_v9, %v2481_v9 }
 0x21a   : > { %v3184_v13 = vpack.c.bf16 %v2473_v62, %v2470_v43  ;;  %v2735_v16 = vmul.f32 %v2473_v62, %v2473_v62  ;;  %v2765_v33 = vadd.f32 %v2764_v20, %v2734_v15  ;;  %v2696_v48 = vadd.f32 %v2695_v28, %v2473_v62 }
 0x21b   : > { %v2336_v37 = vadd.f32 %v3668_v40, %v5027_v56  ;;  %3228 = vst [vmem:[%s5063_s22 + $0x58] sm:$0xff] %v3189_v25  }
 0x21c   : > { %3227 = vst [vmem:[%s5063_s22 + $0x50] sm:$0xff] %v3184_v13   ;;  %v3747_v7 = vpop.f32.mrb[136].mxu0  ;;  %v2697_v8 = vadd.f32 %v2696_v48, %v2478_v14  ;;  %v2766_v31 = vadd.f32 %v2765_v33, %v2735_v16 }
 0x21d   : > { %v3669_v58 = vpop.f32.mrb[136].mxu1  ;;  %v2494_v50 = vadd.f32 %v3747_v7, %v2333_v39  ;;  %v2485_v47 = vpop.f32.mrb[137].mxu0 }
 0x21e   : > { %v3670_v32 = vpop.f32.mrb[137].mxu1  ;;  %v2486_v1 = vadd.f32 %v2485_v47, %v2325_v11  ;;  %v3748_v19 = vpop.f32.mrb[138].mxu0  ;;  %v2767_v22 = vadd.f32 %v2766_v31, %v2736_v4  ;;  %v2698_v56 = vadd.f32 %v2697_v8, %v2481_v9 }
 0x21f   : > { %v3671_v18 = vadd.f32 %v3670_v32, %v3669_v58  ;;  %v3672_v30 = vpop.f32.mrb[138].mxu1  ;;  %v2497_v10 = vadd.f32 %v3748_v19, %v2336_v37  ;;  %v2488_v12 = vpop.f32.mrb[139].mxu0  ;;  %v2740_v61 = vmul.f32 %v2494_v50, %v2494_v50 }
 0x220   : > { %v3673_v42 = vpop.f32.mrb[139].mxu1  ;;  %v2738_v36 = vmul.f32 %v2486_v1, %v2486_v1  ;;  %v2489_v27 = vadd.f32 %v2488_v12, %v2328_v34  ;;  %v2699_v49 = vadd.f32 %v2698_v56, %v2486_v1  ;;  %v2768_v2 = vadd.f32 %v2767_v22, %v2737_v57 }
 0x221   : > { %v3674_v6 = vadd.f32 %v3673_v42, %v3672_v30  ;;  %v2341_v52 = vadd.f32 %v3671_v18, %v5033_v44  ;;  %v3199_v26 = vpack.c.bf16 %v2497_v10, %v2494_v50  ;;  %v2741_v46 = vmul.f32 %v2497_v10, %v2497_v10 }
 0x222   : > { %v3194_v51 = vpack.c.bf16 %v2489_v27, %v2486_v1  ;;  %v2739_v11 = vmul.f32 %v2489_v27, %v2489_v27  ;;  %v2769_v59 = vadd.f32 %v2768_v2, %v2738_v36  ;;  %v2700_v38 = vadd.f32 %v2699_v49, %v2489_v27 }
 0x223   : > { %v2344_v23 = vadd.f32 %v3674_v6, %v5039_v5  ;;  %3230 = vst [vmem:[%s5063_s22 + $0x68] sm:$0xff] %v3199_v26  }
 0x224   : > { %3229 = vst [vmem:[%s5063_s22 + $0x60] sm:$0xff] %v3194_v51   ;;  %v3751_v0 = vpop.f32.mrb[140].mxu0  ;;  %v2701_v54 = vadd.f32 %v2700_v38, %v2494_v50  ;;  %v2770_v14 = vadd.f32 %v2769_v59, %v2739_v11 }
 0x225   : > { %v3675_v17 = vpop.f32.mrb[140].mxu1  ;;  %v2501_v34 = vpop.f32.mrb[141].mxu0 }
 0x226   : > { %v3676_v21 = vpop.f32.mrb[141].mxu1  ;;  %v2502_v44 = vadd.f32 %v2501_v34, %v2341_v52  ;;  %v3752_v43 = vpop.f32.mrb[142].mxu0  ;;  %v2771_v3 = vadd.f32 %v2770_v14, %v2740_v61  ;;  %v2702_v45 = vadd.f32 %v2701_v54, %v2497_v10 }
 0x227   : > { %v3677_v35 = vadd.f32 %v3676_v21, %v3675_v17  ;;  %v3678_v63 = vpop.f32.mrb[142].mxu1  ;;  %v2504_v5 = vpop.f32.mrb[143].mxu0 }
 0x228   : > { %v3679_v55 = vpop.f32.mrb[143].mxu1  ;;  %v2742_v9 = vmul.f32 %v2502_v44, %v2502_v44  ;;  %v2505_v60 = vadd.f32 %v2504_v5, %v2344_v23  ;;  %v2703_v15 = vadd.f32 %v2702_v45, %v2502_v44  ;;  %v2772_v40 = vadd.f32 %v2771_v3, %v2741_v46 }
 0x229   : > { %v2349_v53 = vadd.f32 %v3677_v35, %v5045_v24  ;;  %v3680_v29 = vadd.f32 %v3679_v55, %v3678_v63 }
 0x22a   : > { %v3204_v28 = vpack.c.bf16 %v2505_v60, %v2502_v44  ;;  %v2743_v20 = vmul.f32 %v2505_v60, %v2505_v60  ;;  %v2773_v25 = vadd.f32 %v2772_v40, %v2742_v9  ;;  %v2704_v13 = vadd.f32 %v2703_v15, %v2505_v60 }
 0x22b   : > { %v2510_v62 = vadd.f32 %v3751_v0, %v2349_v53  ;;  %v2352_v39 = vadd.f32 %v3680_v29, %v5051_v41 }
 0x22c   : > { %3231 = vst [vmem:[%s5063_s22 + $0x70] sm:$0xff] %v3204_v28   ;;  %v2774_v48 = vadd.f32 %v2773_v25, %v2743_v20 }
 0x22d   : > { %v2744_v16 = vmul.f32 %v2510_v62, %v2510_v62  ;;  %v2513_v37 = vadd.f32 %v3752_v43, %v2352_v39  ;;  %v2705_v33 = vadd.f32 %v2704_v13, %v2510_v62 }
 0x22f   : > { %v3209_v24 = vpack.c.bf16 %v2513_v37, %v2510_v62  ;;  %v2745_v58 = vmul.f32 %v2513_v37, %v2513_v37  ;;  %v2706_v7 = vadd.f32 %v2705_v33, %v2513_v37  ;;  %v2775_v4 = vadd.f32 %v2774_v48, %v2744_v16 }
 0x231   : > { %3232 = vst [vmem:[%s5063_s22 + $0x78] sm:$0xff] %v3209_v24   ;;  %v2707_v8 = vrot.slane %v2706_v7, 4  ;;  %v2776_v31 = vadd.f32 %v2775_v4, %v2745_v58 }
 0x233   : > { %v2708_v50 = vadd.f32 %v2707_v8, %v2706_v7  ;;  %v2777_v32 = vrot.slane %v2776_v31, 4 }
 0x235   : > { %v2709_v41 = vrot.slane %v2708_v50, 2  ;;  %v2778_v47 = vadd.f32 %v2777_v32, %v2776_v31 }
 0x237   : > { %v2710_v18 = vadd.f32 %v2709_v41, %v2708_v50  ;;  %v2779_v1 = vrot.slane %v2778_v47, 2 }
 0x239   : > { %v2711_v30 = vrot.slane %v2710_v18, 1  ;;  %v2780_v19 = vadd.f32 %v2779_v1, %v2778_v47 }
 0x23b   : > { %v2712_v57 = vadd.f32 %v2711_v30, %v2710_v18  ;;  %v2781_v22 = vrot.slane %v2780_v19, 1 }
 0x23d   : > { %2713 = vst [vmem:[%s365_s7] sm:$0x1] %v2712_v57  ;;  %v2782_v56 = vadd.f32 %v2781_v22, %v2780_v19 }
 0x23f   : > { %2783 = vst [vmem:[%s365_s7 + $0x1] sm:$0x1] %v2782_v56 }
 0x240 PF: > { %s16_s20 = sadd.s32 1, %s3892_s20   ;;  %s5147_s18 = smov %s3888_s19 }
 0x241   : > { %p13_p5 = scmp.ge.s32.totalorder %s16_s20, 4   ;;  %s5148_s19 = smov %s5150_s21 }
 0x243   :  { %15 = sbr.rel (!%p13_p5) target bundleno = 2 (0x2), region = 81 }

</bundles_post_ra>
